<compile_context>
chip_gen: v6e
topology: v6e:2x2x1
jax: 0.10.0
libtpu: 0.0.40
codegen_flags: <defaults>
</compile_context>

<pallas_src>
import functools
import math

import jax
import jax.numpy as jnp
import numpy as np
from jax import lax
from jax.experimental import pallas as pl
from jax.experimental.pallas import tpu as pltpu

# Full-f32 MXU passes in BOTH the kernel and the reference so they agree to
# f32 rounding (enables the tight 1e-4 check requested by the review).
_PREC = lax.Precision.HIGHEST


def _dot(a, b):
    return jnp.dot(a, b, preferred_element_type=jnp.float32, precision=_PREC)


# --------------------------------------------------------------------------
# Fused kernel: static self-attn + memory cross-attn + dim_reduce + cross-attn
# --------------------------------------------------------------------------
def fused_kernel(num_heads, N, L, M, E,
                 x_ref, mem_ref,
                 s_win_ref, s_bin_ref,          # static attn: packed (E,3E) in-proj
                 wq_ref, bq_ref,                # [memory, cross] q proj   (2,E,E)
                 wkv_ref, bkv_ref,              # [memory, cross] kv proj  (2,E,2E)
                 wo_ref, bo_ref,                # [static, memory, cross] out proj
                 dr_w_ref, dr_b_ref,            # dim_reduce (2E,E) + (1,E)
                 o_ref):
    xf = x_ref[...]                             # (N*L, E) batch-major tokens
    mf = mem_ref[...]                           # (N*M, E)

    def attend(q, k, v, Lq, Lk, heads, wo, bo):
        """q: (N*Lq, E), k/v: (N*Lk, E); heads are lane slices of width hd."""
        hd = E // heads
        q = q * (1.0 / math.sqrt(hd))           # single VPU multiply
        ctx_heads = []
        for h in range(heads):                  # heads <= 4, tiny loop body
            lo, hi = h * hd, (h + 1) * hd
            q3 = q[:, lo:hi].reshape(N, Lq, hd)
            k3 = k[:, lo:hi].reshape(N, Lk, hd)
            v3 = v[:, lo:hi].reshape(N, Lk, hd)
            s = jnp.einsum('nqd,nkd->nqk', q3, k3,
                           preferred_element_type=jnp.float32, precision=_PREC)
            s = s - jnp.max(s, axis=-1, keepdims=True)
            p = jnp.exp(s)
            p = p / jnp.sum(p, axis=-1, keepdims=True)   # exact reciprocal
            ctx = jnp.einsum('nqk,nkd->nqd', p, v3,
                             preferred_element_type=jnp.float32, precision=_PREC)
            ctx_heads.append(ctx.reshape(N * Lq, hd))
        ctx = ctx_heads[0] if heads == 1 else jnp.concatenate(ctx_heads, axis=-1)
        return _dot(ctx, wo) + bo               # single out-projection matmul

    # --- static self-attention (1 head): one packed (E,3E) projection ------
    qkv = _dot(xf, s_win_ref[...]) + s_bin_ref[...]
    static_out = attend(qkv[:, :E], qkv[:, E:2 * E], qkv[:, 2 * E:],
                        L, L, 1, wo_ref[0], bo_ref[0])

    # --- memory cross-attention (num_heads): q from x, packed KV from memory
    mq = _dot(xf, wq_ref[0]) + bq_ref[0]
    mkv = _dot(mf, wkv_ref[0]) + bkv_ref[0]
    memory_out = attend(mq, mkv[:, :E], mkv[:, E:], L, M, num_heads,
                        wo_ref[1], bo_ref[1])

    # --- dim_reduce(cat([static, memory], -1)): one (2E,E) matmul ----------
    combined = _dot(jnp.concatenate([static_out, memory_out], axis=-1),
                    dr_w_ref[...]) + dr_b_ref[...]

    # --- cross attention (num_heads): q from x, packed KV from combined ----
    cq = _dot(xf, wq_ref[1]) + bq_ref[1]
    ckv = _dot(combined, wkv_ref[1]) + bkv_ref[1]
    cross = attend(cq, ckv[:, :E], ckv[:, E:], L, L, num_heads,
                   wo_ref[2], bo_ref[2])

    # Leading-dim split only (no in-kernel relayout); wrapper does one small
    # transpose back to the PyTorch (L, N, E) convention.
    o_ref[...] = cross.reshape(N, L, E).astype(o_ref.dtype)


# --------------------------------------------------------------------------
# One-time weight preprocessing (host side, outside jit)
# --------------------------------------------------------------------------
def prepare_weights(params):
    """Transpose for x @ W, pack K/V, stack per-attention tensors (12 operands)."""
    def qkv_split(p):
        w_t = p["in_w"].T                                   # (E, 3E)
        e = w_t.shape[0]
        return w_t[:, :e], p["in_b"][:, :e], w_t[:, e:], p["in_b"][:, e:]

    m = qkv_split(params["memory"])
    c = qkv_split(params["cross"])
    return dict(
        s_win=params["static"]["in_w"].T,                   # (E, 3E)
        s_bin=params["static"]["in_b"],                     # (1, 3E)
        wq=jnp.stack([m[0], c[0]]),                         # (2, E, E)
        bq=jnp.stack([m[1], c[1]]),                         # (2, 1, E)
        wkv=jnp.stack([m[2], c[2]]),                        # (2, E, 2E)
        bkv=jnp.stack([m[3], c[3]]),                        # (2, 1, 2E)
        wo=jnp.stack([params[k]["out_w"].T
                      for k in ("static", "memory", "cross")]),   # (3, E, E)
        bo=jnp.stack([params[k]["out_b"]
                      for k in ("static", "memory", "cross")]),   # (3, 1, E)
        dr_w=params["dr_w"].T,                              # (2E, E)
        dr_b=params["dr_b"],                                # (1, E)
    )


def _cost_estimate(N, L, M, E, H):
    def mha_flops(Lq, Lk):
        proj = 2 * N * (Lq + 2 * Lk) * E * E
        attn = 2 * 2 * N * Lq * Lk * E
        outp = 2 * N * Lq * E * E
        return proj + attn + outp
    flops = (mha_flops(L, L) + mha_flops(L, M) + mha_flops(L, L)
             + 2 * 2 * N * L * E * E)
    transcendentals = N * L * (L + H * M + H * L)
    nbytes = 4 * (2 * N * L * E + N * M * E
                  + 3 * (4 * E * E + 4 * E) + 2 * E * E + E)
    return pl.CostEstimate(flops=int(flops),
                           transcendentals=int(transcendentals),
                           bytes_accessed=int(nbytes))


def transformer_memory_forward(x, memory, w, num_heads):
    """x: (L, N, E), memory: (M, N, E) -> (L, N, E) (PyTorch convention)."""
    L, N, E = x.shape
    M = memory.shape[0]

    # Batch-major flat activations (one tiny relayout per input in XLA).
    xf = jnp.transpose(x, (1, 0, 2)).reshape(N * L, E)
    mf = jnp.transpose(memory, (1, 0, 2)).reshape(N * M, E)

    out = pl.pallas_call(
        functools.partial(fused_kernel, num_heads, N, L, M, E),
        out_shape=jax.ShapeDtypeStruct((N, L, E), jnp.float32),
        cost_estimate=_cost_estimate(N, L, M, E, num_heads),
    )(xf, mf, w["s_win"], w["s_bin"], w["wq"], w["bq"], w["wkv"], w["bkv"],
      w["wo"], w["bo"], w["dr_w"], w["dr_b"])

    return jnp.transpose(out, (1, 0, 2))        # (L, N, E)


# --------------------------------------------------------------------------
# Independent pure-JAX reference (mirrors nn.MultiheadAttention math directly
# from the packed in_proj weights; does NOT reuse the kernel's helpers).
# --------------------------------------------------------------------------
def _ref_mha(xq, xkv, in_w, in_b, out_w, out_b, num_heads):
    Lq, E = xq.shape
    Lk = xkv.shape[0]
    hd = E // num_heads
    q = jnp.dot(xq, in_w[0:E].T, precision=_PREC) + in_b[0, 0:E]
    k = jnp.dot(xkv, in_w[E:2 * E].T, precision=_PREC) + in_b[0, E:2 * E]
    v = jnp.dot(xkv, in_w[2 * E:].T, precision=_PREC) + in_b[0, 2 * E:]
    q = q.reshape(Lq, num_heads, hd).transpose(1, 0, 2) * (1.0 / math.sqrt(hd))
    k = k.reshape(Lk, num_heads, hd).transpose(1, 0, 2)
    v = v.reshape(Lk, num_heads, hd).transpose(1, 0, 2)
    s = jnp.einsum('hqd,hkd->hqk', q, k, precision=_PREC)
    p = jax.nn.softmax(s, axis=-1)
    ctx = jnp.einsum('hqk,hkd->hqd', p, v, precision=_PREC)
    ctx = ctx.transpose(1, 0, 2).reshape(Lq, E)
    return jnp.dot(ctx, out_w.T, precision=_PREC) + out_b[0]


def ref_forward(x, memory, params, num_heads):
    def one(x_i, mem_i):
        s, m, c = params["static"], params["memory"], params["cross"]
        so = _ref_mha(x_i, x_i, s["in_w"], s["in_b"], s["out_w"], s["out_b"], 1)
        mo = _ref_mha(x_i, mem_i, m["in_w"], m["in_b"], m["out_w"], m["out_b"],
                      num_heads)
        comb = jnp.dot(jnp.concatenate([so, mo], axis=-1), params["dr_w"].T,
                       precision=_PREC) + params["dr_b"][0]
        return _ref_mha(x_i, comb, c["in_w"], c["in_b"], c["out_w"], c["out_b"],
                        num_heads)

    xb = jnp.transpose(x, (1, 0, 2))
    memb = jnp.transpose(memory, (1, 0, 2))
    out = jax.vmap(one)(xb, memb)               # (N, L, E)
    return jnp.transpose(out, (1, 0, 2))


def init_attn(key, E):
    k1, k2, k3, k4 = jax.random.split(key, 4)
    return {
        "in_w": jax.random.normal(k1, (3 * E, E), jnp.float32) / math.sqrt(E),
        "in_b": jax.random.normal(k2, (1, 3 * E), jnp.float32) * 0.02,
        "out_w": jax.random.normal(k3, (E, E), jnp.float32) / math.sqrt(E),
        "out_b": jax.random.normal(k4, (1, E), jnp.float32) * 0.02,
    }


if __name__ == "__main__":
    # Small shapes implied by the module: seq=8, batch=2, embed=32,
    # num_heads=4, memory_size=8.
    E, H, MEM, L, N = 32, 4, 8, 8, 2

    key = jax.random.PRNGKey(0)
    keys = jax.random.split(key, 8)

    x = jax.random.normal(keys[0], (L, N, E), jnp.float32)
    # self.memory lazy init: randn(memory_size, batch, embed) -> explicit input
    memory = jax.random.normal(keys[1], (MEM, N, E), jnp.float32)

    params = {
        "static": init_attn(keys[2], E),
        "memory": init_attn(keys[3], E),
        "cross": init_attn(keys[4], E),
        "dr_w": jax.random.normal(keys[5], (E, 2 * E), jnp.float32) / math.sqrt(2 * E),
        "dr_b": jax.random.normal(keys[6], (1, E), jnp.float32) * 0.02,
    }

    # TODO(synk): the stateful update() method (memory write-back via the
    # feedback attentions + gate_linear) is not part of forward() and is not
    # implemented; memory is an explicit input here.

    prepped = prepare_weights(params)           # one-time, outside jit
    fwd = jax.jit(transformer_memory_forward, static_argnums=(3,))
    out = jax.block_until_ready(fwd(x, memory, prepped, H))

    ref = ref_forward(x, memory, params, H)
    assert out.shape == (L, N, E)
    # Exact softmax divide + HIGHEST-precision matmuls on both sides -> f32-tight.
    np.testing.assert_allclose(np.asarray(out), np.asarray(ref),
                               rtol=1e-4, atol=1e-4)
    print("KERNEL_OK")
</pallas_src>

<mosaic_0001>
module attributes {stable_mosaic.version = 11 : i64} {
  func.func @fused_kernel(%arg0: memref<16x32xf32, #tpu.memory_space<vmem>>, %arg1: memref<16x32xf32, #tpu.memory_space<vmem>>, %arg2: memref<32x96xf32, #tpu.memory_space<vmem>>, %arg3: memref<1x96xf32, #tpu.memory_space<vmem>>, %arg4: memref<2x32x32xf32, #tpu.memory_space<vmem>>, %arg5: memref<2x1x32xf32, #tpu.memory_space<vmem>>, %arg6: memref<2x32x64xf32, #tpu.memory_space<vmem>>, %arg7: memref<2x1x64xf32, #tpu.memory_space<vmem>>, %arg8: memref<3x32x32xf32, #tpu.memory_space<vmem>>, %arg9: memref<3x1x32xf32, #tpu.memory_space<vmem>>, %arg10: memref<64x32xf32, #tpu.memory_space<vmem>>, %arg11: memref<1x32xf32, #tpu.memory_space<vmem>>, %arg12: memref<2x8x32xf32, #tpu.memory_space<vmem>>) attributes {dimension_semantics = [], scalar_prefetch = 0 : i64, scratch_operands = 0 : i64, tpu.core_type = #tpu.core_type<tc>} {
    %c0 = arith.constant 0 : index
    %c0_0 = arith.constant 0 : index
    %0 = vector.load %arg0[%c0, %c0_0] : memref<16x32xf32, #tpu.memory_space<vmem>>, vector<16x32xf32>
    %c0_1 = arith.constant 0 : index
    %c0_2 = arith.constant 0 : index
    %1 = vector.load %arg1[%c0_1, %c0_2] : memref<16x32xf32, #tpu.memory_space<vmem>>, vector<16x32xf32>
    %c0_3 = arith.constant 0 : index
    %c0_4 = arith.constant 0 : index
    %2 = vector.load %arg2[%c0_3, %c0_4] : memref<32x96xf32, #tpu.memory_space<vmem>>, vector<32x96xf32>
    %cst = arith.constant dense<0.000000e+00> : vector<16x96xf32>
    %3 = tpu.matmul %0, %2, %cst {dimension_numbers = #tpu.dot_dimension_numbers<[1], [0], [0], [1], [0, 0, 1, 1], [], []>, precision = #tpu.contract_precision<fp32>} : vector<16x32xf32>, vector<32x96xf32>, vector<16x96xf32> -> vector<16x96xf32>
    %c0_5 = arith.constant 0 : index
    %c0_6 = arith.constant 0 : index
    %4 = vector.load %arg3[%c0_5, %c0_6] : memref<1x96xf32, #tpu.memory_space<vmem>>, vector<1x96xf32>
    %5 = vector.broadcast %4 : vector<1x96xf32> to vector<16x96xf32>
    %6 = arith.addf %3, %5 : vector<16x96xf32>
    %7 = vector.extract_strided_slice %6 {offsets = [0, 0], sizes = [16, 32], strides = [1, 1]} : vector<16x96xf32> to vector<16x32xf32>
    %8 = vector.extract_strided_slice %6 {offsets = [0, 32], sizes = [16, 32], strides = [1, 1]} : vector<16x96xf32> to vector<16x32xf32>
    %9 = vector.extract_strided_slice %6 {offsets = [0, 64], sizes = [16, 32], strides = [1, 1]} : vector<16x96xf32> to vector<16x32xf32>
    %c0_7 = arith.constant 0 : index
    %c0_8 = arith.constant 0 : index
    %c0_9 = arith.constant 0 : index
    %10 = vector.load %arg8[%c0_7, %c0_8, %c0_9] : memref<3x32x32xf32, #tpu.memory_space<vmem>>, vector<1x32x32xf32>
    %11 = vector.shape_cast %10 : vector<1x32x32xf32> to vector<32x32xf32>
    %c0_10 = arith.constant 0 : index
    %c0_11 = arith.constant 0 : index
    %c0_12 = arith.constant 0 : index
    %12 = vector.load %arg9[%c0_10, %c0_11, %c0_12] : memref<3x1x32xf32, #tpu.memory_space<vmem>>, vector<1x1x32xf32>
    %13 = vector.shape_cast %12 : vector<1x1x32xf32> to vector<1x32xf32>
    %cst_13 = arith.constant 0.176776692 : f32
    %14 = vector.broadcast %cst_13 : f32 to vector<16x32xf32>
    %15 = arith.mulf %7, %14 : vector<16x32xf32>
    %16 = vector.shape_cast %15 : vector<16x32xf32> to vector<2x8x32xf32>
    %17 = vector.shape_cast %8 : vector<16x32xf32> to vector<2x8x32xf32>
    %18 = vector.shape_cast %9 : vector<16x32xf32> to vector<2x8x32xf32>
    "tpu.trace_start"() <{level = 10 : i32, message = "nqd,nkd->nqk"}> : () -> ()
    %cst_14 = arith.constant dense<0.000000e+00> : vector<2x8x8xf32>
    %19 = tpu.matmul %16, %17, %cst_14 {dimension_numbers = #tpu.dot_dimension_numbers<[2], [2], [1], [1], [0, 0, 0, 1, 1, 1], [0], [0]>, precision = #tpu.contract_precision<fp32>} : vector<2x8x32xf32>, vector<2x8x32xf32>, vector<2x8x8xf32> -> vector<2x8x8xf32>
    "tpu.trace_stop"() : () -> ()
    %cst_15 = arith.constant dense<0xFF800000> : vector<2x8xf32>
    %20 = vector.multi_reduction <maximumf>, %19, %cst_15 [2] : vector<2x8x8xf32> to vector<2x8xf32>
    %21 = vector.shape_cast %20 : vector<2x8xf32> to vector<2x8x1xf32>
    %22 = vector.broadcast %21 : vector<2x8x1xf32> to vector<2x8x8xf32>
    %23 = arith.subf %19, %22 : vector<2x8x8xf32>
    %24 = math.exp %23 : vector<2x8x8xf32>
    %cst_16 = arith.constant dense<0.000000e+00> : vector<2x8xf32>
    %25 = vector.multi_reduction <add>, %24, %cst_16 [2] : vector<2x8x8xf32> to vector<2x8xf32>
    %26 = vector.shape_cast %25 : vector<2x8xf32> to vector<2x8x1xf32>
    %27 = vector.broadcast %26 : vector<2x8x1xf32> to vector<2x8x8xf32>
    %28 = arith.divf %24, %27 : vector<2x8x8xf32>
    "tpu.trace_start"() <{level = 10 : i32, message = "nqk,nkd->nqd"}> : () -> ()
    %cst_17 = arith.constant dense<0.000000e+00> : vector<2x8x32xf32>
    %29 = tpu.matmul %28, %18, %cst_17 {dimension_numbers = #tpu.dot_dimension_numbers<[2], [1], [1], [2], [0, 0, 0, 1, 1, 2], [0], [0]>, precision = #tpu.contract_precision<fp32>} : vector<2x8x8xf32>, vector<2x8x32xf32>, vector<2x8x32xf32> -> vector<2x8x32xf32>
    "tpu.trace_stop"() : () -> ()
    %30 = vector.shape_cast %29 : vector<2x8x32xf32> to vector<16x32xf32>
    %cst_18 = arith.constant dense<0.000000e+00> : vector<16x32xf32>
    %31 = tpu.matmul %30, %11, %cst_18 {dimension_numbers = #tpu.dot_dimension_numbers<[1], [0], [0], [1], [0, 0, 1, 1], [], []>, precision = #tpu.contract_precision<fp32>} : vector<16x32xf32>, vector<32x32xf32>, vector<16x32xf32> -> vector<16x32xf32>
    %32 = vector.broadcast %13 : vector<1x32xf32> to vector<16x32xf32>
    %33 = arith.addf %31, %32 : vector<16x32xf32>
    %c0_19 = arith.constant 0 : index
    %c0_20 = arith.constant 0 : index
    %c0_21 = arith.constant 0 : index
    %34 = vector.load %arg4[%c0_19, %c0_20, %c0_21] : memref<2x32x32xf32, #tpu.memory_space<vmem>>, vector<1x32x32xf32>
    %35 = vector.shape_cast %34 : vector<1x32x32xf32> to vector<32x32xf32>
    %cst_22 = arith.constant dense<0.000000e+00> : vector<16x32xf32>
    %36 = tpu.matmul %0, %35, %cst_22 {dimension_numbers = #tpu.dot_dimension_numbers<[1], [0], [0], [1], [0, 0, 1, 1], [], []>, precision = #tpu.contract_precision<fp32>} : vector<16x32xf32>, vector<32x32xf32>, vector<16x32xf32> -> vector<16x32xf32>
    %c0_23 = arith.constant 0 : index
    %c0_24 = arith.constant 0 : index
    %c0_25 = arith.constant 0 : index
    %37 = vector.load %arg5[%c0_23, %c0_24, %c0_25] : memref<2x1x32xf32, #tpu.memory_space<vmem>>, vector<1x1x32xf32>
    %38 = vector.shape_cast %37 : vector<1x1x32xf32> to vector<1x32xf32>
    %39 = vector.broadcast %38 : vector<1x32xf32> to vector<16x32xf32>
    %40 = arith.addf %36, %39 : vector<16x32xf32>
    %c0_26 = arith.constant 0 : index
    %c0_27 = arith.constant 0 : index
    %c0_28 = arith.constant 0 : index
    %41 = vector.load %arg6[%c0_26, %c0_27, %c0_28] : memref<2x32x64xf32, #tpu.memory_space<vmem>>, vector<1x32x64xf32>
    %42 = vector.shape_cast %41 : vector<1x32x64xf32> to vector<32x64xf32>
    %cst_29 = arith.constant dense<0.000000e+00> : vector<16x64xf32>
    %43 = tpu.matmul %1, %42, %cst_29 {dimension_numbers = #tpu.dot_dimension_numbers<[1], [0], [0], [1], [0, 0, 1, 1], [], []>, precision = #tpu.contract_precision<fp32>} : vector<16x32xf32>, vector<32x64xf32>, vector<16x64xf32> -> vector<16x64xf32>
    %c0_30 = arith.constant 0 : index
    %c0_31 = arith.constant 0 : index
    %c0_32 = arith.constant 0 : index
    %44 = vector.load %arg7[%c0_30, %c0_31, %c0_32] : memref<2x1x64xf32, #tpu.memory_space<vmem>>, vector<1x1x64xf32>
    %45 = vector.shape_cast %44 : vector<1x1x64xf32> to vector<1x64xf32>
    %46 = vector.broadcast %45 : vector<1x64xf32> to vector<16x64xf32>
    %47 = arith.addf %43, %46 : vector<16x64xf32>
    %48 = vector.extract_strided_slice %47 {offsets = [0, 0], sizes = [16, 32], strides = [1, 1]} : vector<16x64xf32> to vector<16x32xf32>
    %49 = vector.extract_strided_slice %47 {offsets = [0, 32], sizes = [16, 32], strides = [1, 1]} : vector<16x64xf32> to vector<16x32xf32>
    %c1 = arith.constant 1 : index
    %c0_33 = arith.constant 0 : index
    %c0_34 = arith.constant 0 : index
    %50 = vector.load %arg8[%c1, %c0_33, %c0_34] : memref<3x32x32xf32, #tpu.memory_space<vmem>>, vector<1x32x32xf32>
    %51 = vector.shape_cast %50 : vector<1x32x32xf32> to vector<32x32xf32>
    %c1_35 = arith.constant 1 : index
    %c0_36 = arith.constant 0 : index
    %c0_37 = arith.constant 0 : index
    %52 = vector.load %arg9[%c1_35, %c0_36, %c0_37] : memref<3x1x32xf32, #tpu.memory_space<vmem>>, vector<1x1x32xf32>
    %53 = vector.shape_cast %52 : vector<1x1x32xf32> to vector<1x32xf32>
    %cst_38 = arith.constant 0.353553385 : f32
    %54 = vector.broadcast %cst_38 : f32 to vector<16x32xf32>
    %55 = arith.mulf %40, %54 : vector<16x32xf32>
    %56 = vector.extract_strided_slice %55 {offsets = [0, 0], sizes = [16, 8], strides = [1, 1]} : vector<16x32xf32> to vector<16x8xf32>
    %57 = vector.shape_cast %56 : vector<16x8xf32> to vector<2x8x8xf32>
    %58 = vector.extract_strided_slice %48 {offsets = [0, 0], sizes = [16, 8], strides = [1, 1]} : vector<16x32xf32> to vector<16x8xf32>
    %59 = vector.shape_cast %58 : vector<16x8xf32> to vector<2x8x8xf32>
    %60 = vector.extract_strided_slice %49 {offsets = [0, 0], sizes = [16, 8], strides = [1, 1]} : vector<16x32xf32> to vector<16x8xf32>
    %61 = vector.shape_cast %60 : vector<16x8xf32> to vector<2x8x8xf32>
    "tpu.trace_start"() <{level = 10 : i32, message = "nqd,nkd->nqk"}> : () -> ()
    %cst_39 = arith.constant dense<0.000000e+00> : vector<2x8x8xf32>
    %62 = tpu.matmul %57, %59, %cst_39 {dimension_numbers = #tpu.dot_dimension_numbers<[2], [2], [1], [1], [0, 0, 0, 1, 1, 1], [0], [0]>, precision = #tpu.contract_precision<fp32>} : vector<2x8x8xf32>, vector<2x8x8xf32>, vector<2x8x8xf32> -> vector<2x8x8xf32>
    "tpu.trace_stop"() : () -> ()
    %cst_40 = arith.constant dense<0xFF800000> : vector<2x8xf32>
    %63 = vector.multi_reduction <maximumf>, %62, %cst_40 [2] : vector<2x8x8xf32> to vector<2x8xf32>
    %64 = vector.shape_cast %63 : vector<2x8xf32> to vector<2x8x1xf32>
    %65 = vector.broadcast %64 : vector<2x8x1xf32> to vector<2x8x8xf32>
    %66 = arith.subf %62, %65 : vector<2x8x8xf32>
    %67 = math.exp %66 : vector<2x8x8xf32>
    %cst_41 = arith.constant dense<0.000000e+00> : vector<2x8xf32>
    %68 = vector.multi_reduction <add>, %67, %cst_41 [2] : vector<2x8x8xf32> to vector<2x8xf32>
    %69 = vector.shape_cast %68 : vector<2x8xf32> to vector<2x8x1xf32>
    %70 = vector.broadcast %69 : vector<2x8x1xf32> to vector<2x8x8xf32>
    %71 = arith.divf %67, %70 : vector<2x8x8xf32>
    "tpu.trace_start"() <{level = 10 : i32, message = "nqk,nkd->nqd"}> : () -> ()
    %cst_42 = arith.constant dense<0.000000e+00> : vector<2x8x8xf32>
    %72 = tpu.matmul %71, %61, %cst_42 {dimension_numbers = #tpu.dot_dimension_numbers<[2], [1], [1], [2], [0, 0, 0, 1, 1, 2], [0], [0]>, precision = #tpu.contract_precision<fp32>} : vector<2x8x8xf32>, vector<2x8x8xf32>, vector<2x8x8xf32> -> vector<2x8x8xf32>
    "tpu.trace_stop"() : () -> ()
    %73 = vector.shape_cast %72 : vector<2x8x8xf32> to vector<16x8xf32>
    %74 = vector.extract_strided_slice %55 {offsets = [0, 8], sizes = [16, 8], strides = [1, 1]} : vector<16x32xf32> to vector<16x8xf32>
    %75 = vector.shape_cast %74 : vector<16x8xf32> to vector<2x8x8xf32>
    %76 = vector.extract_strided_slice %48 {offsets = [0, 8], sizes = [16, 8], strides = [1, 1]} : vector<16x32xf32> to vector<16x8xf32>
    %77 = vector.shape_cast %76 : vector<16x8xf32> to vector<2x8x8xf32>
    %78 = vector.extract_strided_slice %49 {offsets = [0, 8], sizes = [16, 8], strides = [1, 1]} : vector<16x32xf32> to vector<16x8xf32>
    %79 = vector.shape_cast %78 : vector<16x8xf32> to vector<2x8x8xf32>
    "tpu.trace_start"() <{level = 10 : i32, message = "nqd,nkd->nqk"}> : () -> ()
    %cst_43 = arith.constant dense<0.000000e+00> : vector<2x8x8xf32>
    %80 = tpu.matmul %75, %77, %cst_43 {dimension_numbers = #tpu.dot_dimension_numbers<[2], [2], [1], [1], [0, 0, 0, 1, 1, 1], [0], [0]>, precision = #tpu.contract_precision<fp32>} : vector<2x8x8xf32>, vector<2x8x8xf32>, vector<2x8x8xf32> -> vector<2x8x8xf32>
    "tpu.trace_stop"() : () -> ()
    %cst_44 = arith.constant dense<0xFF800000> : vector<2x8xf32>
    %81 = vector.multi_reduction <maximumf>, %80, %cst_44 [2] : vector<2x8x8xf32> to vector<2x8xf32>
    %82 = vector.shape_cast %81 : vector<2x8xf32> to vector<2x8x1xf32>
    %83 = vector.broadcast %82 : vector<2x8x1xf32> to vector<2x8x8xf32>
    %84 = arith.subf %80, %83 : vector<2x8x8xf32>
    %85 = math.exp %84 : vector<2x8x8xf32>
    %cst_45 = arith.constant dense<0.000000e+00> : vector<2x8xf32>
    %86 = vector.multi_reduction <add>, %85, %cst_45 [2] : vector<2x8x8xf32> to vector<2x8xf32>
    %87 = vector.shape_cast %86 : vector<2x8xf32> to vector<2x8x1xf32>
    %88 = vector.broadcast %87 : vector<2x8x1xf32> to vector<2x8x8xf32>
    %89 = arith.divf %85, %88 : vector<2x8x8xf32>
    "tpu.trace_start"() <{level = 10 : i32, message = "nqk,nkd->nqd"}> : () -> ()
    %cst_46 = arith.constant dense<0.000000e+00> : vector<2x8x8xf32>
    %90 = tpu.matmul %89, %79, %cst_46 {dimension_numbers = #tpu.dot_dimension_numbers<[2], [1], [1], [2], [0, 0, 0, 1, 1, 2], [0], [0]>, precision = #tpu.contract_precision<fp32>} : vector<2x8x8xf32>, vector<2x8x8xf32>, vector<2x8x8xf32> -> vector<2x8x8xf32>
    "tpu.trace_stop"() : () -> ()
    %91 = vector.shape_cast %90 : vector<2x8x8xf32> to vector<16x8xf32>
    %92 = vector.extract_strided_slice %55 {offsets = [0, 16], sizes = [16, 8], strides = [1, 1]} : vector<16x32xf32> to vector<16x8xf32>
    %93 = vector.shape_cast %92 : vector<16x8xf32> to vector<2x8x8xf32>
    %94 = vector.extract_strided_slice %48 {offsets = [0, 16], sizes = [16, 8], strides = [1, 1]} : vector<16x32xf32> to vector<16x8xf32>
    %95 = vector.shape_cast %94 : vector<16x8xf32> to vector<2x8x8xf32>
    %96 = vector.extract_strided_slice %49 {offsets = [0, 16], sizes = [16, 8], strides = [1, 1]} : vector<16x32xf32> to vector<16x8xf32>
    %97 = vector.shape_cast %96 : vector<16x8xf32> to vector<2x8x8xf32>
    "tpu.trace_start"() <{level = 10 : i32, message = "nqd,nkd->nqk"}> : () -> ()
    %cst_47 = arith.constant dense<0.000000e+00> : vector<2x8x8xf32>
    %98 = tpu.matmul %93, %95, %cst_47 {dimension_numbers = #tpu.dot_dimension_numbers<[2], [2], [1], [1], [0, 0, 0, 1, 1, 1], [0], [0]>, precision = #tpu.contract_precision<fp32>} : vector<2x8x8xf32>, vector<2x8x8xf32>, vector<2x8x8xf32> -> vector<2x8x8xf32>
    "tpu.trace_stop"() : () -> ()
    %cst_48 = arith.constant dense<0xFF800000> : vector<2x8xf32>
    %99 = vector.multi_reduction <maximumf>, %98, %cst_48 [2] : vector<2x8x8xf32> to vector<2x8xf32>
    %100 = vector.shape_cast %99 : vector<2x8xf32> to vector<2x8x1xf32>
    %101 = vector.broadcast %100 : vector<2x8x1xf32> to vector<2x8x8xf32>
    %102 = arith.subf %98, %101 : vector<2x8x8xf32>
    %103 = math.exp %102 : vector<2x8x8xf32>
    %cst_49 = arith.constant dense<0.000000e+00> : vector<2x8xf32>
    %104 = vector.multi_reduction <add>, %103, %cst_49 [2] : vector<2x8x8xf32> to vector<2x8xf32>
    %105 = vector.shape_cast %104 : vector<2x8xf32> to vector<2x8x1xf32>
    %106 = vector.broadcast %105 : vector<2x8x1xf32> to vector<2x8x8xf32>
    %107 = arith.divf %103, %106 : vector<2x8x8xf32>
    "tpu.trace_start"() <{level = 10 : i32, message = "nqk,nkd->nqd"}> : () -> ()
    %cst_50 = arith.constant dense<0.000000e+00> : vector<2x8x8xf32>
    %108 = tpu.matmul %107, %97, %cst_50 {dimension_numbers = #tpu.dot_dimension_numbers<[2], [1], [1], [2], [0, 0, 0, 1, 1, 2], [0], [0]>, precision = #tpu.contract_precision<fp32>} : vector<2x8x8xf32>, vector<2x8x8xf32>, vector<2x8x8xf32> -> vector<2x8x8xf32>
    "tpu.trace_stop"() : () -> ()
    %109 = vector.shape_cast %108 : vector<2x8x8xf32> to vector<16x8xf32>
    %110 = vector.extract_strided_slice %55 {offsets = [0, 24], sizes = [16, 8], strides = [1, 1]} : vector<16x32xf32> to vector<16x8xf32>
    %111 = vector.shape_cast %110 : vector<16x8xf32> to vector<2x8x8xf32>
    %112 = vector.extract_strided_slice %48 {offsets = [0, 24], sizes = [16, 8], strides = [1, 1]} : vector<16x32xf32> to vector<16x8xf32>
    %113 = vector.shape_cast %112 : vector<16x8xf32> to vector<2x8x8xf32>
    %114 = vector.extract_strided_slice %49 {offsets = [0, 24], sizes = [16, 8], strides = [1, 1]} : vector<16x32xf32> to vector<16x8xf32>
    %115 = vector.shape_cast %114 : vector<16x8xf32> to vector<2x8x8xf32>
    "tpu.trace_start"() <{level = 10 : i32, message = "nqd,nkd->nqk"}> : () -> ()
    %cst_51 = arith.constant dense<0.000000e+00> : vector<2x8x8xf32>
    %116 = tpu.matmul %111, %113, %cst_51 {dimension_numbers = #tpu.dot_dimension_numbers<[2], [2], [1], [1], [0, 0, 0, 1, 1, 1], [0], [0]>, precision = #tpu.contract_precision<fp32>} : vector<2x8x8xf32>, vector<2x8x8xf32>, vector<2x8x8xf32> -> vector<2x8x8xf32>
    "tpu.trace_stop"() : () -> ()
    %cst_52 = arith.constant dense<0xFF800000> : vector<2x8xf32>
    %117 = vector.multi_reduction <maximumf>, %116, %cst_52 [2] : vector<2x8x8xf32> to vector<2x8xf32>
    %118 = vector.shape_cast %117 : vector<2x8xf32> to vector<2x8x1xf32>
    %119 = vector.broadcast %118 : vector<2x8x1xf32> to vector<2x8x8xf32>
    %120 = arith.subf %116, %119 : vector<2x8x8xf32>
    %121 = math.exp %120 : vector<2x8x8xf32>
    %cst_53 = arith.constant dense<0.000000e+00> : vector<2x8xf32>
    %122 = vector.multi_reduction <add>, %121, %cst_53 [2] : vector<2x8x8xf32> to vector<2x8xf32>
    %123 = vector.shape_cast %122 : vector<2x8xf32> to vector<2x8x1xf32>
    %124 = vector.broadcast %123 : vector<2x8x1xf32> to vector<2x8x8xf32>
    %125 = arith.divf %121, %124 : vector<2x8x8xf32>
    "tpu.trace_start"() <{level = 10 : i32, message = "nqk,nkd->nqd"}> : () -> ()
    %cst_54 = arith.constant dense<0.000000e+00> : vector<2x8x8xf32>
    %126 = tpu.matmul %125, %115, %cst_54 {dimension_numbers = #tpu.dot_dimension_numbers<[2], [1], [1], [2], [0, 0, 0, 1, 1, 2], [0], [0]>, precision = #tpu.contract_precision<fp32>} : vector<2x8x8xf32>, vector<2x8x8xf32>, vector<2x8x8xf32> -> vector<2x8x8xf32>
    "tpu.trace_stop"() : () -> ()
    %127 = vector.shape_cast %126 : vector<2x8x8xf32> to vector<16x8xf32>
    %128 = tpu.concatenate %73, %91, %109, %127 in 1 : vector<16x8xf32>, vector<16x8xf32>, vector<16x8xf32>, vector<16x8xf32> -> vector<16x32xf32>
    %cst_55 = arith.constant dense<0.000000e+00> : vector<16x32xf32>
    %129 = tpu.matmul %128, %51, %cst_55 {dimension_numbers = #tpu.dot_dimension_numbers<[1], [0], [0], [1], [0, 0, 1, 1], [], []>, precision = #tpu.contract_precision<fp32>} : vector<16x32xf32>, vector<32x32xf32>, vector<16x32xf32> -> vector<16x32xf32>
    %130 = vector.broadcast %53 : vector<1x32xf32> to vector<16x32xf32>
    %131 = arith.addf %129, %130 : vector<16x32xf32>
    %132 = tpu.concatenate %33, %131 in 1 : vector<16x32xf32>, vector<16x32xf32> -> vector<16x64xf32>
    %c0_56 = arith.constant 0 : index
    %c0_57 = arith.constant 0 : index
    %133 = vector.load %arg10[%c0_56, %c0_57] : memref<64x32xf32, #tpu.memory_space<vmem>>, vector<64x32xf32>
    %cst_58 = arith.constant dense<0.000000e+00> : vector<16x32xf32>
    %134 = tpu.matmul %132, %133, %cst_58 {dimension_numbers = #tpu.dot_dimension_numbers<[1], [0], [0], [1], [0, 0, 1, 1], [], []>, precision = #tpu.contract_precision<fp32>} : vector<16x64xf32>, vector<64x32xf32>, vector<16x32xf32> -> vector<16x32xf32>
    %c0_59 = arith.constant 0 : index
    %c0_60 = arith.constant 0 : index
    %135 = vector.load %arg11[%c0_59, %c0_60] : memref<1x32xf32, #tpu.memory_space<vmem>>, vector<1x32xf32>
    %136 = vector.broadcast %135 : vector<1x32xf32> to vector<16x32xf32>
    %137 = arith.addf %134, %136 : vector<16x32xf32>
    %c1_61 = arith.constant 1 : index
    %c0_62 = arith.constant 0 : index
    %c0_63 = arith.constant 0 : index
    %138 = vector.load %arg4[%c1_61, %c0_62, %c0_63] : memref<2x32x32xf32, #tpu.memory_space<vmem>>, vector<1x32x32xf32>
    %139 = vector.shape_cast %138 : vector<1x32x32xf32> to vector<32x32xf32>
    %cst_64 = arith.constant dense<0.000000e+00> : vector<16x32xf32>
    %140 = tpu.matmul %0, %139, %cst_64 {dimension_numbers = #tpu.dot_dimension_numbers<[1], [0], [0], [1], [0, 0, 1, 1], [], []>, precision = #tpu.contract_precision<fp32>} : vector<16x32xf32>, vector<32x32xf32>, vector<16x32xf32> -> vector<16x32xf32>
    %c1_65 = arith.constant 1 : index
    %c0_66 = arith.constant 0 : index
    %c0_67 = arith.constant 0 : index
    %141 = vector.load %arg5[%c1_65, %c0_66, %c0_67] : memref<2x1x32xf32, #tpu.memory_space<vmem>>, vector<1x1x32xf32>
    %142 = vector.shape_cast %141 : vector<1x1x32xf32> to vector<1x32xf32>
    %143 = vector.broadcast %142 : vector<1x32xf32> to vector<16x32xf32>
    %144 = arith.addf %140, %143 : vector<16x32xf32>
    %c1_68 = arith.constant 1 : index
    %c0_69 = arith.constant 0 : index
    %c0_70 = arith.constant 0 : index
    %145 = vector.load %arg6[%c1_68, %c0_69, %c0_70] : memref<2x32x64xf32, #tpu.memory_space<vmem>>, vector<1x32x64xf32>
    %146 = vector.shape_cast %145 : vector<1x32x64xf32> to vector<32x64xf32>
    %cst_71 = arith.constant dense<0.000000e+00> : vector<16x64xf32>
    %147 = tpu.matmul %137, %146, %cst_71 {dimension_numbers = #tpu.dot_dimension_numbers<[1], [0], [0], [1], [0, 0, 1, 1], [], []>, precision = #tpu.contract_precision<fp32>} : vector<16x32xf32>, vector<32x64xf32>, vector<16x64xf32> -> vector<16x64xf32>
    %c1_72 = arith.constant 1 : index
    %c0_73 = arith.constant 0 : index
    %c0_74 = arith.constant 0 : index
    %148 = vector.load %arg7[%c1_72, %c0_73, %c0_74] : memref<2x1x64xf32, #tpu.memory_space<vmem>>, vector<1x1x64xf32>
    %149 = vector.shape_cast %148 : vector<1x1x64xf32> to vector<1x64xf32>
    %150 = vector.broadcast %149 : vector<1x64xf32> to vector<16x64xf32>
    %151 = arith.addf %147, %150 : vector<16x64xf32>
    %152 = vector.extract_strided_slice %151 {offsets = [0, 0], sizes = [16, 32], strides = [1, 1]} : vector<16x64xf32> to vector<16x32xf32>
    %153 = vector.extract_strided_slice %151 {offsets = [0, 32], sizes = [16, 32], strides = [1, 1]} : vector<16x64xf32> to vector<16x32xf32>
    %c2 = arith.constant 2 : index
    %c0_75 = arith.constant 0 : index
    %c0_76 = arith.constant 0 : index
    %154 = vector.load %arg8[%c2, %c0_75, %c0_76] : memref<3x32x32xf32, #tpu.memory_space<vmem>>, vector<1x32x32xf32>
    %155 = vector.shape_cast %154 : vector<1x32x32xf32> to vector<32x32xf32>
    %c2_77 = arith.constant 2 : index
    %c0_78 = arith.constant 0 : index
    %c0_79 = arith.constant 0 : index
    %156 = vector.load %arg9[%c2_77, %c0_78, %c0_79] : memref<3x1x32xf32, #tpu.memory_space<vmem>>, vector<1x1x32xf32>
    %157 = vector.shape_cast %156 : vector<1x1x32xf32> to vector<1x32xf32>
    %cst_80 = arith.constant 0.353553385 : f32
    %158 = vector.broadcast %cst_80 : f32 to vector<16x32xf32>
    %159 = arith.mulf %144, %158 : vector<16x32xf32>
    %160 = vector.extract_strided_slice %159 {offsets = [0, 0], sizes = [16, 8], strides = [1, 1]} : vector<16x32xf32> to vector<16x8xf32>
    %161 = vector.shape_cast %160 : vector<16x8xf32> to vector<2x8x8xf32>
    %162 = vector.extract_strided_slice %152 {offsets = [0, 0], sizes = [16, 8], strides = [1, 1]} : vector<16x32xf32> to vector<16x8xf32>
    %163 = vector.shape_cast %162 : vector<16x8xf32> to vector<2x8x8xf32>
    %164 = vector.extract_strided_slice %153 {offsets = [0, 0], sizes = [16, 8], strides = [1, 1]} : vector<16x32xf32> to vector<16x8xf32>
    %165 = vector.shape_cast %164 : vector<16x8xf32> to vector<2x8x8xf32>
    "tpu.trace_start"() <{level = 10 : i32, message = "nqd,nkd->nqk"}> : () -> ()
    %cst_81 = arith.constant dense<0.000000e+00> : vector<2x8x8xf32>
    %166 = tpu.matmul %161, %163, %cst_81 {dimension_numbers = #tpu.dot_dimension_numbers<[2], [2], [1], [1], [0, 0, 0, 1, 1, 1], [0], [0]>, precision = #tpu.contract_precision<fp32>} : vector<2x8x8xf32>, vector<2x8x8xf32>, vector<2x8x8xf32> -> vector<2x8x8xf32>
    "tpu.trace_stop"() : () -> ()
    %cst_82 = arith.constant dense<0xFF800000> : vector<2x8xf32>
    %167 = vector.multi_reduction <maximumf>, %166, %cst_82 [2] : vector<2x8x8xf32> to vector<2x8xf32>
    %168 = vector.shape_cast %167 : vector<2x8xf32> to vector<2x8x1xf32>
    %169 = vector.broadcast %168 : vector<2x8x1xf32> to vector<2x8x8xf32>
    %170 = arith.subf %166, %169 : vector<2x8x8xf32>
    %171 = math.exp %170 : vector<2x8x8xf32>
    %cst_83 = arith.constant dense<0.000000e+00> : vector<2x8xf32>
    %172 = vector.multi_reduction <add>, %171, %cst_83 [2] : vector<2x8x8xf32> to vector<2x8xf32>
    %173 = vector.shape_cast %172 : vector<2x8xf32> to vector<2x8x1xf32>
    %174 = vector.broadcast %173 : vector<2x8x1xf32> to vector<2x8x8xf32>
    %175 = arith.divf %171, %174 : vector<2x8x8xf32>
    "tpu.trace_start"() <{level = 10 : i32, message = "nqk,nkd->nqd"}> : () -> ()
    %cst_84 = arith.constant dense<0.000000e+00> : vector<2x8x8xf32>
    %176 = tpu.matmul %175, %165, %cst_84 {dimension_numbers = #tpu.dot_dimension_numbers<[2], [1], [1], [2], [0, 0, 0, 1, 1, 2], [0], [0]>, precision = #tpu.contract_precision<fp32>} : vector<2x8x8xf32>, vector<2x8x8xf32>, vector<2x8x8xf32> -> vector<2x8x8xf32>
    "tpu.trace_stop"() : () -> ()
    %177 = vector.shape_cast %176 : vector<2x8x8xf32> to vector<16x8xf32>
    %178 = vector.extract_strided_slice %159 {offsets = [0, 8], sizes = [16, 8], strides = [1, 1]} : vector<16x32xf32> to vector<16x8xf32>
    %179 = vector.shape_cast %178 : vector<16x8xf32> to vector<2x8x8xf32>
    %180 = vector.extract_strided_slice %152 {offsets = [0, 8], sizes = [16, 8], strides = [1, 1]} : vector<16x32xf32> to vector<16x8xf32>
    %181 = vector.shape_cast %180 : vector<16x8xf32> to vector<2x8x8xf32>
    %182 = vector.extract_strided_slice %153 {offsets = [0, 8], sizes = [16, 8], strides = [1, 1]} : vector<16x32xf32> to vector<16x8xf32>
    %183 = vector.shape_cast %182 : vector<16x8xf32> to vector<2x8x8xf32>
    "tpu.trace_start"() <{level = 10 : i32, message = "nqd,nkd->nqk"}> : () -> ()
    %cst_85 = arith.constant dense<0.000000e+00> : vector<2x8x8xf32>
    %184 = tpu.matmul %179, %181, %cst_85 {dimension_numbers = #tpu.dot_dimension_numbers<[2], [2], [1], [1], [0, 0, 0, 1, 1, 1], [0], [0]>, precision = #tpu.contract_precision<fp32>} : vector<2x8x8xf32>, vector<2x8x8xf32>, vector<2x8x8xf32> -> vector<2x8x8xf32>
    "tpu.trace_stop"() : () -> ()
    %cst_86 = arith.constant dense<0xFF800000> : vector<2x8xf32>
    %185 = vector.multi_reduction <maximumf>, %184, %cst_86 [2] : vector<2x8x8xf32> to vector<2x8xf32>
    %186 = vector.shape_cast %185 : vector<2x8xf32> to vector<2x8x1xf32>
    %187 = vector.broadcast %186 : vector<2x8x1xf32> to vector<2x8x8xf32>
    %188 = arith.subf %184, %187 : vector<2x8x8xf32>
    %189 = math.exp %188 : vector<2x8x8xf32>
    %cst_87 = arith.constant dense<0.000000e+00> : vector<2x8xf32>
    %190 = vector.multi_reduction <add>, %189, %cst_87 [2] : vector<2x8x8xf32> to vector<2x8xf32>
    %191 = vector.shape_cast %190 : vector<2x8xf32> to vector<2x8x1xf32>
    %192 = vector.broadcast %191 : vector<2x8x1xf32> to vector<2x8x8xf32>
    %193 = arith.divf %189, %192 : vector<2x8x8xf32>
    "tpu.trace_start"() <{level = 10 : i32, message = "nqk,nkd->nqd"}> : () -> ()
    %cst_88 = arith.constant dense<0.000000e+00> : vector<2x8x8xf32>
    %194 = tpu.matmul %193, %183, %cst_88 {dimension_numbers = #tpu.dot_dimension_numbers<[2], [1], [1], [2], [0, 0, 0, 1, 1, 2], [0], [0]>, precision = #tpu.contract_precision<fp32>} : vector<2x8x8xf32>, vector<2x8x8xf32>, vector<2x8x8xf32> -> vector<2x8x8xf32>
    "tpu.trace_stop"() : () -> ()
    %195 = vector.shape_cast %194 : vector<2x8x8xf32> to vector<16x8xf32>
    %196 = vector.extract_strided_slice %159 {offsets = [0, 16], sizes = [16, 8], strides = [1, 1]} : vector<16x32xf32> to vector<16x8xf32>
    %197 = vector.shape_cast %196 : vector<16x8xf32> to vector<2x8x8xf32>
    %198 = vector.extract_strided_slice %152 {offsets = [0, 16], sizes = [16, 8], strides = [1, 1]} : vector<16x32xf32> to vector<16x8xf32>
    %199 = vector.shape_cast %198 : vector<16x8xf32> to vector<2x8x8xf32>
    %200 = vector.extract_strided_slice %153 {offsets = [0, 16], sizes = [16, 8], strides = [1, 1]} : vector<16x32xf32> to vector<16x8xf32>
    %201 = vector.shape_cast %200 : vector<16x8xf32> to vector<2x8x8xf32>
    "tpu.trace_start"() <{level = 10 : i32, message = "nqd,nkd->nqk"}> : () -> ()
    %cst_89 = arith.constant dense<0.000000e+00> : vector<2x8x8xf32>
    %202 = tpu.matmul %197, %199, %cst_89 {dimension_numbers = #tpu.dot_dimension_numbers<[2], [2], [1], [1], [0, 0, 0, 1, 1, 1], [0], [0]>, precision = #tpu.contract_precision<fp32>} : vector<2x8x8xf32>, vector<2x8x8xf32>, vector<2x8x8xf32> -> vector<2x8x8xf32>
    "tpu.trace_stop"() : () -> ()
    %cst_90 = arith.constant dense<0xFF800000> : vector<2x8xf32>
    %203 = vector.multi_reduction <maximumf>, %202, %cst_90 [2] : vector<2x8x8xf32> to vector<2x8xf32>
    %204 = vector.shape_cast %203 : vector<2x8xf32> to vector<2x8x1xf32>
    %205 = vector.broadcast %204 : vector<2x8x1xf32> to vector<2x8x8xf32>
    %206 = arith.subf %202, %205 : vector<2x8x8xf32>
    %207 = math.exp %206 : vector<2x8x8xf32>
    %cst_91 = arith.constant dense<0.000000e+00> : vector<2x8xf32>
    %208 = vector.multi_reduction <add>, %207, %cst_91 [2] : vector<2x8x8xf32> to vector<2x8xf32>
    %209 = vector.shape_cast %208 : vector<2x8xf32> to vector<2x8x1xf32>
    %210 = vector.broadcast %209 : vector<2x8x1xf32> to vector<2x8x8xf32>
    %211 = arith.divf %207, %210 : vector<2x8x8xf32>
    "tpu.trace_start"() <{level = 10 : i32, message = "nqk,nkd->nqd"}> : () -> ()
    %cst_92 = arith.constant dense<0.000000e+00> : vector<2x8x8xf32>
    %212 = tpu.matmul %211, %201, %cst_92 {dimension_numbers = #tpu.dot_dimension_numbers<[2], [1], [1], [2], [0, 0, 0, 1, 1, 2], [0], [0]>, precision = #tpu.contract_precision<fp32>} : vector<2x8x8xf32>, vector<2x8x8xf32>, vector<2x8x8xf32> -> vector<2x8x8xf32>
    "tpu.trace_stop"() : () -> ()
    %213 = vector.shape_cast %212 : vector<2x8x8xf32> to vector<16x8xf32>
    %214 = vector.extract_strided_slice %159 {offsets = [0, 24], sizes = [16, 8], strides = [1, 1]} : vector<16x32xf32> to vector<16x8xf32>
    %215 = vector.shape_cast %214 : vector<16x8xf32> to vector<2x8x8xf32>
    %216 = vector.extract_strided_slice %152 {offsets = [0, 24], sizes = [16, 8], strides = [1, 1]} : vector<16x32xf32> to vector<16x8xf32>
    %217 = vector.shape_cast %216 : vector<16x8xf32> to vector<2x8x8xf32>
    %218 = vector.extract_strided_slice %153 {offsets = [0, 24], sizes = [16, 8], strides = [1, 1]} : vector<16x32xf32> to vector<16x8xf32>
    %219 = vector.shape_cast %218 : vector<16x8xf32> to vector<2x8x8xf32>
    "tpu.trace_start"() <{level = 10 : i32, message = "nqd,nkd->nqk"}> : () -> ()
    %cst_93 = arith.constant dense<0.000000e+00> : vector<2x8x8xf32>
    %220 = tpu.matmul %215, %217, %cst_93 {dimension_numbers = #tpu.dot_dimension_numbers<[2], [2], [1], [1], [0, 0, 0, 1, 1, 1], [0], [0]>, precision = #tpu.contract_precision<fp32>} : vector<2x8x8xf32>, vector<2x8x8xf32>, vector<2x8x8xf32> -> vector<2x8x8xf32>
    "tpu.trace_stop"() : () -> ()
    %cst_94 = arith.constant dense<0xFF800000> : vector<2x8xf32>
    %221 = vector.multi_reduction <maximumf>, %220, %cst_94 [2] : vector<2x8x8xf32> to vector<2x8xf32>
    %222 = vector.shape_cast %221 : vector<2x8xf32> to vector<2x8x1xf32>
    %223 = vector.broadcast %222 : vector<2x8x1xf32> to vector<2x8x8xf32>
    %224 = arith.subf %220, %223 : vector<2x8x8xf32>
    %225 = math.exp %224 : vector<2x8x8xf32>
    %cst_95 = arith.constant dense<0.000000e+00> : vector<2x8xf32>
    %226 = vector.multi_reduction <add>, %225, %cst_95 [2] : vector<2x8x8xf32> to vector<2x8xf32>
    %227 = vector.shape_cast %226 : vector<2x8xf32> to vector<2x8x1xf32>
    %228 = vector.broadcast %227 : vector<2x8x1xf32> to vector<2x8x8xf32>
    %229 = arith.divf %225, %228 : vector<2x8x8xf32>
    "tpu.trace_start"() <{level = 10 : i32, message = "nqk,nkd->nqd"}> : () -> ()
    %cst_96 = arith.constant dense<0.000000e+00> : vector<2x8x8xf32>
    %230 = tpu.matmul %229, %219, %cst_96 {dimension_numbers = #tpu.dot_dimension_numbers<[2], [1], [1], [2], [0, 0, 0, 1, 1, 2], [0], [0]>, precision = #tpu.contract_precision<fp32>} : vector<2x8x8xf32>, vector<2x8x8xf32>, vector<2x8x8xf32> -> vector<2x8x8xf32>
    "tpu.trace_stop"() : () -> ()
    %231 = vector.shape_cast %230 : vector<2x8x8xf32> to vector<16x8xf32>
    %232 = tpu.concatenate %177, %195, %213, %231 in 1 : vector<16x8xf32>, vector<16x8xf32>, vector<16x8xf32>, vector<16x8xf32> -> vector<16x32xf32>
    %cst_97 = arith.constant dense<0.000000e+00> : vector<16x32xf32>
    %233 = tpu.matmul %232, %155, %cst_97 {dimension_numbers = #tpu.dot_dimension_numbers<[1], [0], [0], [1], [0, 0, 1, 1], [], []>, precision = #tpu.contract_precision<fp32>} : vector<16x32xf32>, vector<32x32xf32>, vector<16x32xf32> -> vector<16x32xf32>
    %234 = vector.broadcast %157 : vector<1x32xf32> to vector<16x32xf32>
    %235 = arith.addf %233, %234 : vector<16x32xf32>
    %236 = vector.shape_cast %235 : vector<16x32xf32> to vector<2x8x32xf32>
    %c0_98 = arith.constant 0 : index
    %c0_99 = arith.constant 0 : index
    %c0_100 = arith.constant 0 : index
    %237 = vector.load %arg12[%c0_98, %c0_99, %c0_100] : memref<2x8x32xf32, #tpu.memory_space<vmem>>, vector<2x8x32xf32>
    tpu.vector_store %arg12[%c0_98, %c0_99, %c0_100], %236 {strides = array<i32>} : memref<2x8x32xf32, #tpu.memory_space<vmem>>, vector<2x8x32xf32>,
    return
  }
}

</mosaic_0001>

<bundles_post_ra>
// kernel: transformer_memory_forward.1
= control target key start
LH: loop header
LB: loop body
LE: loop exit
PB: predicated region body
PF: predicated region fallthrough
CT: control target
= control target key end

     0   :  { %17 = vsyncpa [#allocation3], 0  ;;  %s26532_s0 = inlined_call_operand.vmem [shape: f32[16,32], index: 0, kind: input, shape index: {}]   ;;  %s26533_s1 = inlined_call_operand.vmem [shape: f32[16,32], index: 1, kind: input, shape index: {}]   ;;  %s26534_s2 = inlined_call_operand.hbm [shape: f32[32,96], index: 2, kind: input, shape index: {}]   ;;  %s26535_s3 = inlined_call_operand.vmem [shape: f32[1,96], index: 3, kind: input, shape index: {}]   ;;  %s26536_s4 = inlined_call_operand.vmem [shape: f32[2,32,32], index: 4, kind: input, shape index: {}]   ;;  %s26537_s5 = inlined_call_operand.vmem [shape: f32[2,1,32], index: 5, kind: input, shape index: {}]   ;;  %s26538_s6 = inlined_call_operand.hbm [shape: f32[2,32,64], index: 6, kind: input, shape index: {}]   ;;  %s26539_s7 = inlined_call_operand.vmem [shape: f32[2,1,64], index: 7, kind: input, shape index: {}]   ;;  %s26540_s8 = inlined_call_operand.vmem [shape: f32[3,32,32], index: 8, kind: input, shape index: {}]   ;;  %s26541_s9 = inlined_call_operand.vmem [shape: f32[3,1,32], index: 9, kind: input, shape index: {}]   ;;  %s26542_s10 = inlined_call_operand.vmem [shape: f32[64,32], index: 10, kind: input, shape index: {}]   ;;  %s26543_s11 = inlined_call_operand.vmem [shape: f32[1,32], index: 11, kind: input, shape index: {}]   ;;  %s26544_s12 = inlined_call_operand.vmem [shape: f32[2,8,32], index: 12, kind: output, shape index: {}]  }
   0x1   :  { %18 = vsyncpa [#allocation5], 0  ;;  %s24278_s21 = smov [#allocation2]  }
   0x2   :  { %s28_s22 = sshll.u32 %s24278_s21, 4  ;;  %s29_s22 = int_to_ptr.vmem [resolvable:$true] %s28_s22 }
   0x3   :  { %s24242_s23 = scalar_lea.vmem %s29_s22, 512  ;;  %p24247_p1 = scmp.lt.s32.totalorder %s29_s22, %s29_s22 }
   0x4   :  { %p24243_p0 = scmp.ne.s32.totalorder %s29_s22, %s24242_s23  ;;  %p24248_p2 = scmp.lt.s32.totalorder %s24242_s23, %s24242_s23 }
   0x6   :  { %p24249_p3 = por %p24248_p2, %p24247_p1 }
   0x8   :  { %p24250_p4 = pnand %p24249_p3, %p24243_p0 }
   0xa   :  { %24253 = shalt.err (!%p24250_p4)
}
   0xb   :  { %s24279_s24 = smov 128   ;;  %s24280_s25 = smov 8  }
   0xc   :  { %34 = dma.hbm_to_vmem [thread:$0]  %s26534_s2, 512, %s29_s22, [#allocation3], %s24279_s24, %s24279_s24, %s24280_s25  }
   0xd   :  { %s24281_s28 = smov [#allocation4]  }
   0xe   :  { %s46_s29 = sshll.u32 %s24281_s28, 4  ;;  %s47_s29 = int_to_ptr.vmem [resolvable:$true] %s46_s29 }
   0xf   :  { %s24262_s30 = scalar_lea.vmem %s47_s29, 1024  ;;  %p24267_p6 = scmp.lt.s32.totalorder %s47_s29, %s47_s29 }
  0x10   :  { %p24263_p5 = scmp.ne.s32.totalorder %s47_s29, %s24262_s30  ;;  %p24268_p7 = scmp.lt.s32.totalorder %s24262_s30, %s24262_s30 }
  0x12   :  { %p24269_p8 = por %p24268_p7, %p24267_p6 }
  0x14   :  { %p24270_p9 = pnand %p24269_p8, %p24263_p5 }
  0x16   :  { %24273 = shalt.err (!%p24270_p9)
}
  0x17   :  { %52 = dma.hbm_to_vmem [thread:$0]  %s26538_s6, 1024, %s47_s29, [#allocation5], %s24279_s24, %s24279_s24, %s24280_s25  }
  0x18   :  { %24274 = dma.done.wait [#allocation3], 512  }
  0x19   :  { %24275 = vsyncadd [#allocation3], 4294966784 }
  0x1a   :  { %24276 = dma.done.wait [#allocation5], 1024  }
  0x1b   :  { %24277 = vsyncadd [#allocation5], 4294966272  ;;  %vm84_vm0 = vcmask 261120   ;;  %v76_v0 = vld [vmem:[#allocation2 + $0x18] sm:$0xff]  ;;  %v75_v1 = vld [vmem:[#allocation2 + $0x10] sm:$0xff]  ;;  %v24282_v51 = vmov 0.0  }
  0x1c   :  { %v74_v2 = vld [vmem:[#allocation2 + $0x8] sm:$0xff]  ;;  %v24368_v3 = vand.u32 4294901760, %v76_v0  ;;  %v24370_v4 = vand.u32 4294901760, %v75_v1  ;;  %v73_v6 = vld [vmem:[#allocation2] sm:$0xff]  ;;  %vm24283_vm1 = vmmov 0   ;;  %vm1534_vm2 = vcmask 64512  }
  0x1d   :  { %v24372_v5 = vand.u32 4294901760, %v74_v2  ;;  %v69_v7 = vld [vmem:[%s26532_s0] sm:$0xff]  ;;  %v70_v8 = vld [vmem:[%s26532_s0 + $0x8] sm:$0xff]  ;;  %v24380_v9 = vand.u32 4294901760, %v73_v6  ;;  %s24285_s18 = smov 64   ;;  %s24286_s24 = smov 120  }
  0x1e   :  { %v86_v10 = vsel %vm84_vm0, %v69_v7, 0  ;;  %v89_v11 = vsel %vm84_vm0, %v70_v8, 0  ;;  %22422 = vmatprep.subr.mxu0 %v24368_v3  ;;  %v206_v12 = vsub.f32 %v76_v0, %v24368_v3  ;;  %v213_v14 = vsub.f32 %v75_v1, %v24370_v4  ;;  %v21617_v39 = vld [vmem:[%s26535_s3] ss:$0 sm:$0xff]  ;;  %s24284_s3 = smov 96   ;;  %s24287_s26 = smov 88  }
  0x1f   :  { %v24386_v13 = vand.u32 4294901760, %v86_v10  ;;  %v24389_v15 = vand.u32 4294901760, %v89_v11  ;;  %22423 = vmatpush3.msra.mxu0 %v24368_v3  ;;  %v220_v16 = vsub.f32 %v74_v2, %v24372_v5  ;;  %v227_v17 = vsub.f32 %v73_v6, %v24380_v9  ;;  %s24288_s27 = smov 112   ;;  %s24289_s28 = smov 80  }
  0x20   :  { %22424 = vmatprep.subr.mxu0 %v24370_v4  ;;  %v207_v18 = vand.u32 4294901760, %v206_v12  ;;  %v214_v20 = vand.u32 4294901760, %v213_v14  ;;  %s24290_s29 = smov 104   ;;  %s24291_s30 = smov 72   ;;  %vm11455_vm3 = vcmask 195584   ;;  %vm11452_vm4 = vcmask 130048  }
  0x21   :  { %v24396_v19 = vsub.f32 %v86_v10, %v24386_v13  ;;  %v24399_v21 = vsub.f32 %v89_v11, %v24389_v15  ;;  %22441 = vmatprep.mubr.f32.mxu1 %v24386_v13  ;;  %22425 = vmatpush3.msra.mxu0 %v24370_v4  ;;  %v221_v22 = vand.u32 4294901760, %v220_v16  ;;  %v228_v23 = vand.u32 4294901760, %v227_v17  ;;  %s24292_s13 = smov 16  }
  0x22   :  { %22426 = vmatprep.subr.mxu0 %v24372_v5  ;;  %v208_v24 = vsub.f32 %v206_v12, %v207_v18  ;;  %v215_v26 = vsub.f32 %v213_v14, %v214_v20  ;;  %vm12023_vm5 = vcmask 523264  }
  0x23   :  { %v24405_v25 = vand.u32 4294901760, %v24396_v19  ;;  %v24408_v27 = vand.u32 4294901760, %v24399_v21  ;;  %22427 = vmatpush3.msra.mxu0 %v24372_v5  ;;  %v222_v28 = vsub.f32 %v220_v16, %v221_v22  ;;  %v229_v29 = vsub.f32 %v227_v17, %v228_v23 }
  0x24   :  { %22428 = vmatprep.subr.mxu0 %v24380_v9  ;;  %v209_v30 = vand.u32 4294901760, %v208_v24  ;;  %v216_v32 = vand.u32 4294901760, %v215_v26 }
  0x25   :  { %v163_v31 = vsub.f32 %v24396_v19, %v24405_v25  ;;  %v173_v33 = vsub.f32 %v24399_v21, %v24408_v27  ;;  %22429 = vmatpush3.msra.mxu0 %v24380_v9  ;;  %v223_v36 = vand.u32 4294901760, %v222_v28  ;;  %v230_v37 = vand.u32 4294901760, %v229_v29 }
  0x26   :  { %22433 = vmatprep.subr.mxu1 %v209_v30  ;;  %22444 = vmatprep.subr.mxu0 %v206_v12 }
  0x27   :  { %v24417_v34 = vand.u32 4294901760, %v163_v31  ;;  %v24419_v35 = vand.u32 4294901760, %v173_v33  ;;  %22434 = vmatpush3.msra.mxu1 %v209_v30 }
  0x28   :  { %22435 = vmatprep.subr.mxu1 %v216_v32 }
  0x29   :  { %22430 = vmatprep.mubr.f32.mxu0 %v24417_v34  ;;  %22436 = vmatpush3.msra.mxu1 %v216_v32 }
  0x2a   :  { %22431 = vmatmul.mubr.f32.vlgmr.msra.gmra.mxu0 %v24419_v35  ;;  %22437 = vmatprep.subr.mxu1 %v223_v36 }
  0x2b   :  { %22445 = vmatpush3.msra.mxu0 %v206_v12  ;;  %22438 = vmatpush3.msra.mxu1 %v223_v36 }
  0x2c   :  { %22446 = vmatprep.subr.mxu0 %v213_v14  ;;  %22439 = vmatprep.subr.mxu1 %v230_v37 }
  0x2d   :  { %22447 = vmatpush3.msra.mxu0 %v213_v14  ;;  %22440 = vmatpush3.msra.mxu1 %v230_v37 }
  0x2e   :  { %22448 = vmatprep.subr.mxu0 %v220_v16  ;;  %22442 = vmatmul.mubr.f32.vlgmr.msra.gmra.mxu1 %v24389_v15 }
  0x2f   :  { %22449 = vmatpush3.msra.mxu0 %v220_v16  ;;  %22455 = vmatprep.subr.mxu1 %v24368_v3 }
  0x30   :  { %22450 = vmatprep.subr.mxu0 %v227_v17  ;;  %22452 = vmatprep.mubr.f32.mxu0 %v24396_v19 }
  0x31   :  { %22451 = vmatpush3.msra.mxu0 %v227_v17  ;;  %22456 = vmatpush3.msra.mxu1 %v24368_v3 }
  0x32   :  { %22453 = vmatmul.mubr.f32.vlgmr.msra.gmra.mxu0 %v24399_v21  ;;  %22457 = vmatprep.subr.mxu1 %v24370_v4 }
  0x33   :  { %22466 = vmatprep.subr.mxu0 %v207_v18  ;;  %22458 = vmatpush3.msra.mxu1 %v24370_v4 }
  0x34   :  { %22467 = vmatpush3.msra.mxu0 %v207_v18  ;;  %22459 = vmatprep.subr.mxu1 %v24372_v5 }
  0x35   :  { %22468 = vmatprep.subr.mxu0 %v214_v20  ;;  %22460 = vmatpush3.msra.mxu1 %v24372_v5 }
  0x36   :  { %22469 = vmatpush3.msra.mxu0 %v214_v20  ;;  %22461 = vmatprep.subr.mxu1 %v24380_v9 }
  0x37   :  { %22470 = vmatprep.subr.mxu0 %v221_v22  ;;  %22462 = vmatpush3.msra.mxu1 %v24380_v9 }
  0x38   :  { %22463 = vmatprep.mubr.f32.mxu1 %v24405_v25  ;;  %22471 = vmatpush3.msra.mxu0 %v221_v22 }
  0x39   :  { %22464 = vmatmul.mubr.f32.vlgmr.msra.gmra.mxu1 %v24408_v27  ;;  %22472 = vmatprep.subr.mxu0 %v228_v23 }
  0x3a   :  { %22477 = vmatprep.subr.mxu1 %v24368_v3  ;;  %22473 = vmatpush3.msra.mxu0 %v228_v23 }
  0x3b   :  { %22474 = vmatprep.mubr.f32.mxu0 %v24386_v13  ;;  %22478 = vmatpush3.msra.mxu1 %v24368_v3 }
  0x3c   :  { %22475 = vmatmul.mubr.f32.vlgmr.msra.gmra.mxu0 %v24389_v15  ;;  %22479 = vmatprep.subr.mxu1 %v24370_v4 }
  0x3d   :  { %22485 = vmatprep.mubr.f32.mxu1 %v24386_v13  ;;  %22480 = vmatpush3.msra.mxu1 %v24370_v4 }
  0x3e   :  { %22481 = vmatprep.subr.mxu1 %v24372_v5  ;;  %22488 = vmatprep.subr.mxu0 %v24282_v51 }
  0x3f   :  { %22482 = vmatpush3.msra.mxu1 %v24372_v5  ;;  %22490 = vmatprep.mubr.msk.f32.mxu0 %vm24283_vm1, %v24282_v51 }
  0x40   :  { %22483 = vmatprep.subr.mxu1 %v24380_v9 }
  0x41   :  { %22484 = vmatpush3.msra.mxu1 %v24380_v9 }
  0x42   :  { %22486 = vmatmul.mubr.f32.vlgmr.msra.gmra.mxu1 %v24389_v15  ;;  %22493 = vmatprep.subr.mxu1 %v24282_v51 }
  0x43   :  { %22495 = vmatprep.mubr.msk.f32.mxu1 %vm24283_vm1, %v24282_v51 }
  0xea   :  { %v22432_v38 = vpop.f32.mrf.mxu0 }
  0xeb   :  { %v177_v46 = vadd.f32 %v22432_v38, %v21617_v39 }
  0xec   :  { %v166_v40 = vpop.f32.mrf.mxu0 }
  0xed   :  { %v167_v42 = vadd.f32 %v21617_v39, %v166_v40 }
  0xee   :  { %v22443_v41 = vpop.f32.mrf.mxu1 }
  0xef   :  { %v274_v52 = vadd.f32 %v22443_v41, %v177_v46 }
  0xf0   :  { %v267_v43 = vpop.f32.mrf.mxu1 }
  0xf1   :  { %v268_v47 = vadd.f32 %v267_v43, %v167_v42 }
  0xf2   :  { %v22454_v44 = vpop.f32.mrf.mxu0 }
  0xf3   :  { %v361_v56 = vadd.f32 %v22454_v44, %v274_v52 }
  0xf4   :  { %v353_v48 = vpop.f32.mrf.mxu0 }
  0xf5   :  { %v354_v53 = vadd.f32 %v353_v48, %v268_v47 }
  0xf9   :  { %v22465_v45 = vpop.f32.mrf.mxu1 }
  0xfa   :  { %v446_v58 = vadd.f32 %v22465_v45, %v361_v56 }
  0xfb   :  { %v437_v49 = vpop.f32.mrf.mxu1 }
  0xfc   :  { %v22476_v50 = vpop.f32.mrf.mxu0  ;;  %v438_v54 = vadd.f32 %v437_v49, %v354_v53 }
  0xfd   :  { %v535_v62 = vadd.f32 %v22476_v50, %v446_v58 }
  0xfe   :  { %v528_v55 = vpop.f32.mrf.mxu0 }
  0xff   :  { %v529_v59 = vadd.f32 %v528_v55, %v438_v54 }
 0x102   :  { %v22487_v57 = vpop.f32.mrf.mxu1 }
 0x103   :  { %v24461_v63 = vadd.f32 %v22487_v57, %v535_v62 }
 0x104   :  { %v609_v60 = vpop.f32.mrf.mxu1 }
 0x105   :  { %v24457_v61 = vadd.f32 %v609_v60, %v529_v59  ;;  %v625_v4 = vmul.f32 0.17677669, %v24461_v63 }
 0x107   :  { %627 = vrot.lane.b32.xlu0 %v24457_v61, %s24284_s3  ;;  %v624_v0 = vmul.f32 0.17677669, %v24457_v61  ;;  %v1084_v6 = vsel %vm84_vm0, %v625_v4, 0 }
 0x108   :  { %v24469_v8 = vand.u32 4294901760, %v1084_v6 }
 0x109   :  { %v630_v1 = vsel %vm84_vm0, %v624_v0, 0 }
 0x10a   :  { %v700_v2 = vand.u32 4294901760, %v630_v1  ;;  %v1155_v16 = vsub.f32 %v1084_v6, %v24469_v8 }
 0x10b   :  { %1081 = vrot.lane.b32.xlu0 %v24461_v63, %s24284_s3 }
 0x10c   :  { %v701_v3 = vsub.f32 %v630_v1, %v700_v2  ;;  %v1156_v24 = vand.u32 4294901760, %v1155_v16 }
 0x10e   :  { %v702_v5 = vand.u32 4294901760, %v701_v3  ;;  %v1157_v29 = vsub.f32 %v1155_v16, %v1156_v24 }
 0x110   :  { %v703_v10 = vsub.f32 %v701_v3, %v702_v5  ;;  %v1158_v31 = vand.u32 4294901760, %v1157_v29 }
 0x112   :  { %v704_v18 = vand.u32 4294901760, %v703_v10 }
 0x179   :  { %v628_v7 = vpop.permute.xlu0 %627 }
 0x17a   :  { %v632_v9 = vsel %vm84_vm0, %v628_v7, 0 }
 0x17b   :  { %v665_v11 = vand.u32 4294901760, %v632_v9 }
 0x17d   :  { %v742_v12 = vsub.f32 %v632_v9, %v665_v11  ;;  %22489 = vmatpush3.xpose.msra.mxu0 %v665_v11  ;;  %v1082_v14 = vpop.permute.xlu0 %1081 }
 0x17e   :  { %v1086_v17 = vsel %vm84_vm0, %v1082_v14, 0  ;;  %22498 = vmatprep.subr.mxu0 %v24282_v51 }
 0x17f   :  { %v743_v20 = vand.u32 4294901760, %v742_v12  ;;  %v1119_v22 = vand.u32 4294901760, %v1086_v17 }
 0x180   :  { %22491 = vmatmul.mubr.f32.vlgmr.msra.gmra.mxu0 %v704_v18 }
 0x181   :  { %v744_v23 = vsub.f32 %v742_v12, %v743_v20  ;;  %22499 = vmatpush3.xpose.msra.mxu0 %v742_v12  ;;  %22500 = vmatprep.mubr.msk.f32.mxu0 %vm24283_vm1, %v24282_v51  ;;  %v1196_v28 = vsub.f32 %v1086_v17, %v1119_v22 }
 0x182   :  { %22508 = vmatprep.subr.mxu0 %v24282_v51 }
 0x183   :  { %v745_v26 = vand.u32 4294901760, %v744_v23  ;;  %v1197_v30 = vand.u32 4294901760, %v1196_v28 }
 0x184   :  { %22501 = vmatmul.mubr.f32.vlgmr.msra.gmra.mxu0 %v701_v3 }
 0x185   :  { %22494 = vmatpush3.xpose.msra.mxu1 %v745_v26  ;;  %22509 = vmatpush3.xpose.msra.mxu0 %v743_v20  ;;  %v1198_v32 = vsub.f32 %v1196_v28, %v1197_v30 }
 0x186   :  { %22510 = vmatprep.mubr.msk.f32.mxu0 %vm24283_vm1, %v24282_v51  ;;  %22503 = vmatprep.subr.mxu1 %v24282_v51 }
 0x187   :  { %22518 = vmatprep.subr.mxu0 %v24282_v51  ;;  %v1199_v33 = vand.u32 4294901760, %v1198_v32 }
 0x188   :  { %22496 = vmatmul.mubr.f32.vlgmr.msra.gmra.mxu1 %v700_v2  ;;  %22511 = vmatmul.mubr.f32.vlgmr.msra.gmra.mxu0 %v700_v2 }
 0x189   :  { %22504 = vmatpush3.xpose.msra.mxu1 %v665_v11  ;;  %22519 = vmatpush3.xpose.msra.mxu0 %v1119_v22 }
 0x18a   :  { %22505 = vmatprep.mubr.msk.f32.mxu1 %vm24283_vm1, %v24282_v51  ;;  %22520 = vmatprep.mubr.msk.f32.mxu0 %vm24283_vm1, %v24282_v51 }
 0x18b   :  { %22513 = vmatprep.subr.mxu1 %v24282_v51  ;;  %22528 = vmatprep.subr.mxu0 %v24282_v51 }
 0x18c   :  { %22506 = vmatmul.mubr.f32.vlgmr.msra.gmra.mxu1 %v702_v5  ;;  %22521 = vmatmul.mubr.f32.vlgmr.msra.gmra.mxu0 %v1158_v31 }
 0x18d   :  { %22514 = vmatpush3.xpose.msra.mxu1 %v665_v11  ;;  %22529 = vmatpush3.xpose.msra.mxu0 %v1196_v28 }
 0x18e   :  { %22515 = vmatprep.mubr.msk.f32.mxu1 %vm24283_vm1, %v24282_v51  ;;  %22530 = vmatprep.mubr.msk.f32.mxu0 %vm24283_vm1, %v24282_v51 }
 0x18f   :  { %22523 = vmatprep.subr.mxu1 %v24282_v51  ;;  %22538 = vmatprep.subr.mxu0 %v24282_v51 }
 0x190   :  { %22516 = vmatmul.mubr.f32.vlgmr.msra.gmra.mxu1 %v700_v2  ;;  %22531 = vmatmul.mubr.f32.vlgmr.msra.gmra.mxu0 %v1155_v16 }
 0x191   :  { %22524 = vmatpush3.xpose.msra.mxu1 %v1199_v33  ;;  %22539 = vmatpush3.xpose.msra.mxu0 %v1197_v30 }
 0x192   :  { %22525 = vmatprep.mubr.msk.f32.mxu1 %vm24283_vm1, %v24282_v51  ;;  %22540 = vmatprep.mubr.msk.f32.mxu0 %vm24283_vm1, %v24282_v51 }
 0x193   :  { %22533 = vmatprep.subr.mxu1 %v24282_v51  ;;  %22548 = vmatprep.subr.mxu0 %v24282_v51 }
 0x194   :  { %22526 = vmatmul.mubr.f32.vlgmr.msra.gmra.mxu1 %v24469_v8  ;;  %22541 = vmatmul.mubr.f32.vlgmr.msra.gmra.mxu0 %v24469_v8 }
 0x195   :  { %22534 = vmatpush3.xpose.msra.mxu1 %v1119_v22  ;;  %22535 = vmatprep.mubr.msk.f32.mxu1 %vm24283_vm1, %v24282_v51 }
 0x196   :  { %22543 = vmatprep.subr.mxu1 %v24282_v51  ;;  %22550 = vmatprep.mubr.msk.f32.mxu0 %vm24283_vm1, %v24282_v51 }
 0x198   :  { %22536 = vmatmul.mubr.f32.vlgmr.msra.gmra.mxu1 %v1156_v24 }
 0x199   :  { %22544 = vmatpush3.xpose.msra.mxu1 %v1119_v22  ;;  %22545 = vmatprep.mubr.msk.f32.mxu1 %vm24283_vm1, %v24282_v51 }
 0x19a   :  { %22553 = vmatprep.subr.mxu1 %v24282_v51 }
 0x19c   :  { %22546 = vmatmul.mubr.f32.vlgmr.msra.gmra.mxu1 %v24469_v8 }
 0x19d   :  { %22555 = vmatprep.mubr.msk.f32.mxu1 %vm24283_vm1, %v24282_v51 }
 0x240   :  { %v706_v36 = vpop.f32.mrf.mxu0 }
 0x242   :  { %v22492_v37 = vpop.f32.mrf.mxu0 }
 0x244   :  { %v856_v38 = vpop.f32.mrf.mxu0 }
 0x246   :  { %v22502_v39 = vpop.f32.mrf.mxu0 }
 0x248   :  { %v782_v40 = vpop.f32.mrf.mxu1  ;;  %v1004_v41 = vpop.f32.mrf.mxu0 }
 0x249   :  { %v783_v42 = vadd.f32 %v782_v40, %v706_v36 }
 0x24a   :  { %v22497_v43 = vpop.f32.mrf.mxu1  ;;  %v22512_v44 = vpop.f32.mrf.mxu0 }
 0x24b   :  { %v857_v45 = vadd.f32 %v856_v38, %v783_v42 }
 0x24c   :  { %v930_v46 = vpop.f32.mrf.mxu1  ;;  %v1160_v47 = vpop.f32.mrf.mxu0 }
 0x24d   :  { %v931_v48 = vadd.f32 %v930_v46, %v857_v45 }
 0x24e   :  { %v22507_v49 = vpop.f32.mrf.mxu1  ;;  %v22522_v50 = vpop.f32.mrf.mxu0 }
 0x24f   :  { %v1005_v52 = vadd.f32 %v1004_v41, %v931_v48 }
 0x250   :  { %v1076_v53 = vpop.f32.mrf.mxu1  ;;  %v1310_v54 = vpop.f32.mrf.mxu0 }
 0x251   :  { %v1077_v55 = vadd.f32 %v1076_v53, %v1005_v52 }
 0x252   :  { %v22517_v56 = vpop.f32.mrf.mxu1  ;;  %v22532_v57 = vpop.f32.mrf.mxu0 }
 0x253   :  { %v1535_v58 = vsel %vm1534_vm2, %v1077_v55, -inf }
 0x254   :  { %v1236_v59 = vpop.f32.mrf.mxu1  ;;  %1536 = vmax.xlane.f32.xlu1 %v1535_v58  ;;  %v1458_v60 = vpop.f32.mrf.mxu0  ;;  %v622_v58 = vld [vmem:[%s26540_s8 + $0x18] sm:$0xff] }
 0x255   :  { %v1237_v62 = vadd.f32 %v1236_v59, %v1160_v47  ;;  %v24554_v59 = vand.u32 4294901760, %v622_v58 }
 0x256   :  { %v22527_v0 = vpop.f32.mrf.mxu1  ;;  %v22542_v1 = vpop.f32.mrf.mxu0 }
 0x257   :  { %v1311_v2 = vadd.f32 %v1310_v54, %v1237_v62  ;;  %v24560_v62 = vsub.f32 %v622_v58, %v24554_v59  ;;  %v620_v1 = vld [vmem:[%s26540_s8 + $0x8] sm:$0xff] }
 0x258   :  { %v1384_v3 = vpop.f32.mrf.mxu1 }
 0x259   :  { %v1385_v4 = vadd.f32 %v1384_v3, %v1311_v2  ;;  %v24570_v2 = vand.u32 4294901760, %v24560_v62 }
 0x25a   :  { %v22537_v5 = vpop.f32.mrf.mxu1 }
 0x25b   :  { %v1459_v6 = vadd.f32 %v1458_v60, %v1385_v4  ;;  %v621_v60 = vld [vmem:[%s26540_s8 + $0x10] sm:$0xff]  ;;  %v24575_v4 = vand.u32 4294901760, %v620_v1  ;;  %v619_v5 = vld [vmem:[%s26540_s8] sm:$0xff] }
 0x25c   :  { %v1530_v7 = vpop.f32.mrf.mxu1  ;;  %v24562_v0 = vand.u32 4294901760, %v621_v60 }
 0x25d   :  { %v1531_v8 = vadd.f32 %v1530_v7, %v1459_v6  ;;  %v2590_v6 = vsub.f32 %v24560_v62, %v24570_v2 }
 0x25e   :  { %v22547_v9 = vpop.f32.mrf.mxu1  ;;  %v24573_v3 = vsub.f32 %v621_v60, %v24562_v0 }
 0x25f   :  { %v1538_v10 = vsel %vm1534_vm2, %v1531_v8, -inf  ;;  %v24590_v9 = vand.u32 4294901760, %v619_v5 }
 0x260   :  { %1539 = vmax.xlane.f32.xlu1 %v1538_v10  ;;  %v24585_v7 = vand.u32 4294901760, %v24573_v3  ;;  %v2591_v10 = vand.u32 4294901760, %v2590_v6 }
 0x271   :  { %1557 = vrot.lane.b32.xlu1 %v24457_v61, %s24285_s18 }
 0x2dd   :  { %v1537_v11 = vpop.xlane.xlu1 %1536 }
 0x2de   :  { %v1541_v12 = vsub.f32 %v1077_v55, %v1537_v11  ;;  %v2597_v11 = vsub.f32 %v24573_v3, %v24585_v7 }
 0x2e0   :  { %v1543_v14 = vmul.f32 1.442695, %v1541_v12 }
 0x2e2   :  { %24161 = vpow2.f32 %v1543_v14  ;;  %v24600_v14 = vsub.f32 %v619_v5, %v24590_v9 }
 0x2e9   :  { %v1540_v16 = vpop.xlane.xlu1 %1539 }
 0x2ea   :  { %v1542_v17 = vsub.f32 %v1531_v8, %v1540_v16  ;;  %v24588_v8 = vsub.f32 %v620_v1, %v24575_v4  ;;  %v2598_v16 = vand.u32 4294901760, %v2597_v11 }
 0x2ec   :  { %v1545_v18 = vmul.f32 1.442695, %v1542_v17  ;;  %v24597_v12 = vand.u32 4294901760, %v24588_v8 }
 0x2ed   :  { %v1558_v20 = vpop.permute.xlu1 %1557 }
 0x2ee   :  { %24163 = vpow2.f32 %v1545_v18  ;;  %v1594_v22 = vand.u32 4294901760, %v1558_v20  ;;  %v2604_v17 = vsub.f32 %v24588_v8, %v24597_v12  ;;  %v24607_v18 = vand.u32 4294901760, %v24600_v14 }
 0x2ef   :  { %v24162_v23 = vpop.eup %24161 }
 0x2f0   :  { %v1671_v24 = vsub.f32 %v1558_v20, %v1594_v22  ;;  %22549 = vmatpush3.msra.mxu0 %v1594_v22  ;;  %v1547_v26 = vsel %vm1534_vm2, %v24162_v23, 0.0  ;;  %v2605_v20 = vand.u32 4294901760, %v2604_v17 }
 0x2f1   :  { %1548 = vadd.xlane.f32.xlu0 %v1547_v26  ;;  %22558 = vmatprep.subr.mxu0 %v24282_v51 }
 0x2f2   :  { %v1672_v28 = vand.u32 4294901760, %v1671_v24 }
 0x2f4   :  { %v1673_v61 = vsub.f32 %v1671_v24, %v1672_v28 }
 0x2f6   :  { %v1674_v29 = vand.u32 4294901760, %v1673_v61 }
 0x2f8   :  { %22554 = vmatpush3.msra.mxu1 %v1674_v29 }
 0x2f9   :  { %22563 = vmatprep.subr.mxu1 %v24282_v51 }
 0x2fb   :  { %v24164_v30 = vpop.eup %24163 }
 0x2fc   :  { %v1550_v31 = vsel %vm1534_vm2, %v24164_v30, 0.0 }
 0x2fd   :  { %1551 = vadd.xlane.f32.xlu1 %v1550_v31 }
 0x30e   :  { %2009 = vrot.lane.b32.xlu1 %v24461_v63, %s24285_s18 }
 0x37a   :  { %v1549_v32 = vpop.xlane.xlu0 %1548 }
 0x37b   :  { %24165 = vrcp.f32 %v1549_v32 }
 0x386   :  { %v1552_v33 = vpop.xlane.xlu1 %1551 }
 0x387   :  { %24167 = vrcp.f32 %v1552_v33 }
 0x388   :  { %v24166_v36 = vpop.eup %24165 }
 0x389   :  { %v1554_v37 = vmul.f32 %v24166_v36, %v24162_v23 }
 0x38a   :  { %v2010_v38 = vpop.permute.xlu1 %2009 }
 0x38b   :  { %v2046_v39 = vand.u32 4294901760, %v2010_v38  ;;  %v1561_v40 = vsel %vm1534_vm2, %v1554_v37, 0 }
 0x38c   :  { %v1629_v41 = vand.u32 4294901760, %v1561_v40 }
 0x38d   :  { %v2123_v42 = vsub.f32 %v2010_v38, %v2046_v39 }
 0x38e   :  { %v1630_v43 = vsub.f32 %v1561_v40, %v1629_v41  ;;  %22556 = vmatmul.mubr.f32.vlgmr.msra.gmra.mxu1 %v1629_v41 }
 0x38f   :  { %v2124_v44 = vand.u32 4294901760, %v2123_v42  ;;  %22564 = vmatpush3.msra.mxu1 %v1594_v22  ;;  %22565 = vmatprep.mubr.msk.f32.mxu1 %vm24283_vm1, %v24282_v51 }
 0x390   :  { %22573 = vmatprep.subr.mxu1 %v24282_v51  ;;  %v1631_v63 = vand.u32 4294901760, %v1630_v43 }
 0x391   :  { %v2125_v45 = vsub.f32 %v2123_v42, %v2124_v44 }
 0x392   :  { %22566 = vmatmul.mubr.f32.vlgmr.msra.gmra.mxu1 %v1631_v63  ;;  %v1632_v46 = vsub.f32 %v1630_v43, %v1631_v63 }
 0x393   :  { %v2126_v47 = vand.u32 4294901760, %v2125_v45  ;;  %22574 = vmatpush3.msra.mxu1 %v1594_v22  ;;  %22575 = vmatprep.mubr.msk.f32.mxu1 %vm24283_vm1, %v24282_v51  ;;  %v2611_v22 = vsub.f32 %v24600_v14, %v24607_v18 }
 0x394   :  { %v24168_v48 = vpop.eup %24167  ;;  %22583 = vmatprep.subr.mxu1 %v24282_v51  ;;  %v1633_v49 = vand.u32 4294901760, %v1632_v46 }
 0x395   :  { %v1556_v50 = vmul.f32 %v24168_v48, %v24164_v30  ;;  %v2612_v23 = vand.u32 4294901760, %v2611_v22  ;;  %v3004_v22 = vld [vmem:[%s26536_s4 + $0x18] sm:$0xff] }
 0x396   :  { %22551 = vmatmul.mubr.f32.vlgmr.msra.gmra.mxu0 %v1633_v49  ;;  %22576 = vmatmul.mubr.f32.vlgmr.msra.gmra.mxu1 %v1629_v41 }
 0x397   :  { %22559 = vmatpush3.msra.mxu0 %v1671_v24  ;;  %22584 = vmatpush3.msra.mxu1 %v2126_v47  ;;  %v2013_v52 = vsel %vm1534_vm2, %v1556_v50, 0 }
 0x398   :  { %22560 = vmatprep.mubr.msk.f32.mxu0 %vm24283_vm1, %v24282_v51  ;;  %22568 = vmatprep.subr.mxu0 %v24282_v51  ;;  %v2081_v53 = vand.u32 4294901760, %v2013_v52 }
 0x399   :  { %22585 = vmatprep.mubr.msk.f32.mxu1 %vm24283_vm1, %v24282_v51  ;;  %22593 = vmatprep.subr.mxu1 %v24282_v51 }
 0x39a   :  { %22561 = vmatmul.mubr.f32.vlgmr.msra.gmra.mxu0 %v1630_v43  ;;  %v2082_v54 = vsub.f32 %v2013_v52, %v2081_v53  ;;  %22586 = vmatmul.mubr.f32.vlgmr.msra.gmra.mxu1 %v2081_v53 }
 0x39b   :  { %22569 = vmatpush3.msra.mxu0 %v1672_v28  ;;  %22594 = vmatpush3.msra.mxu1 %v2046_v39 }
 0x39c   :  { %22570 = vmatprep.mubr.msk.f32.mxu0 %vm24283_vm1, %v24282_v51  ;;  %22578 = vmatprep.subr.mxu0 %v24282_v51  ;;  %v2083_v55 = vand.u32 4294901760, %v2082_v54 }
 0x39d   :  { %22595 = vmatprep.mubr.msk.f32.mxu1 %vm24283_vm1, %v24282_v51  ;;  %22603 = vmatprep.subr.mxu1 %v24282_v51 }
 0x39e   :  { %22571 = vmatmul.mubr.f32.vlgmr.msra.gmra.mxu0 %v1629_v41  ;;  %22596 = vmatmul.mubr.f32.vlgmr.msra.gmra.mxu1 %v2083_v55  ;;  %v2084_v56 = vsub.f32 %v2082_v54, %v2083_v55 }
 0x39f   :  { %22579 = vmatpush3.msra.mxu0 %v2046_v39  ;;  %22604 = vmatpush3.msra.mxu1 %v2046_v39 }
 0x3a0   :  { %22580 = vmatprep.mubr.msk.f32.mxu0 %vm24283_vm1, %v24282_v51  ;;  %22588 = vmatprep.subr.mxu0 %v24282_v51  ;;  %v2085_v57 = vand.u32 4294901760, %v2084_v56 }
 0x3a1   :  { %22605 = vmatprep.mubr.msk.f32.mxu1 %vm24283_vm1, %v24282_v51  ;;  %22619 = vmatprep.subr.mxu1 %v2591_v10 }
 0x3a2   :  { %22581 = vmatmul.mubr.f32.vlgmr.msra.gmra.mxu0 %v2085_v57  ;;  %22606 = vmatmul.mubr.f32.vlgmr.msra.gmra.mxu1 %v2081_v53 }
 0x3a3   :  { %22589 = vmatpush3.msra.mxu0 %v2123_v42  ;;  %22590 = vmatprep.mubr.msk.f32.mxu0 %vm24283_vm1, %v24282_v51 }
 0x3a4   :  { %22598 = vmatprep.subr.mxu0 %v24282_v51  ;;  %22620 = vmatpush3.msra.mxu1 %v2591_v10 }
 0x3a5   :  { %22621 = vmatprep.subr.mxu1 %v2598_v16 }
 0x3a6   :  { %22591 = vmatmul.mubr.f32.vlgmr.msra.gmra.mxu0 %v2082_v54  ;;  %22622 = vmatpush3.msra.mxu1 %v2598_v16 }
 0x3a7   :  { %22599 = vmatpush3.msra.mxu0 %v2124_v44  ;;  %22600 = vmatprep.mubr.msk.f32.mxu0 %vm24283_vm1, %v24282_v51 }
 0x3a8   :  { %22608 = vmatprep.subr.mxu0 %v24554_v59  ;;  %22623 = vmatprep.subr.mxu1 %v2605_v20 }
 0x3a9   :  { %22624 = vmatpush3.msra.mxu1 %v2605_v20 }
 0x3aa   :  { %22601 = vmatmul.mubr.f32.vlgmr.msra.gmra.mxu0 %v2081_v53  ;;  %22625 = vmatprep.subr.mxu1 %v2612_v23 }
 0x3ab   :  { %22609 = vmatpush3.msra.mxu0 %v24554_v59  ;;  %22626 = vmatpush3.msra.mxu1 %v2612_v23 }
 0x3ac   :  { %22610 = vmatprep.subr.mxu0 %v24562_v0  ;;  %22641 = vmatprep.subr.mxu1 %v24554_v59 }
 0x3ad   :  { %22611 = vmatpush3.msra.mxu0 %v24562_v0 }
 0x3ae   :  { %22612 = vmatprep.subr.mxu0 %v24575_v4 }
 0x3af   :  { %22613 = vmatpush3.msra.mxu0 %v24575_v4 }
 0x3b0   :  { %22614 = vmatprep.subr.mxu0 %v24590_v9 }
 0x3b1   :  { %22615 = vmatpush3.msra.mxu0 %v24590_v9 }
 0x3b2   :  { %22630 = vmatprep.subr.mxu0 %v24560_v62 }
 0x44e   :  { %v1711_v24 = vpop.f32.mrf.mxu1 }
 0x450   :  { %v22557_v26 = vpop.f32.mrf.mxu1 }
 0x452   :  { %v1859_v28 = vpop.f32.mrf.mxu1 }
 0x454   :  { %v22567_v61 = vpop.f32.mrf.mxu1 }
 0x455   :  { %v3002_v61 = vld [vmem:[%s26536_s4 + $0x8] sm:$0xff] }
 0x456   :  { %v1635_v29 = vpop.f32.mrf.mxu0  ;;  %v2005_v30 = vpop.f32.mrf.mxu1 }
 0x457   :  { %v1712_v33 = vadd.f32 %v1711_v24, %v1635_v29  ;;  %v3003_v24 = vld [vmem:[%s26536_s4 + $0x10] sm:$0xff] }
 0x458   :  { %v22552_v31 = vpop.f32.mrf.mxu0  ;;  %v22577_v32 = vpop.f32.mrf.mxu1 }
 0x45a   :  { %v1785_v36 = vpop.f32.mrf.mxu0  ;;  %v2163_v37 = vpop.f32.mrf.mxu1 }
 0x45b   :  { %v1786_v38 = vadd.f32 %v1785_v36, %v1712_v33  ;;  %v24643_v33 = vand.u32 4294901760, %v3002_v61  ;;  %v3001_v36 = vld [vmem:[%s26536_s4] sm:$0xff] }
 0x45c   :  { %v22562_v39 = vpop.f32.mrf.mxu0  ;;  %v22587_v40 = vpop.f32.mrf.mxu1 }
 0x45d   :  { %v1860_v41 = vadd.f32 %v1859_v28, %v1786_v38  ;;  %v24629_v28 = vand.u32 4294901760, %v3004_v22  ;;  %v24654_v39 = vand.u32 4294901760, %v3001_v36 }
 0x45e   :  { %v1933_v42 = vpop.f32.mrf.mxu0  ;;  %v2311_v43 = vpop.f32.mrf.mxu1 }
 0x45f   :  { %v1934_v44 = vadd.f32 %v1933_v42, %v1860_v41  ;;  %v24641_v32 = vsub.f32 %v3004_v22, %v24629_v28  ;;  %v24661_v41 = vsub.f32 %v3002_v61, %v24643_v33 }
 0x460   :  { %v22572_v63 = vpop.f32.mrf.mxu0  ;;  %v22597_v45 = vpop.f32.mrf.mxu1 }
 0x461   :  { %v2006_v46 = vadd.f32 %v2005_v30, %v1934_v44  ;;  %v24636_v30 = vand.u32 4294901760, %v3003_v24  ;;  %v24658_v40 = vand.u32 4294901760, %v24641_v32  ;;  %v71_v45 = vld [vmem:[%s26533_s1] sm:$0xff] }
 0x462   :  { %v2087_v47 = vpop.f32.mrf.mxu0  ;;  %v2457_v48 = vpop.f32.mrf.mxu1 }
 0x463   :  { %v2468_v49 = vsel %vm84_vm0, %v2006_v46, 0  ;;  %v2164_v54 = vadd.f32 %v2163_v37, %v2087_v47  ;;  %v24651_v38 = vsub.f32 %v3003_v24, %v24636_v30  ;;  %v72_v47 = vld [vmem:[%s26533_s1 + $0x8] sm:$0xff]  ;;  %s24293_s1 = smov 24  }
 0x464   :  { %v24614_v50 = vand.u32 4294901760, %v2468_v49  ;;  %v22582_v52 = vpop.f32.mrf.mxu0  ;;  %v22607_v53 = vpop.f32.mrf.mxu1 }
 0x465   :  { %v24667_v42 = vand.u32 4294901760, %v24651_v38  ;;  %v3552_v52 = vsel %vm84_vm0, %v71_v45, 0  ;;  %v3555_v53 = vsel %vm84_vm0, %v72_v47, 0 }
 0x466   :  { %v2543_v55 = vsub.f32 %v2468_v49, %v24614_v50  ;;  %v2237_v56 = vpop.f32.mrf.mxu0  ;;  %22627 = vmatprep.mubr.f32.mxu1 %v24614_v50  ;;  %v3540_v49 = vld [vmem:[#allocation4] sm:$0xff] }
 0x467   :  { %v2238_v57 = vadd.f32 %v2237_v56, %v2164_v54  ;;  %v3136_v44 = vsub.f32 %v24651_v38, %v24667_v42 }
 0x468   :  { %v22592_v58 = vpop.f32.mrf.mxu0  ;;  %v2544_v60 = vand.u32 4294901760, %v2543_v55 }
 0x469   :  { %v2312_v1 = vadd.f32 %v2311_v43, %v2238_v57  ;;  %v24671_v43 = vsub.f32 %v3001_v36, %v24654_v39  ;;  %v24763_v57 = vand.u32 4294901760, %v3552_v52 }
 0x46a   :  { %v2385_v5 = vpop.f32.mrf.mxu0  ;;  %v2545_v6 = vsub.f32 %v2543_v55, %v2544_v60 }
 0x46b   :  { %v2386_v10 = vadd.f32 %v2385_v5, %v2312_v1 }
 0x46c   :  { %v22602_v11 = vpop.f32.mrf.mxu0  ;;  %v2546_v16 = vand.u32 4294901760, %v2545_v6 }
 0x46d   :  { %v2458_v17 = vadd.f32 %v2457_v48, %v2386_v10  ;;  %v24787_v10 = vsub.f32 %v3552_v52, %v24763_v57 }
 0x46e   :  { %22616 = vmatprep.mubr.f32.mxu0 %v2546_v16 }
 0x46f   :  { %v2471_v20 = vsel %vm84_vm0, %v2458_v17, 0 }
 0x470   :  { %v24622_v23 = vand.u32 4294901760, %v2471_v20 }
 0x472   :  { %v2553_v26 = vsub.f32 %v2471_v20, %v24622_v23  ;;  %22628 = vmatmul.mubr.f32.vlgmr.msra.gmra.mxu1 %v24622_v23 }
 0x473   :  { %22642 = vmatpush3.msra.mxu1 %v24554_v59  ;;  %22649 = vmatprep.mubr.f32.mxu1 %v2544_v60  ;;  %v24770_v60 = vand.u32 4294901760, %v3555_v53 }
 0x474   :  { %22643 = vmatprep.subr.mxu1 %v24562_v0  ;;  %v2554_v29 = vand.u32 4294901760, %v2553_v26 }
 0x475   :  { %22644 = vmatpush3.msra.mxu1 %v24562_v0  ;;  %v24795_v16 = vsub.f32 %v3555_v53, %v24770_v60 }
 0x476   :  { %22645 = vmatprep.subr.mxu1 %v24575_v4  ;;  %v2555_v31 = vsub.f32 %v2553_v26, %v2554_v29 }
 0x477   :  { %22646 = vmatpush3.msra.mxu1 %v24575_v4 }
 0x478   :  { %22647 = vmatprep.subr.mxu1 %v24590_v9  ;;  %v2556_v37 = vand.u32 4294901760, %v2555_v31 }
 0x479   :  { %22648 = vmatpush3.msra.mxu1 %v24590_v9 }
 0x47a   :  { %22650 = vmatmul.mubr.f32.vlgmr.msra.gmra.mxu1 %v2554_v29  ;;  %22663 = vmatprep.subr.mxu1 %v24554_v59 }
 0x47b   :  { %22617 = vmatmul.mubr.f32.vlgmr.msra.gmra.mxu0 %v2556_v37  ;;  %22664 = vmatpush3.msra.mxu1 %v24554_v59  ;;  %v3129_v59 = vsub.f32 %v24641_v32, %v24658_v40  ;;  %v21618_v37 = vld [vmem:[%s26541_s9] ss:$0 sm:$0xff] }
 0x47c   :  { %22631 = vmatpush3.msra.mxu0 %v24560_v62  ;;  %22671 = vmatprep.mubr.f32.mxu1 %v24614_v50  ;;  %v24678_v62 = vand.u32 4294901760, %v24661_v41 }
 0x47d   :  { %22632 = vmatprep.subr.mxu0 %v24573_v3  ;;  %22638 = vmatprep.mubr.f32.mxu0 %v2543_v55  ;;  %v24756_v55 = vand.u32 4294901760, %v3540_v49 }
 0x47e   :  { %22665 = vmatprep.subr.mxu1 %v24562_v0  ;;  %22633 = vmatpush3.msra.mxu0 %v24573_v3  ;;  %v24689_v3 = vand.u32 4294901760, %v24671_v43  ;;  %v3143_v63 = vsub.f32 %v24661_v41, %v24678_v62 }
 0x47f   :  { %22666 = vmatpush3.msra.mxu1 %v24562_v0  ;;  %22634 = vmatprep.subr.mxu0 %v24588_v8  ;;  %v3130_v0 = vand.u32 4294901760, %v3129_v59  ;;  %v24780_v5 = vsub.f32 %v3540_v49, %v24756_v55 }
 0x480   :  { %22667 = vmatprep.subr.mxu1 %v24575_v4  ;;  %22635 = vmatpush3.msra.mxu0 %v24588_v8  ;;  %v3150_v8 = vsub.f32 %v24671_v43, %v24689_v3 }
 0x481   :  { %22668 = vmatpush3.msra.mxu1 %v24575_v4  ;;  %22636 = vmatprep.subr.mxu0 %v24600_v14  ;;  %v3137_v4 = vand.u32 4294901760, %v3136_v44  ;;  %v24804_v20 = vand.u32 4294901760, %v24780_v5 }
 0x482   :  { %22669 = vmatprep.subr.mxu1 %v24590_v9  ;;  %22637 = vmatpush3.msra.mxu0 %v24600_v14  ;;  %v3144_v14 = vand.u32 4294901760, %v3143_v63 }
 0x483   :  { %22670 = vmatpush3.msra.mxu1 %v24590_v9  ;;  %22639 = vmatmul.mubr.f32.vlgmr.msra.gmra.mxu0 %v2553_v26  ;;  %v3151_v9 = vand.u32 4294901760, %v3150_v8  ;;  %v3638_v26 = vand.u32 4294901760, %v24795_v16  ;;  %v3695_v61 = vsub.f32 %v24780_v5, %v24804_v20 }
 0x484   :  { %22652 = vmatprep.subr.mxu0 %v24570_v2  ;;  %22672 = vmatmul.mubr.f32.vlgmr.msra.gmra.mxu1 %v24622_v23 }
 0x485   :  { %22653 = vmatpush3.msra.mxu0 %v24570_v2  ;;  %22660 = vmatprep.mubr.f32.mxu0 %v24614_v50  ;;  %v3543_v2 = vld [vmem:[#allocation4 + $0x18] sm:$0xff]  ;;  %v3639_v31 = vsub.f32 %v24795_v16, %v3638_v26 }
 0x486   :  { %22654 = vmatprep.subr.mxu0 %v24585_v7  ;;  %22685 = vmatprep.subr.mxu1 %v3130_v0 }
 0x487   :  { %22655 = vmatpush3.msra.mxu0 %v24585_v7  ;;  %22686 = vmatpush3.msra.mxu1 %v3130_v0  ;;  %v24722_v7 = vand.u32 4294901760, %v3543_v2  ;;  %v3640_v36 = vand.u32 4294901760, %v3639_v31 }
 0x488   :  { %22656 = vmatprep.subr.mxu0 %v24597_v12  ;;  %22687 = vmatprep.subr.mxu1 %v3137_v4 }
 0x489   :  { %22657 = vmatpush3.msra.mxu0 %v24597_v12  ;;  %22688 = vmatpush3.msra.mxu1 %v3137_v4  ;;  %v3542_v12 = vld [vmem:[#allocation4 + $0x10] sm:$0xff]  ;;  %v24741_v48 = vsub.f32 %v3543_v2, %v24722_v7 }
 0x48a   :  { %22658 = vmatprep.subr.mxu0 %v24607_v18  ;;  %22689 = vmatprep.subr.mxu1 %v3144_v14  ;;  %v24733_v46 = vand.u32 4294901760, %v3542_v12 }
 0x48b   :  { %22659 = vmatpush3.msra.mxu0 %v24607_v18  ;;  %22690 = vmatpush3.msra.mxu1 %v3144_v14  ;;  %v3541_v18 = vld [vmem:[#allocation4 + $0x8] sm:$0xff]  ;;  %v24761_v56 = vand.u32 4294901760, %v24741_v48 }
 0x48c   :  { %22661 = vmatmul.mubr.f32.vlgmr.msra.gmra.mxu0 %v24622_v23  ;;  %22674 = vmatprep.subr.mxu0 %v24629_v28  ;;  %v24745_v50 = vand.u32 4294901760, %v3541_v18  ;;  %v24754_v54 = vsub.f32 %v3542_v12, %v24733_v46  ;;  %v3628_v23 = vand.u32 4294901760, %v24787_v10 }
 0x48d   :  { %22675 = vmatpush3.msra.mxu0 %v24629_v28  ;;  %22691 = vmatprep.subr.mxu1 %v3151_v9  ;;  %v3674_v6 = vsub.f32 %v24741_v48, %v24761_v56 }
 0x48e   :  { %22676 = vmatprep.subr.mxu0 %v24636_v30  ;;  %22682 = vmatprep.mubr.f32.mxu0 %v24417_v34  ;;  %v24768_v58 = vsub.f32 %v3541_v18, %v24745_v50  ;;  %v24777_v1 = vand.u32 4294901760, %v24754_v54  ;;  %v3629_v29 = vsub.f32 %v24787_v10, %v3628_v23  ;;  %v21619_v18 = vld [vmem:[%s26537_s5] ss:$0 sm:$0xff] }
 0x48f   :  { %22677 = vmatpush3.msra.mxu0 %v24636_v30  ;;  %22692 = vmatpush3.msra.mxu1 %v3151_v9  ;;  %v3675_v22 = vand.u32 4294901760, %v3674_v6 }
 0x490   :  { %22678 = vmatprep.subr.mxu0 %v24643_v33  ;;  %22693 = vmatprep.mubr.f32.mxu1 %v24386_v13  ;;  %v24792_v11 = vand.u32 4294901760, %v24768_v58  ;;  %v3681_v17 = vsub.f32 %v24754_v54, %v24777_v1 }
 0x491   :  { %22679 = vmatpush3.msra.mxu0 %v24643_v33  ;;  %22707 = vmatprep.subr.mxu1 %v24629_v28 }
 0x492   :  { %22680 = vmatprep.subr.mxu0 %v24654_v39  ;;  %22694 = vmatmul.mubr.f32.vlgmr.msra.gmra.mxu1 %v24389_v15  ;;  %v3688_v24 = vsub.f32 %v24768_v58, %v24792_v11 }
 0x493   :  { %22681 = vmatpush3.msra.mxu0 %v24654_v39  ;;  %22708 = vmatpush3.msra.mxu1 %v24629_v28 }
 0x494   :  { %22683 = vmatmul.mubr.f32.vlgmr.msra.gmra.mxu0 %v24419_v35  ;;  %22696 = vmatprep.subr.mxu0 %v24641_v32 }
 0x495   :  { %22697 = vmatpush3.msra.mxu0 %v24641_v32  ;;  %22709 = vmatprep.subr.mxu1 %v24636_v30  ;;  %v3696_v32 = vand.u32 4294901760, %v3695_v61 }
 0x496   :  { %22698 = vmatprep.subr.mxu0 %v24651_v38  ;;  %22710 = vmatpush3.msra.mxu1 %v24636_v30 }
 0x497   :  { %22699 = vmatpush3.msra.mxu0 %v24651_v38  ;;  %22711 = vmatprep.subr.mxu1 %v24643_v33 }
 0x498   :  { %22700 = vmatprep.subr.mxu0 %v24661_v41  ;;  %22712 = vmatpush3.msra.mxu1 %v24643_v33 }
 0x499   :  { %22701 = vmatpush3.msra.mxu0 %v24661_v41  ;;  %22713 = vmatprep.subr.mxu1 %v24654_v39 }
 0x49a   :  { %22702 = vmatprep.subr.mxu0 %v24671_v43  ;;  %22704 = vmatprep.mubr.f32.mxu0 %v24396_v19 }
 0x49b   :  { %22703 = vmatpush3.msra.mxu0 %v24671_v43  ;;  %22714 = vmatpush3.msra.mxu1 %v24654_v39 }
 0x49c   :  { %22705 = vmatmul.mubr.f32.vlgmr.msra.gmra.mxu0 %v24399_v21  ;;  %22715 = vmatprep.mubr.f32.mxu1 %v24405_v25 }
 0x49d   :  { %22718 = vmatprep.subr.mxu0 %v24658_v40  ;;  %22729 = vmatprep.subr.mxu1 %v24629_v28 }
 0x49e   :  { %22716 = vmatmul.mubr.f32.vlgmr.msra.gmra.mxu1 %v24408_v27  ;;  %22719 = vmatpush3.msra.mxu0 %v24658_v40 }
 0x49f   :  { %22730 = vmatpush3.msra.mxu1 %v24629_v28  ;;  %22720 = vmatprep.subr.mxu0 %v24667_v42  ;;  %v3682_v28 = vand.u32 4294901760, %v3681_v17 }
 0x4a0   :  { %22731 = vmatprep.subr.mxu1 %v24636_v30  ;;  %22721 = vmatpush3.msra.mxu0 %v24667_v42 }
 0x4a1   :  { %22732 = vmatpush3.msra.mxu1 %v24636_v30  ;;  %22722 = vmatprep.subr.mxu0 %v24678_v62  ;;  %v3689_v30 = vand.u32 4294901760, %v3688_v24 }
 0x4a2   :  { %22733 = vmatprep.subr.mxu1 %v24643_v33  ;;  %22723 = vmatpush3.msra.mxu0 %v24678_v62 }
 0x4a3   :  { %22734 = vmatpush3.msra.mxu1 %v24643_v33  ;;  %22724 = vmatprep.subr.mxu0 %v24689_v3  ;;  %v3630_v33 = vand.u32 4294901760, %v3629_v29 }
 0x4a4   :  { %22735 = vmatprep.subr.mxu1 %v24654_v39  ;;  %22725 = vmatpush3.msra.mxu0 %v24689_v3 }
 0x4a5   :  { %22726 = vmatprep.mubr.f32.mxu0 %v24386_v13  ;;  %22736 = vmatpush3.msra.mxu1 %v24654_v39 }
 0x4a6   :  { %22727 = vmatmul.mubr.f32.vlgmr.msra.gmra.mxu0 %v24389_v15  ;;  %22737 = vmatprep.mubr.f32.mxu1 %v24386_v13 }
 0x4a7   :  { %22740 = vmatprep.subr.mxu0 %v24722_v7  ;;  %22751 = vmatprep.subr.mxu1 %v3675_v22 }
 0x4a8   :  { %22738 = vmatmul.mubr.f32.vlgmr.msra.gmra.mxu1 %v24389_v15  ;;  %22741 = vmatpush3.msra.mxu0 %v24722_v7 }
 0x4a9   :  { %22752 = vmatpush3.msra.mxu1 %v3675_v22  ;;  %22742 = vmatprep.subr.mxu0 %v24733_v46 }
 0x4aa   :  { %22753 = vmatprep.subr.mxu1 %v3682_v28  ;;  %22743 = vmatpush3.msra.mxu0 %v24733_v46 }
 0x4ab   :  { %22754 = vmatpush3.msra.mxu1 %v3682_v28  ;;  %22744 = vmatprep.subr.mxu0 %v24745_v50 }
 0x4ac   :  { %22755 = vmatprep.subr.mxu1 %v3689_v30  ;;  %22745 = vmatpush3.msra.mxu0 %v24745_v50 }
 0x4ad   :  { %22756 = vmatpush3.msra.mxu1 %v3689_v30  ;;  %22746 = vmatprep.subr.mxu0 %v24756_v55 }
 0x4ae   :  { %22757 = vmatprep.subr.mxu1 %v3696_v32  ;;  %22747 = vmatpush3.msra.mxu0 %v24756_v55 }
 0x4af   :  { %22748 = vmatprep.mubr.f32.mxu0 %v3630_v33  ;;  %22758 = vmatpush3.msra.mxu1 %v3696_v32 }
 0x4b0   :  { %22749 = vmatmul.mubr.f32.vlgmr.msra.gmra.mxu0 %v3640_v36  ;;  %22759 = vmatprep.mubr.f32.mxu1 %v24763_v57 }
 0x4b1   :  { %22762 = vmatprep.subr.mxu0 %v24741_v48  ;;  %22773 = vmatprep.subr.mxu1 %v24722_v7 }
 0x4b2   :  { %22760 = vmatmul.mubr.f32.vlgmr.msra.gmra.mxu1 %v24770_v60  ;;  %22763 = vmatpush3.msra.mxu0 %v24741_v48 }
 0x4b3   :  { %22774 = vmatpush3.msra.mxu1 %v24722_v7  ;;  %22764 = vmatprep.subr.mxu0 %v24754_v54 }
 0x4b4   :  { %22775 = vmatprep.subr.mxu1 %v24733_v46  ;;  %22765 = vmatpush3.msra.mxu0 %v24754_v54 }
 0x4b5   :  { %22776 = vmatpush3.msra.mxu1 %v24733_v46  ;;  %22766 = vmatprep.subr.mxu0 %v24768_v58 }
 0x4b6   :  { %22777 = vmatprep.subr.mxu1 %v24745_v50  ;;  %22767 = vmatpush3.msra.mxu0 %v24768_v58 }
 0x4b7   :  { %22778 = vmatpush3.msra.mxu1 %v24745_v50  ;;  %22768 = vmatprep.subr.mxu0 %v24780_v5 }
 0x4b8   :  { %22779 = vmatprep.subr.mxu1 %v24756_v55  ;;  %22769 = vmatpush3.msra.mxu0 %v24780_v5 }
 0x4b9   :  { %22770 = vmatprep.mubr.f32.mxu0 %v24787_v10  ;;  %22780 = vmatpush3.msra.mxu1 %v24756_v55 }
 0x4ba   :  { %22771 = vmatmul.mubr.f32.vlgmr.msra.gmra.mxu0 %v24795_v16  ;;  %22781 = vmatprep.mubr.f32.mxu1 %v3628_v23 }
 0x4bb   :  { %22784 = vmatprep.subr.mxu0 %v24761_v56  ;;  %22795 = vmatprep.subr.mxu1 %v24722_v7 }
 0x4bc   :  { %22782 = vmatmul.mubr.f32.vlgmr.msra.gmra.mxu1 %v3638_v26  ;;  %22785 = vmatpush3.msra.mxu0 %v24761_v56 }
 0x4bd   :  { %22796 = vmatpush3.msra.mxu1 %v24722_v7  ;;  %22786 = vmatprep.subr.mxu0 %v24777_v1 }
 0x4be   :  { %22797 = vmatprep.subr.mxu1 %v24733_v46  ;;  %22787 = vmatpush3.msra.mxu0 %v24777_v1 }
 0x4bf   :  { %22798 = vmatpush3.msra.mxu1 %v24733_v46  ;;  %22788 = vmatprep.subr.mxu0 %v24792_v11 }
 0x4c0   :  { %22799 = vmatprep.subr.mxu1 %v24745_v50  ;;  %22789 = vmatpush3.msra.mxu0 %v24792_v11 }
 0x4c1   :  { %22800 = vmatpush3.msra.mxu1 %v24745_v50  ;;  %22790 = vmatprep.subr.mxu0 %v24804_v20 }
 0x4c2   :  { %22801 = vmatprep.subr.mxu1 %v24756_v55  ;;  %22791 = vmatpush3.msra.mxu0 %v24804_v20  ;;  %v21620_v20 = vld [vmem:[%s26539_s7] ss:$0 sm:$0xff] }
 0x4c3   :  { %22792 = vmatprep.mubr.f32.mxu0 %v24763_v57  ;;  %22802 = vmatpush3.msra.mxu1 %v24756_v55 }
 0x4c4   :  { %22803 = vmatprep.mubr.f32.mxu1 %v24763_v57  ;;  %22793 = vmatmul.mubr.f32.vlgmr.msra.gmra.mxu0 %v24770_v60 }
 0x4c5   :  { %22804 = vmatmul.mubr.f32.vlgmr.msra.gmra.mxu1 %v24770_v60  ;;  %22806 = vmatprep.subr.mxu0 %v24282_v51 }
 0x4c6   :  { %22808 = vmatprep.mubr.msk.f32.mxu0 %vm24283_vm1, %v24282_v51  ;;  %22811 = vmatprep.subr.mxu1 %v24282_v51 }
 0x4c7   :  { %22813 = vmatprep.mubr.msk.f32.mxu1 %vm24283_vm1, %v24282_v51 }
 0x532   :  { %v22629_v40 = vpop.f32.mrf.mxu1 }
 0x534   :  { %v24882_v43 = vpop.f32.mrf.mxu1 }
 0x53a   :  { %v22651_v44 = vpop.f32.mrf.mxu1 }
 0x53b   :  { %v22618_v38 = vpop.f32.mrf.mxu0 }
 0x53c   :  { %v2559_v39 = vadd.f32 %v22618_v38, %v21618_v37  ;;  %v24886_v63 = vpop.f32.mrf.mxu1 }
 0x53d   :  { %v24880_v42 = vpop.f32.mrf.mxu0 }
 0x53e   :  { %v2656_v41 = vadd.f32 %v22629_v40, %v2559_v39 }
 0x543   :  { %v22640_v59 = vpop.f32.mrf.mxu0 }
 0x544   :  { %v2743_v62 = vadd.f32 %v22640_v59, %v2656_v41  ;;  %v22673_v14 = vpop.f32.mrf.mxu1 }
 0x545   :  { %v24884_v0 = vpop.f32.mrf.mxu0 }
 0x546   :  { %v2828_v3 = vadd.f32 %v22651_v44, %v2743_v62  ;;  %v24892_v12 = vpop.f32.mrf.mxu1 }
 0x54c   :  { %v22662_v4 = vpop.f32.mrf.mxu0 }
 0x54d   :  { %v2917_v8 = vadd.f32 %v22662_v4, %v2828_v3 }
 0x54e   :  { %v24890_v2 = vpop.f32.mrf.mxu0 }
 0x54f   :  { %v24888_v9 = vadd.f32 %v22673_v14, %v2917_v8 }
 0x552   :  { %v22695_v45 = vpop.f32.mrf.mxu1 }
 0x554   :  { %v22684_v7 = vpop.f32.mrf.mxu0  ;;  %v3188_v49 = vpop.f32.mrf.mxu1 }
 0x555   :  { %v3098_v1 = vadd.f32 %v22684_v7, %v21619_v18 }
 0x556   :  { %v3087_v46 = vpop.f32.mrf.mxu0 }
 0x557   :  { %v3088_v48 = vadd.f32 %v21619_v18, %v3087_v46  ;;  %v3195_v10 = vadd.f32 %v22695_v45, %v3098_v1 }
 0x559   :  { %v3189_v53 = vadd.f32 %v3188_v49, %v3088_v48 }
 0x55c   :  { %v22706_v47 = vpop.f32.mrf.mxu0 }
 0x55d   :  { %v3282_v17 = vadd.f32 %v22706_v47, %v3195_v10 }
 0x55e   :  { %v22717_v50 = vpop.f32.mrf.mxu1  ;;  %v3274_v52 = vpop.f32.mrf.mxu0 }
 0x55f   :  { %v3275_v55 = vadd.f32 %v3274_v52, %v3189_v53  ;;  %v3367_v28 = vadd.f32 %v22717_v50, %v3282_v17 }
 0x560   :  { %v3358_v56 = vpop.f32.mrf.mxu1 }
 0x561   :  { %v3359_v60 = vadd.f32 %v3358_v56, %v3275_v55 }
 0x566   :  { %v22728_v54 = vpop.f32.mrf.mxu0 }
 0x567   :  { %v3456_v30 = vadd.f32 %v22728_v54, %v3367_v28 }
 0x568   :  { %v22739_v57 = vpop.f32.mrf.mxu1  ;;  %v3449_v58 = vpop.f32.mrf.mxu0 }
 0x569   :  { %v3450_v5 = vadd.f32 %v3449_v58, %v3359_v60  ;;  %v3537_v41 = vadd.f32 %v22739_v57, %v3456_v30 }
 0x56a   :  { %v3530_v6 = vpop.f32.mrf.mxu1 }
 0x56b   :  { %v3531_v11 = vadd.f32 %v3530_v6, %v3450_v5  ;;  %v24907_v4 = vmul.f32 0.35355338, %v3537_v41 }
 0x56d   :  { %v24900_v22 = vmul.f32 0.35355338, %v3531_v11  ;;  %v4547_v48 = vsel %vm1534_vm2, %v24907_v4, 0 }
 0x56e   :  { %v24915_v53 = vand.u32 4294901760, %v4547_v48 }
 0x56f   :  { %v4095_v31 = vsel %vm1534_vm2, %v24900_v22, 0 }
 0x570   :  { %v22750_v16 = vpop.f32.mrf.mxu0  ;;  %v24904_v38 = vand.u32 4294901760, %v4095_v31  ;;  %v4619_v60 = vsub.f32 %v4547_v48, %v24915_v53 }
 0x571   :  { %v3643_v26 = vadd.f32 %v22750_v16, %v21620_v20 }
 0x572   :  { %v22761_v23 = vpop.f32.mrf.mxu1  ;;  %v3632_v24 = vpop.f32.mrf.mxu0  ;;  %v4167_v44 = vsub.f32 %v4095_v31, %v24904_v38  ;;  %v4620_v11 = vand.u32 4294901760, %v4619_v60 }
 0x573   :  { %v3633_v29 = vadd.f32 %v21620_v20, %v3632_v24  ;;  %v3740_v33 = vadd.f32 %v22761_v23, %v3643_v26 }
 0x574   :  { %v3733_v32 = vpop.f32.mrf.mxu1  ;;  %v4168_v47 = vand.u32 4294901760, %v4167_v44  ;;  %v4621_v20 = vsub.f32 %v4619_v60, %v4620_v11 }
 0x575   :  { %v3734_v39 = vadd.f32 %v3733_v32, %v3633_v29 }
 0x576   :  { %v4169_v55 = vsub.f32 %v4167_v44, %v4168_v47  ;;  %v4622_v24 = vand.u32 4294901760, %v4621_v20 }
 0x578   :  { %v4170_v1 = vand.u32 4294901760, %v4169_v55 }
 0x57a   :  { %v22772_v61 = vpop.f32.mrf.mxu0 }
 0x57b   :  { %v3827_v40 = vadd.f32 %v22772_v61, %v3740_v33 }
 0x57c   :  { %v22783_v36 = vpop.f32.mrf.mxu1  ;;  %v3819_v37 = vpop.f32.mrf.mxu0 }
 0x57d   :  { %v3820_v59 = vadd.f32 %v3819_v37, %v3734_v39  ;;  %v3912_v3 = vadd.f32 %v22783_v36, %v3827_v40 }
 0x57e   :  { %v3903_v62 = vpop.f32.mrf.mxu1 }
 0x57f   :  { %v3904_v14 = vadd.f32 %v3903_v62, %v3820_v59 }
 0x584   :  { %v22794_v8 = vpop.f32.mrf.mxu0 }
 0x585   :  { %v4001_v7 = vadd.f32 %v22794_v8, %v3912_v3  ;;  %v22805_v18 = vpop.f32.mrf.mxu1 }
 0x586   :  { %v3994_v45 = vpop.f32.mrf.mxu0 }
 0x587   :  { %v3995_v46 = vadd.f32 %v3994_v45, %v3904_v14  ;;  %v4075_v49 = vpop.f32.mrf.mxu1  ;;  %v24911_v50 = vadd.f32 %v22805_v18, %v4001_v7 }
 0x589   :  { %v24913_v52 = vadd.f32 %v4075_v49, %v3995_v46  ;;  %v4550_v57 = vsel %vm1534_vm2, %v24911_v50, 0 }
 0x58a   :  { %v4583_v6 = vand.u32 4294901760, %v4550_v57 }
 0x58b   :  { %v4098_v54 = vsel %vm1534_vm2, %v24913_v52, 0 }
 0x58c   :  { %v4131_v56 = vand.u32 4294901760, %v4098_v54  ;;  %v4660_v17 = vsub.f32 %v4550_v57, %v4583_v6 }
 0x58e   :  { %22807 = vmatpush3.xpose.msra.mxu0 %v4131_v56  ;;  %v4208_v58 = vsub.f32 %v4098_v54, %v4131_v56  ;;  %v4661_v23 = vand.u32 4294901760, %v4660_v17 }
 0x58f   :  { %22816 = vmatprep.subr.mxu0 %v24282_v51 }
 0x590   :  { %v4209_v5 = vand.u32 4294901760, %v4208_v58  ;;  %v4662_v26 = vsub.f32 %v4660_v17, %v4661_v23 }
 0x591   :  { %22809 = vmatmul.mubr.f32.vlgmr.msra.gmra.mxu0 %v4170_v1 }
 0x592   :  { %22817 = vmatpush3.xpose.msra.mxu0 %v4208_v58  ;;  %22818 = vmatprep.mubr.msk.f32.mxu0 %vm24283_vm1, %v24282_v51  ;;  %v4210_v10 = vsub.f32 %v4208_v58, %v4209_v5  ;;  %v4663_v28 = vand.u32 4294901760, %v4662_v26 }
 0x593   :  { %22826 = vmatprep.subr.mxu0 %v24282_v51 }
 0x594   :  { %v4211_v16 = vand.u32 4294901760, %v4210_v10 }
 0x595   :  { %22819 = vmatmul.mubr.f32.vlgmr.msra.gmra.mxu0 %v4167_v44 }
 0x596   :  { %22812 = vmatpush3.xpose.msra.mxu1 %v4211_v16  ;;  %22827 = vmatpush3.xpose.msra.mxu0 %v4209_v5 }
 0x597   :  { %22828 = vmatprep.mubr.msk.f32.mxu0 %vm24283_vm1, %v24282_v51  ;;  %22821 = vmatprep.subr.mxu1 %v24282_v51 }
 0x598   :  { %22836 = vmatprep.subr.mxu0 %v24282_v51 }
 0x599   :  { %22814 = vmatmul.mubr.f32.vlgmr.msra.gmra.mxu1 %v24904_v38  ;;  %22829 = vmatmul.mubr.f32.vlgmr.msra.gmra.mxu0 %v24904_v38 }
 0x59a   :  { %22822 = vmatpush3.xpose.msra.mxu1 %v4131_v56  ;;  %22837 = vmatpush3.xpose.msra.mxu0 %v4583_v6 }
 0x59b   :  { %22823 = vmatprep.mubr.msk.f32.mxu1 %vm24283_vm1, %v24282_v51  ;;  %22838 = vmatprep.mubr.msk.f32.mxu0 %vm24283_vm1, %v24282_v51 }
 0x59c   :  { %22831 = vmatprep.subr.mxu1 %v24282_v51  ;;  %22846 = vmatprep.subr.mxu0 %v24282_v51 }
 0x59d   :  { %22824 = vmatmul.mubr.f32.vlgmr.msra.gmra.mxu1 %v4168_v47  ;;  %22839 = vmatmul.mubr.f32.vlgmr.msra.gmra.mxu0 %v4622_v24 }
 0x59e   :  { %22832 = vmatpush3.xpose.msra.mxu1 %v4131_v56  ;;  %22847 = vmatpush3.xpose.msra.mxu0 %v4660_v17 }
 0x59f   :  { %22833 = vmatprep.mubr.msk.f32.mxu1 %vm24283_vm1, %v24282_v51  ;;  %22848 = vmatprep.mubr.msk.f32.mxu0 %vm24283_vm1, %v24282_v51 }
 0x5a0   :  { %22841 = vmatprep.subr.mxu1 %v24282_v51  ;;  %22856 = vmatprep.subr.mxu0 %v24282_v51 }
 0x5a1   :  { %22834 = vmatmul.mubr.f32.vlgmr.msra.gmra.mxu1 %v24904_v38  ;;  %22849 = vmatmul.mubr.f32.vlgmr.msra.gmra.mxu0 %v4619_v60 }
 0x5a2   :  { %22842 = vmatpush3.xpose.msra.mxu1 %v4663_v28  ;;  %22857 = vmatpush3.xpose.msra.mxu0 %v4661_v23 }
 0x5a3   :  { %22843 = vmatprep.mubr.msk.f32.mxu1 %vm24283_vm1, %v24282_v51  ;;  %22858 = vmatprep.mubr.msk.f32.mxu0 %vm24283_vm1, %v24282_v51 }
 0x5a4   :  { %22851 = vmatprep.subr.mxu1 %v24282_v51  ;;  %22866 = vmatprep.subr.mxu0 %v24282_v51 }
 0x5a5   :  { %22844 = vmatmul.mubr.f32.vlgmr.msra.gmra.mxu1 %v24915_v53  ;;  %22859 = vmatmul.mubr.f32.vlgmr.msra.gmra.mxu0 %v24915_v53 }
 0x5a6   :  { %22852 = vmatpush3.xpose.msra.mxu1 %v4583_v6  ;;  %22853 = vmatprep.mubr.msk.f32.mxu1 %vm24283_vm1, %v24282_v51 }
 0x5a7   :  { %22861 = vmatprep.subr.mxu1 %v24282_v51  ;;  %22868 = vmatprep.mubr.msk.f32.mxu0 %vm24283_vm1, %v24282_v51 }
 0x5a9   :  { %22854 = vmatmul.mubr.f32.vlgmr.msra.gmra.mxu1 %v4620_v11 }
 0x5aa   :  { %22862 = vmatpush3.xpose.msra.mxu1 %v4583_v6  ;;  %22863 = vmatprep.mubr.msk.f32.mxu1 %vm24283_vm1, %v24282_v51 }
 0x5ab   :  { %22871 = vmatprep.subr.mxu1 %v24282_v51 }
 0x5ad   :  { %22864 = vmatmul.mubr.f32.vlgmr.msra.gmra.mxu1 %v24915_v53 }
 0x5ae   :  { %22873 = vmatprep.mubr.msk.f32.mxu1 %vm24283_vm1, %v24282_v51 }
 0x651   :  { %v4172_v61 = vpop.f32.mrf.mxu0 }
 0x653   :  { %v22810_v29 = vpop.f32.mrf.mxu0 }
 0x655   :  { %v4322_v30 = vpop.f32.mrf.mxu0 }
 0x657   :  { %v22820_v31 = vpop.f32.mrf.mxu0 }
 0x659   :  { %v4248_v32 = vpop.f32.mrf.mxu1  ;;  %v4470_v33 = vpop.f32.mrf.mxu0 }
 0x65a   :  { %v4249_v36 = vadd.f32 %v4248_v32, %v4172_v61 }
 0x65b   :  { %v22815_v37 = vpop.f32.mrf.mxu1  ;;  %v22830_v38 = vpop.f32.mrf.mxu0 }
 0x65c   :  { %v4323_v39 = vadd.f32 %v4322_v30, %v4249_v36 }
 0x65d   :  { %v4396_v40 = vpop.f32.mrf.mxu1  ;;  %v4624_v41 = vpop.f32.mrf.mxu0 }
 0x65e   :  { %v4397_v59 = vadd.f32 %v4396_v40, %v4323_v39 }
 0x65f   :  { %v22825_v62 = vpop.f32.mrf.mxu1  ;;  %v22840_v44 = vpop.f32.mrf.mxu0 }
 0x660   :  { %v4471_v3 = vadd.f32 %v4470_v33, %v4397_v59 }
 0x661   :  { %v4542_v8 = vpop.f32.mrf.mxu1  ;;  %v4774_v14 = vpop.f32.mrf.mxu0 }
 0x662   :  { %v4543_v7 = vadd.f32 %v4542_v8, %v4471_v3 }
 0x663   :  { %v22835_v18 = vpop.f32.mrf.mxu1  ;;  %v22850_v45 = vpop.f32.mrf.mxu0 }
 0x664   :  { %v4998_v46 = vsel %vm1534_vm2, %v4543_v7, -inf }
 0x665   :  { %v4700_v47 = vpop.f32.mrf.mxu1  ;;  %4999 = vmax.xlane.f32.xlu1 %v4998_v46  ;;  %v4922_v48 = vpop.f32.mrf.mxu0 }
 0x666   :  { %v4701_v49 = vadd.f32 %v4700_v47, %v4624_v41 }
 0x667   :  { %v22845_v53 = vpop.f32.mrf.mxu1  ;;  %v22860_v54 = vpop.f32.mrf.mxu0 }
 0x668   :  { %v4775_v55 = vadd.f32 %v4774_v14, %v4701_v49 }
 0x669   :  { %v4848_v56 = vpop.f32.mrf.mxu1 }
 0x66a   :  { %v4849_v57 = vadd.f32 %v4848_v56, %v4775_v55 }
 0x66b   :  { %v22855_v58 = vpop.f32.mrf.mxu1 }
 0x66c   :  { %v4923_v60 = vadd.f32 %v4922_v48, %v4849_v57 }
 0x66d   :  { %v4994_v1 = vpop.f32.mrf.mxu1 }
 0x66e   :  { %v4995_v5 = vadd.f32 %v4994_v1, %v4923_v60 }
 0x66f   :  { %v22865_v6 = vpop.f32.mrf.mxu1 }
 0x670   :  { %v5001_v10 = vsel %vm1534_vm2, %v4995_v5, -inf }
 0x671   :  { %5002 = vmax.xlane.f32.xlu0 %v5001_v10 }
 0x676   :  { %5472 = vrot.lane.b32.xlu1 %v24911_v50, %s24284_s3 }
 0x6ee   :  { %v5000_v11 = vpop.xlane.xlu1 %4999 }
 0x6ef   :  { %v5004_v16 = vsub.f32 %v4543_v7, %v5000_v11 }
 0x6f1   :  { %v5006_v17 = vmul.f32 1.442695, %v5004_v16 }
 0x6f2   :  { %v5473_v37 = vpop.permute.xlu1 %5472 }
 0x6f3   :  { %24169 = vpow2.f32 %v5006_v17  ;;  %v24981_v59 = vand.u32 4294901760, %v5473_v37 }
 0x6f5   :  { %v24985_v7 = vsub.f32 %v5473_v37, %v24981_v59 }
 0x6f7   :  { %v5587_v49 = vand.u32 4294901760, %v24985_v7 }
 0x6f9   :  { %v5588_v58 = vsub.f32 %v24985_v7, %v5587_v49 }
 0x6fa   :  { %v5003_v20 = vpop.xlane.xlu0 %5002 }
 0x6fb   :  { %v5005_v23 = vsub.f32 %v4995_v5, %v5003_v20  ;;  %v5589_v11 = vand.u32 4294901760, %v5588_v58 }
 0x6fd   :  { %v5008_v24 = vmul.f32 1.442695, %v5005_v23 }
 0x6ff   :  { %24171 = vpow2.f32 %v5008_v24 }
 0x700   :  { %v24170_v26 = vpop.eup %24169 }
 0x701   :  { %v5010_v28 = vsel %vm1534_vm2, %v24170_v26, 0.0 }
 0x702   :  { %5011 = vadd.xlane.f32.xlu0 %v5010_v28 }
 0x70c   :  { %v24172_v61 = vpop.eup %24171 }
 0x70d   :  { %v5013_v29 = vsel %vm1534_vm2, %v24172_v61, 0.0 }
 0x70e   :  { %5014 = vadd.xlane.f32.xlu0 %v5013_v29 }
 0x724   :  { %5020 = vrot.lane.b32.xlu0 %v24913_v52, %s24284_s3 }
 0x728   :  { %5926 = vrot.lane.b32.xlu0 %v24913_v52, %s24286_s24 }
 0x72c   :  { %5924 = vrot.lane.b32.xlu0 %v24900_v22, %s24286_s24 }
 0x730   :  { %6380 = vrot.lane.b32.xlu0 %v24911_v50, %s24286_s24 }
 0x734   :  { %6378 = vrot.lane.b32.xlu0 %v24907_v4, %s24286_s24 }
 0x78b   :  { %v5012_v30 = vpop.xlane.xlu0 %5011 }
 0x78c   :  { %24173 = vrcp.f32 %v5012_v30 }
 0x797   :  { %v5015_v31 = vpop.xlane.xlu0 %5014 }
 0x798   :  { %24175 = vrcp.f32 %v5015_v31 }
 0x799   :  { %v24174_v32 = vpop.eup %24173 }
 0x79a   :  { %v5017_v33 = vmul.f32 %v24174_v32, %v24170_v26 }
 0x79b   :  { %v5021_v36 = vpop.permute.xlu0 %5020 }
 0x79c   :  { %v5057_v38 = vand.u32 4294901760, %v5021_v36  ;;  %v5024_v39 = vsel %vm1534_vm2, %v5017_v33, 0 }
 0x79d   :  { %v5092_v40 = vand.u32 4294901760, %v5024_v39 }
 0x79e   :  { %v5134_v41 = vsub.f32 %v5021_v36, %v5057_v38  ;;  %22867 = vmatpush3.msra.mxu0 %v5057_v38 }
 0x79f   :  { %22876 = vmatprep.subr.mxu0 %v24282_v51  ;;  %v5093_v62 = vsub.f32 %v5024_v39, %v5092_v40  ;;  %v5927_v3 = vpop.permute.xlu0 %5926 }
 0x7a0   :  { %v5135_v44 = vand.u32 4294901760, %v5134_v41  ;;  %v5930_v54 = vsel %vm1534_vm2, %v5927_v3, 0 }
 0x7a1   :  { %v5094_v8 = vand.u32 4294901760, %v5093_v62  ;;  %v24998_v60 = vand.u32 4294901760, %v5930_v54 }
 0x7a2   :  { %v5136_v14 = vsub.f32 %v5134_v41, %v5135_v44 }
 0x7a3   :  { %v5095_v18 = vsub.f32 %v5093_v62, %v5094_v8  ;;  %v5925_v53 = vpop.permute.xlu0 %5924  ;;  %v25009_v16 = vsub.f32 %v5930_v54, %v24998_v60 }
 0x7a4   :  { %v5137_v45 = vand.u32 4294901760, %v5136_v14  ;;  %v5928_v57 = vsel %vm1534_vm2, %v5925_v53, 0 }
 0x7a5   :  { %v24176_v46 = vpop.eup %24175  ;;  %v5096_v47 = vand.u32 4294901760, %v5095_v18  ;;  %v25001_v5 = vand.u32 4294901760, %v5928_v57  ;;  %v6041_v24 = vand.u32 4294901760, %v25009_v16 }
 0x7a6   :  { %v5019_v48 = vmul.f32 %v24176_v46, %v24172_v61  ;;  %22872 = vmatpush3.msra.mxu1 %v5137_v45 }
 0x7a7   :  { %22869 = vmatmul.mubr.f32.vlgmr.msra.gmra.mxu0 %v5096_v47  ;;  %22874 = vmatmul.mubr.f32.vlgmr.msra.gmra.mxu1 %v5092_v40  ;;  %v6381_v6 = vpop.permute.xlu0 %6380  ;;  %v5999_v20 = vsub.f32 %v5928_v57, %v25001_v5  ;;  %v6042_v30 = vsub.f32 %v25009_v16, %v6041_v24 }
 0x7a8   :  { %22877 = vmatpush3.msra.mxu0 %v5134_v41  ;;  %22881 = vmatprep.subr.mxu1 %v24282_v51  ;;  %v5476_v55 = vsel %vm1534_vm2, %v5019_v48, 0  ;;  %v6384_v28 = vsel %vm1534_vm2, %v6381_v6, 0 }
 0x7a9   :  { %22882 = vmatpush3.msra.mxu1 %v5057_v38  ;;  %22878 = vmatprep.mubr.msk.f32.mxu0 %vm24283_vm1, %v24282_v51  ;;  %v5544_v56 = vand.u32 4294901760, %v5476_v55  ;;  %v6000_v61 = vand.u32 4294901760, %v5999_v20  ;;  %v25031_v31 = vand.u32 4294901760, %v6384_v28  ;;  %v6043_v36 = vand.u32 4294901760, %v6042_v30 }
 0x7aa   :  { %22883 = vmatprep.mubr.msk.f32.mxu1 %vm24283_vm1, %v24282_v51  ;;  %22886 = vmatprep.subr.mxu0 %v24282_v51 }
 0x7ab   :  { %22891 = vmatprep.subr.mxu1 %v24282_v51  ;;  %22879 = vmatmul.mubr.f32.vlgmr.msra.gmra.mxu0 %v5093_v62  ;;  %v5545_v1 = vsub.f32 %v5476_v55, %v5544_v56  ;;  %v6379_v26 = vpop.permute.xlu0 %6378  ;;  %v6001_v32 = vsub.f32 %v5999_v20, %v6000_v61  ;;  %v6494_v37 = vsub.f32 %v6384_v28, %v25031_v31 }
 0x7ac   :  { %22884 = vmatmul.mubr.f32.vlgmr.msra.gmra.mxu1 %v5094_v8  ;;  %22887 = vmatpush3.msra.mxu0 %v5135_v44  ;;  %v6382_v29 = vsel %vm1534_vm2, %v6379_v26, 0 }
 0x7ad   :  { %22892 = vmatpush3.msra.mxu1 %v5057_v38  ;;  %22888 = vmatprep.mubr.msk.f32.mxu0 %vm24283_vm1, %v24282_v51  ;;  %v5546_v10 = vand.u32 4294901760, %v5545_v1  ;;  %v25034_v33 = vand.u32 4294901760, %v6382_v29  ;;  %v6002_v38 = vand.u32 4294901760, %v6001_v32 }
 0x7ae   :  { %22893 = vmatprep.mubr.msk.f32.mxu1 %vm24283_vm1, %v24282_v51  ;;  %22896 = vmatprep.subr.mxu0 %v24282_v51 }
 0x7af   :  { %22901 = vmatprep.subr.mxu1 %v24282_v51  ;;  %22889 = vmatmul.mubr.f32.vlgmr.msra.gmra.mxu0 %v5092_v40  ;;  %v5547_v17 = vsub.f32 %v5545_v1, %v5546_v10  ;;  %v6453_v39 = vsub.f32 %v6382_v29, %v25034_v33 }
 0x7b0   :  { %22894 = vmatmul.mubr.f32.vlgmr.msra.gmra.mxu1 %v5092_v40  ;;  %22897 = vmatpush3.msra.mxu0 %v24981_v59  ;;  %v6495_v40 = vand.u32 4294901760, %v6494_v37 }
 0x7b1   :  { %22902 = vmatpush3.msra.mxu1 %v5589_v11  ;;  %22898 = vmatprep.mubr.msk.f32.mxu0 %vm24283_vm1, %v24282_v51  ;;  %v5548_v23 = vand.u32 4294901760, %v5547_v17  ;;  %v6454_v41 = vand.u32 4294901760, %v6453_v39 }
 0x7b2   :  { %22903 = vmatprep.mubr.msk.f32.mxu1 %vm24283_vm1, %v24282_v51  ;;  %22906 = vmatprep.subr.mxu0 %v24282_v51 }
 0x7b3   :  { %22911 = vmatprep.subr.mxu1 %v24282_v51  ;;  %22899 = vmatmul.mubr.f32.vlgmr.msra.gmra.mxu0 %v5548_v23  ;;  %v6455_v62 = vsub.f32 %v6453_v39, %v6454_v41 }
 0x7b4   :  { %22904 = vmatmul.mubr.f32.vlgmr.msra.gmra.mxu1 %v5544_v56  ;;  %22907 = vmatpush3.msra.mxu0 %v24985_v7 }
 0x7b5   :  { %22912 = vmatpush3.msra.mxu1 %v24981_v59  ;;  %22908 = vmatprep.mubr.msk.f32.mxu0 %vm24283_vm1, %v24282_v51  ;;  %v6456_v3 = vand.u32 4294901760, %v6455_v62 }
 0x7b6   :  { %22913 = vmatprep.mubr.msk.f32.mxu1 %vm24283_vm1, %v24282_v51  ;;  %22916 = vmatprep.subr.mxu0 %v24282_v51 }
 0x7b7   :  { %22921 = vmatprep.subr.mxu1 %v24282_v51  ;;  %22909 = vmatmul.mubr.f32.vlgmr.msra.gmra.mxu0 %v5545_v1 }
 0x7b8   :  { %22914 = vmatmul.mubr.f32.vlgmr.msra.gmra.mxu1 %v5546_v10  ;;  %22917 = vmatpush3.msra.mxu0 %v5587_v49 }
 0x7b9   :  { %22922 = vmatpush3.msra.mxu1 %v24981_v59  ;;  %22918 = vmatprep.mubr.msk.f32.mxu0 %vm24283_vm1, %v24282_v51  ;;  %v6496_v59 = vsub.f32 %v6494_v37, %v6495_v40 }
 0x7ba   :  { %22923 = vmatprep.mubr.msk.f32.mxu1 %vm24283_vm1, %v24282_v51  ;;  %22926 = vmatprep.subr.mxu0 %v24282_v51 }
 0x7bb   :  { %22931 = vmatprep.subr.mxu1 %v24282_v51  ;;  %22919 = vmatmul.mubr.f32.vlgmr.msra.gmra.mxu0 %v5544_v56  ;;  %v6497_v44 = vand.u32 4294901760, %v6496_v59 }
 0x7bc   :  { %22924 = vmatmul.mubr.f32.vlgmr.msra.gmra.mxu1 %v5544_v56  ;;  %22927 = vmatpush3.xpose.msra.mxu0 %v24998_v60 }
 0x7bd   :  { %22932 = vmatpush3.xpose.msra.mxu1 %v6043_v36  ;;  %22928 = vmatprep.mubr.msk.f32.mxu0 %vm24283_vm1, %v24282_v51 }
 0x7be   :  { %22933 = vmatprep.mubr.msk.f32.mxu1 %vm24283_vm1, %v24282_v51  ;;  %22936 = vmatprep.subr.mxu0 %v24282_v51 }
 0x7bf   :  { %22941 = vmatprep.subr.mxu1 %v24282_v51  ;;  %22929 = vmatmul.mubr.f32.vlgmr.msra.gmra.mxu0 %v6002_v38 }
 0x7c0   :  { %22934 = vmatmul.mubr.f32.vlgmr.msra.gmra.mxu1 %v25001_v5  ;;  %22937 = vmatpush3.xpose.msra.mxu0 %v25009_v16 }
 0x7c1   :  { %22942 = vmatpush3.xpose.msra.mxu1 %v24998_v60  ;;  %22938 = vmatprep.mubr.msk.f32.mxu0 %vm24283_vm1, %v24282_v51 }
 0x7c2   :  { %22943 = vmatprep.mubr.msk.f32.mxu1 %vm24283_vm1, %v24282_v51  ;;  %22946 = vmatprep.subr.mxu0 %v24282_v51 }
 0x7c3   :  { %22951 = vmatprep.subr.mxu1 %v24282_v51  ;;  %22939 = vmatmul.mubr.f32.vlgmr.msra.gmra.mxu0 %v5999_v20 }
 0x7c4   :  { %22944 = vmatmul.mubr.f32.vlgmr.msra.gmra.mxu1 %v6000_v61  ;;  %22947 = vmatpush3.xpose.msra.mxu0 %v6041_v24 }
 0x7c5   :  { %22952 = vmatpush3.xpose.msra.mxu1 %v24998_v60  ;;  %22948 = vmatprep.mubr.msk.f32.mxu0 %vm24283_vm1, %v24282_v51 }
 0x7c6   :  { %22953 = vmatprep.mubr.msk.f32.mxu1 %vm24283_vm1, %v24282_v51  ;;  %22956 = vmatprep.subr.mxu0 %v24282_v51 }
 0x7c7   :  { %22961 = vmatprep.subr.mxu1 %v24282_v51  ;;  %22949 = vmatmul.mubr.f32.vlgmr.msra.gmra.mxu0 %v25001_v5 }
 0x7c8   :  { %22954 = vmatmul.mubr.f32.vlgmr.msra.gmra.mxu1 %v25001_v5  ;;  %22957 = vmatpush3.xpose.msra.mxu0 %v25031_v31 }
 0x7c9   :  { %22962 = vmatpush3.xpose.msra.mxu1 %v6497_v44  ;;  %22958 = vmatprep.mubr.msk.f32.mxu0 %vm24283_vm1, %v24282_v51 }
 0x7ca   :  { %22963 = vmatprep.mubr.msk.f32.mxu1 %vm24283_vm1, %v24282_v51  ;;  %22966 = vmatprep.subr.mxu0 %v24282_v51 }
 0x7cb   :  { %22971 = vmatprep.subr.mxu1 %v24282_v51  ;;  %22959 = vmatmul.mubr.f32.vlgmr.msra.gmra.mxu0 %v6456_v3 }
 0x7cc   :  { %22964 = vmatmul.mubr.f32.vlgmr.msra.gmra.mxu1 %v25034_v33  ;;  %22967 = vmatpush3.xpose.msra.mxu0 %v6494_v37 }
 0x7cd   :  { %22972 = vmatpush3.xpose.msra.mxu1 %v25031_v31  ;;  %22968 = vmatprep.mubr.msk.f32.mxu0 %vm24283_vm1, %v24282_v51 }
 0x7ce   :  { %22973 = vmatprep.mubr.msk.f32.mxu1 %vm24283_vm1, %v24282_v51  ;;  %22976 = vmatprep.subr.mxu0 %v24282_v51 }
 0x7cf   :  { %22981 = vmatprep.subr.mxu1 %v24282_v51  ;;  %22969 = vmatmul.mubr.f32.vlgmr.msra.gmra.mxu0 %v6453_v39 }
 0x7d0   :  { %22974 = vmatmul.mubr.f32.vlgmr.msra.gmra.mxu1 %v6454_v41  ;;  %22977 = vmatpush3.xpose.msra.mxu0 %v6495_v40 }
 0x7d1   :  { %22982 = vmatpush3.xpose.msra.mxu1 %v25031_v31  ;;  %22978 = vmatprep.mubr.msk.f32.mxu0 %vm24283_vm1, %v24282_v51 }
 0x7d2   :  { %22983 = vmatprep.mubr.msk.f32.mxu1 %vm24283_vm1, %v24282_v51  ;;  %22986 = vmatprep.subr.mxu0 %v24282_v51 }
 0x7d3   :  { %22979 = vmatmul.mubr.f32.vlgmr.msra.gmra.mxu0 %v25034_v33  ;;  %22991 = vmatprep.subr.mxu1 %v24282_v51 }
 0x7d4   :  { %22984 = vmatmul.mubr.f32.vlgmr.msra.gmra.mxu1 %v25034_v33  ;;  %22988 = vmatprep.mubr.msk.f32.mxu0 %vm24283_vm1, %v24282_v51 }
 0x7d5   :  { %22993 = vmatprep.mubr.msk.f32.mxu1 %vm24283_vm1, %v24282_v51 }
 0x867   :  { %v5098_v8 = vpop.f32.mrf.mxu0  ;;  %v5174_v14 = vpop.f32.mrf.mxu1 }
 0x868   :  { %v5175_v7 = vadd.f32 %v5174_v14, %v5098_v8 }
 0x869   :  { %v22870_v18 = vpop.f32.mrf.mxu0  ;;  %v22875_v45 = vpop.f32.mrf.mxu1 }
 0x86b   :  { %v5248_v46 = vpop.f32.mrf.mxu0 }
 0x86c   :  { %v5249_v47 = vadd.f32 %v5248_v46, %v5175_v7  ;;  %v5322_v48 = vpop.f32.mrf.mxu1 }
 0x86d   :  { %v22880_v49 = vpop.f32.mrf.mxu0 }
 0x86e   :  { %v5323_v53 = vadd.f32 %v5322_v48, %v5249_v47  ;;  %v22885_v54 = vpop.f32.mrf.mxu1 }
 0x86f   :  { %v5396_v55 = vpop.f32.mrf.mxu0 }
 0x870   :  { %v5397_v56 = vadd.f32 %v5396_v55, %v5323_v53  ;;  %v5468_v57 = vpop.f32.mrf.mxu1 }
 0x871   :  { %v22890_v58 = vpop.f32.mrf.mxu0 }
 0x872   :  { %v25098_v60 = vadd.f32 %v5468_v57, %v5397_v56  ;;  %v22895_v1 = vpop.f32.mrf.mxu1 }
 0x873   :  { %v5550_v5 = vpop.f32.mrf.mxu0 }
 0x874   :  { %v5626_v6 = vpop.f32.mrf.mxu1 }
 0x875   :  { %v5627_v10 = vadd.f32 %v5626_v6, %v5550_v5  ;;  %v22900_v11 = vpop.f32.mrf.mxu0 }
 0x876   :  { %v22905_v16 = vpop.f32.mrf.mxu1 }
 0x877   :  { %v5700_v17 = vpop.f32.mrf.mxu0 }
 0x878   :  { %v5701_v20 = vadd.f32 %v5700_v17, %v5627_v10  ;;  %v5774_v23 = vpop.f32.mrf.mxu1 }
 0x879   :  { %v22910_v24 = vpop.f32.mrf.mxu0 }
 0x87a   :  { %v5775_v26 = vadd.f32 %v5774_v23, %v5701_v20  ;;  %v22915_v28 = vpop.f32.mrf.mxu1 }
 0x87b   :  { %v5848_v61 = vpop.f32.mrf.mxu0 }
 0x87c   :  { %v5849_v29 = vadd.f32 %v5848_v61, %v5775_v26  ;;  %v5920_v30 = vpop.f32.mrf.mxu1 }
 0x87d   :  { %v22920_v31 = vpop.f32.mrf.mxu0 }
 0x87e   :  { %v25100_v32 = vadd.f32 %v5920_v30, %v5849_v29  ;;  %v22925_v33 = vpop.f32.mrf.mxu1 }
 0x87f   :  { %v6004_v36 = vpop.f32.mrf.mxu0 }
 0x880   :  { %v6080_v37 = vpop.f32.mrf.mxu1 }
 0x881   :  { %v22930_v38 = vpop.f32.mrf.mxu0  ;;  %v6081_v39 = vadd.f32 %v6080_v37, %v6004_v36 }
 0x882   :  { %v22935_v40 = vpop.f32.mrf.mxu1 }
 0x883   :  { %v6154_v41 = vpop.f32.mrf.mxu0 }
 0x884   :  { %v6155_v59 = vadd.f32 %v6154_v41, %v6081_v39  ;;  %v6228_v62 = vpop.f32.mrf.mxu1 }
 0x885   :  { %v22940_v44 = vpop.f32.mrf.mxu0 }
 0x886   :  { %v6229_v3 = vadd.f32 %v6228_v62, %v6155_v59  ;;  %v22945_v8 = vpop.f32.mrf.mxu1 }
 0x887   :  { %v6302_v14 = vpop.f32.mrf.mxu0 }
 0x888   :  { %v6303_v7 = vadd.f32 %v6302_v14, %v6229_v3  ;;  %v6374_v18 = vpop.f32.mrf.mxu1 }
 0x889   :  { %v22950_v45 = vpop.f32.mrf.mxu0 }
 0x88a   :  { %v6375_v46 = vadd.f32 %v6374_v18, %v6303_v7  ;;  %v22955_v47 = vpop.f32.mrf.mxu1 }
 0x88b   :  { %v6458_v48 = vpop.f32.mrf.mxu0 }
 0x88c   :  { %v6534_v49 = vpop.f32.mrf.mxu1  ;;  %v6832_v53 = vsel %vm1534_vm2, %v6375_v46, -inf }
 0x88d   :  { %6833 = vmax.xlane.f32.xlu1 %v6832_v53  ;;  %v22960_v54 = vpop.f32.mrf.mxu0  ;;  %v6535_v55 = vadd.f32 %v6534_v49, %v6458_v48 }
 0x88e   :  { %v22965_v56 = vpop.f32.mrf.mxu1 }
 0x88f   :  { %v6608_v57 = vpop.f32.mrf.mxu0 }
 0x890   :  { %v6609_v58 = vadd.f32 %v6608_v57, %v6535_v55  ;;  %v6682_v1 = vpop.f32.mrf.mxu1 }
 0x891   :  { %v22970_v5 = vpop.f32.mrf.mxu0 }
 0x892   :  { %v6683_v6 = vadd.f32 %v6682_v1, %v6609_v58  ;;  %v22975_v10 = vpop.f32.mrf.mxu1 }
 0x893   :  { %v6756_v11 = vpop.f32.mrf.mxu0 }
 0x894   :  { %v6757_v16 = vadd.f32 %v6756_v11, %v6683_v6  ;;  %v6828_v17 = vpop.f32.mrf.mxu1 }
 0x895   :  { %v22980_v20 = vpop.f32.mrf.mxu0 }
 0x896   :  { %v6829_v23 = vadd.f32 %v6828_v17, %v6757_v16  ;;  %v22985_v24 = vpop.f32.mrf.mxu1 }
 0x898   :  { %v6835_v26 = vsel %vm1534_vm2, %v6829_v23, -inf }
 0x899   :  { %6836 = vmax.xlane.f32.xlu0 %v6835_v26 }
 0x916   :  { %v6834_v28 = vpop.xlane.xlu1 %6833 }
 0x917   :  { %v6838_v61 = vsub.f32 %v6375_v46, %v6834_v28 }
 0x919   :  { %v6840_v29 = vmul.f32 1.442695, %v6838_v61 }
 0x91b   :  { %24177 = vpow2.f32 %v6840_v29 }
 0x922   :  { %v6837_v30 = vpop.xlane.xlu0 %6836 }
 0x923   :  { %v6839_v31 = vsub.f32 %v6829_v23, %v6837_v30 }
 0x925   :  { %v6842_v33 = vmul.f32 1.442695, %v6839_v31 }
 0x927   :  { %24179 = vpow2.f32 %v6842_v33 }
 0x928   :  { %v24178_v36 = vpop.eup %24177 }
 0x929   :  { %v6844_v37 = vsel %vm1534_vm2, %v24178_v36, 0.0 }
 0x92a   :  { %6845 = vadd.xlane.f32.xlu0 %v6844_v37 }
 0x934   :  { %v24180_v38 = vpop.eup %24179 }
 0x935   :  { %v6847_v39 = vsel %vm1534_vm2, %v24180_v38, 0.0 }
 0x936   :  { %6848 = vadd.xlane.f32.xlu1 %v6847_v39 }
 0x940   :  { %6854 = vrot.lane.b32.xlu0 %v24913_v52, %s24287_s26 }
 0x944   :  { %7758 = vrot.lane.b32.xlu0 %v24900_v22, %s24288_s27 }
 0x947   :  { %7306 = vrot.lane.b32.xlu1 %v24911_v50, %s24287_s26 }
 0x948   :  { %8212 = vrot.lane.b32.xlu0 %v24907_v4, %s24288_s27 }
 0x94b   :  { %7760 = vrot.lane.b32.xlu1 %v24913_v52, %s24288_s27 }
 0x94f   :  { %8214 = vrot.lane.b32.xlu1 %v24911_v50, %s24288_s27 }
 0x9b3   :  { %v6846_v40 = vpop.xlane.xlu0 %6845 }
 0x9b4   :  { %24181 = vrcp.f32 %v6846_v40 }
 0x9b7   :  { %v6855_v41 = vpop.permute.xlu0 %6854 }
 0x9b8   :  { %v6891_v59 = vand.u32 4294901760, %v6855_v41 }
 0x9ba   :  { %v6968_v62 = vsub.f32 %v6855_v41, %v6891_v59  ;;  %22987 = vmatpush3.msra.mxu0 %v6891_v59 }
 0x9bb   :  { %22996 = vmatprep.subr.mxu0 %v24282_v51  ;;  %v7759_v20 = vpop.permute.xlu0 %7758 }
 0x9bc   :  { %v6969_v44 = vand.u32 4294901760, %v6968_v62  ;;  %v7762_v28 = vsel %vm1534_vm2, %v7759_v20, 0 }
 0x9bd   :  { %v25149_v31 = vand.u32 4294901760, %v7762_v28 }
 0x9be   :  { %v6970_v3 = vsub.f32 %v6968_v62, %v6969_v44 }
 0x9bf   :  { %v6849_v8 = vpop.xlane.xlu1 %6848  ;;  %v7833_v39 = vsub.f32 %v7762_v28, %v25149_v31 }
 0x9c0   :  { %v6971_v14 = vand.u32 4294901760, %v6970_v3  ;;  %24183 = vrcp.f32 %v6849_v8 }
 0x9c1   :  { %v24182_v7 = vpop.eup %24181 }
 0x9c2   :  { %22992 = vmatpush3.msra.mxu1 %v6971_v14  ;;  %v6851_v18 = vmul.f32 %v24182_v7, %v24178_v36 }
 0x9c3   :  { %v7307_v45 = vpop.permute.xlu1 %7306  ;;  %23001 = vmatprep.subr.mxu1 %v24282_v51 }
 0x9c4   :  { %v7343_v46 = vand.u32 4294901760, %v7307_v45  ;;  %v6858_v47 = vsel %vm1534_vm2, %v6851_v18, 0 }
 0x9c5   :  { %v6926_v48 = vand.u32 4294901760, %v6858_v47 }
 0x9c6   :  { %v25121_v49 = vsub.f32 %v7307_v45, %v7343_v46 }
 0x9c7   :  { %v7761_v53 = vpop.permute.xlu1 %7760  ;;  %v6927_v54 = vsub.f32 %v6858_v47, %v6926_v48  ;;  %22994 = vmatmul.mubr.f32.vlgmr.msra.gmra.mxu1 %v6926_v48 }
 0x9c8   :  { %v7421_v55 = vand.u32 4294901760, %v25121_v49  ;;  %v7764_v56 = vsel %vm1534_vm2, %v7761_v53, 0  ;;  %23002 = vmatpush3.msra.mxu1 %v6891_v59  ;;  %23003 = vmatprep.mubr.msk.f32.mxu1 %vm24283_vm1, %v24282_v51 }
 0x9c9   :  { %23011 = vmatprep.subr.mxu1 %v24282_v51  ;;  %v6928_v57 = vand.u32 4294901760, %v6927_v54  ;;  %v25131_v1 = vand.u32 4294901760, %v7764_v56 }
 0x9ca   :  { %v7422_v58 = vsub.f32 %v25121_v49, %v7421_v55 }
 0x9cb   :  { %23004 = vmatmul.mubr.f32.vlgmr.msra.gmra.mxu1 %v6928_v57  ;;  %v6929_v5 = vsub.f32 %v6927_v54, %v6928_v57  ;;  %v25137_v16 = vsub.f32 %v7764_v56, %v25131_v1  ;;  %v8215_v23 = vpop.permute.xlu1 %8214 }
 0x9cc   :  { %v7423_v6 = vand.u32 4294901760, %v7422_v58  ;;  %23012 = vmatpush3.msra.mxu1 %v6891_v59  ;;  %23013 = vmatprep.mubr.msk.f32.mxu1 %vm24283_vm1, %v24282_v51  ;;  %v8218_v29 = vsel %vm1534_vm2, %v8215_v23, 0 }
 0x9cd   :  { %v24184_v10 = vpop.eup %24183  ;;  %23021 = vmatprep.subr.mxu1 %v24282_v51  ;;  %v6930_v11 = vand.u32 4294901760, %v6929_v5  ;;  %v7875_v61 = vand.u32 4294901760, %v25137_v16  ;;  %v25157_v37 = vand.u32 4294901760, %v8218_v29 }
 0x9ce   :  { %v6853_v17 = vmul.f32 %v24184_v10, %v24180_v38 }
 0x9cf   :  { %22989 = vmatmul.mubr.f32.vlgmr.msra.gmra.mxu0 %v6930_v11  ;;  %23014 = vmatmul.mubr.f32.vlgmr.msra.gmra.mxu1 %v6926_v48  ;;  %v7876_v36 = vsub.f32 %v25137_v16, %v7875_v61  ;;  %v25167_v59 = vsub.f32 %v8218_v29, %v25157_v37 }
 0x9d0   :  { %22997 = vmatpush3.msra.mxu0 %v6968_v62  ;;  %23022 = vmatpush3.msra.mxu1 %v7423_v6  ;;  %v7310_v24 = vsel %vm1534_vm2, %v6853_v17, 0  ;;  %v8213_v62 = vpop.permute.xlu0 %8212 }
 0x9d1   :  { %22998 = vmatprep.mubr.msk.f32.mxu0 %vm24283_vm1, %v24282_v51  ;;  %23006 = vmatprep.subr.mxu0 %v24282_v51  ;;  %v7378_v26 = vand.u32 4294901760, %v7310_v24  ;;  %v7877_v41 = vand.u32 4294901760, %v7876_v36  ;;  %v8216_v3 = vsel %vm1534_vm2, %v8213_v62, 0  ;;  %v8329_v8 = vand.u32 4294901760, %v25167_v59 }
 0x9d2   :  { %23023 = vmatprep.mubr.msk.f32.mxu1 %vm24283_vm1, %v24282_v51  ;;  %23031 = vmatprep.subr.mxu1 %v24282_v51  ;;  %v8286_v7 = vand.u32 4294901760, %v8216_v3 }
 0x9d3   :  { %22999 = vmatmul.mubr.f32.vlgmr.msra.gmra.mxu0 %v6927_v54  ;;  %v7379_v30 = vsub.f32 %v7310_v24, %v7378_v26  ;;  %23024 = vmatmul.mubr.f32.vlgmr.msra.gmra.mxu1 %v7378_v26  ;;  %v8330_v18 = vsub.f32 %v25167_v59, %v8329_v8 }
 0x9d4   :  { %23007 = vmatpush3.msra.mxu0 %v6969_v44  ;;  %23032 = vmatpush3.msra.mxu1 %v7343_v46  ;;  %v7834_v44 = vand.u32 4294901760, %v7833_v39 }
 0x9d5   :  { %23008 = vmatprep.mubr.msk.f32.mxu0 %vm24283_vm1, %v24282_v51  ;;  %23016 = vmatprep.subr.mxu0 %v24282_v51  ;;  %v7380_v33 = vand.u32 4294901760, %v7379_v30  ;;  %v8331_v47 = vand.u32 4294901760, %v8330_v18 }
 0x9d6   :  { %23033 = vmatprep.mubr.msk.f32.mxu1 %vm24283_vm1, %v24282_v51  ;;  %23041 = vmatprep.subr.mxu1 %v24282_v51  ;;  %v7835_v14 = vsub.f32 %v7833_v39, %v7834_v44 }
 0x9d7   :  { %23009 = vmatmul.mubr.f32.vlgmr.msra.gmra.mxu0 %v6926_v48  ;;  %23034 = vmatmul.mubr.f32.vlgmr.msra.gmra.mxu1 %v7380_v33  ;;  %v7381_v38 = vsub.f32 %v7379_v30, %v7380_v33 }
 0x9d8   :  { %23017 = vmatpush3.msra.mxu0 %v7343_v46  ;;  %23042 = vmatpush3.msra.mxu1 %v7343_v46  ;;  %v7836_v45 = vand.u32 4294901760, %v7835_v14  ;;  %v8287_v46 = vsub.f32 %v8216_v3, %v8286_v7 }
 0x9d9   :  { %23018 = vmatprep.mubr.msk.f32.mxu0 %vm24283_vm1, %v24282_v51  ;;  %23026 = vmatprep.subr.mxu0 %v24282_v51  ;;  %v7382_v40 = vand.u32 4294901760, %v7381_v38 }
 0x9da   :  { %23043 = vmatprep.mubr.msk.f32.mxu1 %vm24283_vm1, %v24282_v51  ;;  %23051 = vmatprep.subr.mxu1 %v24282_v51  ;;  %v8288_v48 = vand.u32 4294901760, %v8287_v46 }
 0x9db   :  { %23019 = vmatmul.mubr.f32.vlgmr.msra.gmra.mxu0 %v7382_v40  ;;  %23044 = vmatmul.mubr.f32.vlgmr.msra.gmra.mxu1 %v7378_v26 }
 0x9dc   :  { %23027 = vmatpush3.msra.mxu0 %v25121_v49  ;;  %23052 = vmatpush3.xpose.msra.mxu1 %v7877_v41  ;;  %v8289_v49 = vsub.f32 %v8287_v46, %v8288_v48 }
 0x9dd   :  { %23028 = vmatprep.mubr.msk.f32.mxu0 %vm24283_vm1, %v24282_v51  ;;  %23036 = vmatprep.subr.mxu0 %v24282_v51 }
 0x9de   :  { %23053 = vmatprep.mubr.msk.f32.mxu1 %vm24283_vm1, %v24282_v51  ;;  %23061 = vmatprep.subr.mxu1 %v24282_v51  ;;  %v8290_v53 = vand.u32 4294901760, %v8289_v49 }
 0x9df   :  { %23029 = vmatmul.mubr.f32.vlgmr.msra.gmra.mxu0 %v7379_v30  ;;  %23054 = vmatmul.mubr.f32.vlgmr.msra.gmra.mxu1 %v25149_v31 }
 0x9e0   :  { %23037 = vmatpush3.msra.mxu0 %v7421_v55  ;;  %23062 = vmatpush3.xpose.msra.mxu1 %v25131_v1 }
 0x9e1   :  { %23038 = vmatprep.mubr.msk.f32.mxu0 %vm24283_vm1, %v24282_v51  ;;  %23046 = vmatprep.subr.mxu0 %v24282_v51 }
 0x9e2   :  { %23063 = vmatprep.mubr.msk.f32.mxu1 %vm24283_vm1, %v24282_v51  ;;  %23071 = vmatprep.subr.mxu1 %v24282_v51 }
 0x9e3   :  { %23039 = vmatmul.mubr.f32.vlgmr.msra.gmra.mxu0 %v7378_v26  ;;  %23064 = vmatmul.mubr.f32.vlgmr.msra.gmra.mxu1 %v7834_v44 }
 0x9e4   :  { %23047 = vmatpush3.xpose.msra.mxu0 %v25131_v1  ;;  %23072 = vmatpush3.xpose.msra.mxu1 %v25131_v1 }
 0x9e5   :  { %23048 = vmatprep.mubr.msk.f32.mxu0 %vm24283_vm1, %v24282_v51  ;;  %23056 = vmatprep.subr.mxu0 %v24282_v51 }
 0x9e6   :  { %23073 = vmatprep.mubr.msk.f32.mxu1 %vm24283_vm1, %v24282_v51  ;;  %23081 = vmatprep.subr.mxu1 %v24282_v51 }
 0x9e7   :  { %23049 = vmatmul.mubr.f32.vlgmr.msra.gmra.mxu0 %v7836_v45  ;;  %23074 = vmatmul.mubr.f32.vlgmr.msra.gmra.mxu1 %v25149_v31 }
 0x9e8   :  { %23057 = vmatpush3.xpose.msra.mxu0 %v25137_v16  ;;  %23082 = vmatpush3.xpose.msra.mxu1 %v8331_v47 }
 0x9e9   :  { %23058 = vmatprep.mubr.msk.f32.mxu0 %vm24283_vm1, %v24282_v51  ;;  %23066 = vmatprep.subr.mxu0 %v24282_v51 }
 0x9ea   :  { %23083 = vmatprep.mubr.msk.f32.mxu1 %vm24283_vm1, %v24282_v51  ;;  %23091 = vmatprep.subr.mxu1 %v24282_v51 }
 0x9eb   :  { %23059 = vmatmul.mubr.f32.vlgmr.msra.gmra.mxu0 %v7833_v39  ;;  %23084 = vmatmul.mubr.f32.vlgmr.msra.gmra.mxu1 %v8286_v7 }
 0x9ec   :  { %23067 = vmatpush3.xpose.msra.mxu0 %v7875_v61  ;;  %23092 = vmatpush3.xpose.msra.mxu1 %v25157_v37 }
 0x9ed   :  { %23068 = vmatprep.mubr.msk.f32.mxu0 %vm24283_vm1, %v24282_v51  ;;  %23076 = vmatprep.subr.mxu0 %v24282_v51 }
 0x9ee   :  { %23093 = vmatprep.mubr.msk.f32.mxu1 %vm24283_vm1, %v24282_v51  ;;  %23101 = vmatprep.subr.mxu1 %v24282_v51 }
 0x9ef   :  { %23069 = vmatmul.mubr.f32.vlgmr.msra.gmra.mxu0 %v25149_v31  ;;  %23094 = vmatmul.mubr.f32.vlgmr.msra.gmra.mxu1 %v8288_v48 }
 0x9f0   :  { %23077 = vmatpush3.xpose.msra.mxu0 %v25157_v37  ;;  %23102 = vmatpush3.xpose.msra.mxu1 %v25157_v37 }
 0x9f1   :  { %23078 = vmatprep.mubr.msk.f32.mxu0 %vm24283_vm1, %v24282_v51  ;;  %23086 = vmatprep.subr.mxu0 %v24282_v51 }
 0x9f2   :  { %23103 = vmatprep.mubr.msk.f32.mxu1 %vm24283_vm1, %v24282_v51  ;;  %23111 = vmatprep.subr.mxu1 %v24282_v51 }
 0x9f3   :  { %23079 = vmatmul.mubr.f32.vlgmr.msra.gmra.mxu0 %v8290_v53  ;;  %23104 = vmatmul.mubr.f32.vlgmr.msra.gmra.mxu1 %v8286_v7 }
 0x9f4   :  { %23087 = vmatpush3.xpose.msra.mxu0 %v25167_v59  ;;  %23088 = vmatprep.mubr.msk.f32.mxu0 %vm24283_vm1, %v24282_v51 }
 0x9f5   :  { %23096 = vmatprep.subr.mxu0 %v24282_v51  ;;  %23113 = vmatprep.mubr.msk.f32.mxu1 %vm24283_vm1, %v24282_v51 }
 0x9f7   :  { %23089 = vmatmul.mubr.f32.vlgmr.msra.gmra.mxu0 %v8287_v46 }
 0x9f8   :  { %23097 = vmatpush3.xpose.msra.mxu0 %v8329_v8  ;;  %23098 = vmatprep.mubr.msk.f32.mxu0 %vm24283_vm1, %v24282_v51 }
 0x9f9   :  { %23106 = vmatprep.subr.mxu0 %v24282_v51 }
 0x9fb   :  { %23099 = vmatmul.mubr.f32.vlgmr.msra.gmra.mxu0 %v8286_v7 }
 0x9fc   :  { %23108 = vmatprep.mubr.msk.f32.mxu0 %vm24283_vm1, %v24282_v51 }
 0xa87   :  { %v7008_v54 = vpop.f32.mrf.mxu1 }
 0xa89   :  { %v22995_v55 = vpop.f32.mrf.mxu1 }
 0xa8b   :  { %v7156_v56 = vpop.f32.mrf.mxu1 }
 0xa8d   :  { %v23005_v57 = vpop.f32.mrf.mxu1 }
 0xa8f   :  { %v6932_v58 = vpop.f32.mrf.mxu0  ;;  %v7302_v1 = vpop.f32.mrf.mxu1 }
 0xa90   :  { %v7009_v5 = vadd.f32 %v7008_v54, %v6932_v58 }
 0xa91   :  { %v22990_v6 = vpop.f32.mrf.mxu0  ;;  %v23015_v10 = vpop.f32.mrf.mxu1 }
 0xa93   :  { %v7082_v11 = vpop.f32.mrf.mxu0  ;;  %v7460_v16 = vpop.f32.mrf.mxu1 }
 0xa94   :  { %v7083_v17 = vadd.f32 %v7082_v11, %v7009_v5 }
 0xa95   :  { %v23000_v20 = vpop.f32.mrf.mxu0  ;;  %v23025_v23 = vpop.f32.mrf.mxu1 }
 0xa96   :  { %v7157_v24 = vadd.f32 %v7156_v56, %v7083_v17 }
 0xa97   :  { %v7230_v26 = vpop.f32.mrf.mxu0  ;;  %v7608_v28 = vpop.f32.mrf.mxu1 }
 0xa98   :  { %v7231_v61 = vadd.f32 %v7230_v26, %v7157_v24 }
 0xa99   :  { %v23010_v29 = vpop.f32.mrf.mxu0  ;;  %v23035_v30 = vpop.f32.mrf.mxu1 }
 0xa9a   :  { %v25237_v31 = vadd.f32 %v7302_v1, %v7231_v61 }
 0xa9b   :  { %v7384_v33 = vpop.f32.mrf.mxu0  ;;  %v7754_v36 = vpop.f32.mrf.mxu1 }
 0xa9c   :  { %v7461_v37 = vadd.f32 %v7460_v16, %v7384_v33 }
 0xa9d   :  { %v23020_v38 = vpop.f32.mrf.mxu0  ;;  %v23045_v39 = vpop.f32.mrf.mxu1 }
 0xa9f   :  { %v7534_v40 = vpop.f32.mrf.mxu0  ;;  %v7914_v41 = vpop.f32.mrf.mxu1 }
 0xaa0   :  { %v7535_v59 = vadd.f32 %v7534_v40, %v7461_v37 }
 0xaa1   :  { %v23030_v62 = vpop.f32.mrf.mxu0  ;;  %v23055_v44 = vpop.f32.mrf.mxu1 }
 0xaa2   :  { %v7609_v3 = vadd.f32 %v7608_v28, %v7535_v59 }
 0xaa3   :  { %v7682_v8 = vpop.f32.mrf.mxu0  ;;  %v8062_v14 = vpop.f32.mrf.mxu1 }
 0xaa4   :  { %v7683_v7 = vadd.f32 %v7682_v8, %v7609_v3 }
 0xaa5   :  { %v23040_v18 = vpop.f32.mrf.mxu0  ;;  %v23065_v45 = vpop.f32.mrf.mxu1 }
 0xaa6   :  { %v25239_v46 = vadd.f32 %v7754_v36, %v7683_v7 }
 0xaa7   :  { %v7838_v47 = vpop.f32.mrf.mxu0  ;;  %v8208_v48 = vpop.f32.mrf.mxu1 }
 0xaa8   :  { %v7915_v54 = vadd.f32 %v7914_v41, %v7838_v47 }
 0xaa9   :  { %v23050_v49 = vpop.f32.mrf.mxu0  ;;  %v23075_v53 = vpop.f32.mrf.mxu1 }
 0xaab   :  { %v7988_v55 = vpop.f32.mrf.mxu0  ;;  %v8368_v56 = vpop.f32.mrf.mxu1 }
 0xaac   :  { %v7989_v57 = vadd.f32 %v7988_v55, %v7915_v54 }
 0xaad   :  { %v23060_v58 = vpop.f32.mrf.mxu0  ;;  %v23085_v1 = vpop.f32.mrf.mxu1 }
 0xaae   :  { %v8063_v5 = vadd.f32 %v8062_v14, %v7989_v57 }
 0xaaf   :  { %v8136_v6 = vpop.f32.mrf.mxu0  ;;  %v8516_v10 = vpop.f32.mrf.mxu1 }
 0xab0   :  { %v8137_v11 = vadd.f32 %v8136_v6, %v8063_v5 }
 0xab1   :  { %v23070_v16 = vpop.f32.mrf.mxu0  ;;  %v23095_v17 = vpop.f32.mrf.mxu1 }
 0xab2   :  { %v8209_v20 = vadd.f32 %v8208_v48, %v8137_v11 }
 0xab3   :  { %v8292_v23 = vpop.f32.mrf.mxu0  ;;  %v8662_v24 = vpop.f32.mrf.mxu1 }
 0xab4   :  { %v8666_v26 = vsel %vm1534_vm2, %v8209_v20, -inf  ;;  %v8369_v29 = vadd.f32 %v8368_v56, %v8292_v23 }
 0xab5   :  { %v23105_v28 = vpop.f32.mrf.mxu1  ;;  %8667 = vmax.xlane.f32.xlu1 %v8666_v26  ;;  %v23080_v61 = vpop.f32.mrf.mxu0 }
 0xab7   :  { %v8442_v30 = vpop.f32.mrf.mxu0 }
 0xab8   :  { %v8443_v33 = vadd.f32 %v8442_v30, %v8369_v29 }
 0xab9   :  { %v23090_v36 = vpop.f32.mrf.mxu0 }
 0xaba   :  { %v8517_v37 = vadd.f32 %v8516_v10, %v8443_v33 }
 0xabb   :  { %v8590_v38 = vpop.f32.mrf.mxu0 }
 0xabc   :  { %v8591_v39 = vadd.f32 %v8590_v38, %v8517_v37 }
 0xabd   :  { %v23100_v40 = vpop.f32.mrf.mxu0 }
 0xabe   :  { %v8663_v41 = vadd.f32 %v8662_v24, %v8591_v39 }
 0xac0   :  { %v8669_v59 = vsel %vm1534_vm2, %v8663_v41, -inf }
 0xac1   :  { %8670 = vmax.xlane.f32.xlu0 %v8669_v59 }
 0xb3e   :  { %v8668_v62 = vpop.xlane.xlu1 %8667 }
 0xb3f   :  { %v8672_v44 = vsub.f32 %v8209_v20, %v8668_v62 }
 0xb41   :  { %v8674_v3 = vmul.f32 1.442695, %v8672_v44 }
 0xb43   :  { %24185 = vpow2.f32 %v8674_v3 }
 0xb4a   :  { %v8671_v8 = vpop.xlane.xlu0 %8670 }
 0xb4b   :  { %v8673_v14 = vsub.f32 %v8663_v41, %v8671_v8 }
 0xb4d   :  { %v8676_v7 = vmul.f32 1.442695, %v8673_v14 }
 0xb4f   :  { %24187 = vpow2.f32 %v8676_v7 }
 0xb50   :  { %v24186_v18 = vpop.eup %24185 }
 0xb51   :  { %v8678_v45 = vsel %vm1534_vm2, %v24186_v18, 0.0 }
 0xb52   :  { %8679 = vadd.xlane.f32.xlu0 %v8678_v45 }
 0xb5c   :  { %v24188_v47 = vpop.eup %24187 }
 0xb5d   :  { %v8681_v48 = vsel %vm1534_vm2, %v24188_v47, 0.0 }
 0xb5e   :  { %8682 = vadd.xlane.f32.xlu1 %v8681_v48 }
 0xb68   :  { %8688 = vrot.lane.b32.xlu0 %v24913_v52, %s24289_s28 }
 0xb6c   :  { %9592 = vrot.lane.b32.xlu0 %v24900_v22, %s24290_s29 }
 0xb6f   :  { %9140 = vrot.lane.b32.xlu1 %v24911_v50, %s24289_s28 }
 0xb70   :  { %10046 = vrot.lane.b32.xlu0 %v24907_v4, %s24290_s29 }
 0xb73   :  { %9594 = vrot.lane.b32.xlu1 %v24913_v52, %s24290_s29 }
 0xb77   :  { %10048 = vrot.lane.b32.xlu1 %v24911_v50, %s24290_s29 }
 0xbdb   :  { %v8680_v49 = vpop.xlane.xlu0 %8679 }
 0xbdc   :  { %24189 = vrcp.f32 %v8680_v49 }
 0xbdf   :  { %v8689_v53 = vpop.permute.xlu0 %8688 }
 0xbe0   :  { %v8725_v54 = vand.u32 4294901760, %v8689_v53 }
 0xbe2   :  { %v8802_v55 = vsub.f32 %v8689_v53, %v8725_v54  ;;  %23107 = vmatpush3.msra.mxu0 %v8725_v54 }
 0xbe3   :  { %23116 = vmatprep.subr.mxu0 %v24282_v51  ;;  %v9593_v39 = vpop.permute.xlu0 %9592 }
 0xbe4   :  { %v8803_v22 = vand.u32 4294901760, %v8802_v55  ;;  %v9596_v62 = vsel %vm1534_vm2, %v9593_v39, 0 }
 0xbe5   :  { %v25288_v14 = vand.u32 4294901760, %v9596_v62 }
 0xbe6   :  { %v8804_v56 = vsub.f32 %v8802_v55, %v8803_v22 }
 0xbe7   :  { %v8683_v57 = vpop.xlane.xlu1 %8682  ;;  %v9667_v48 = vsub.f32 %v9596_v62, %v25288_v14 }
 0xbe8   :  { %v8805_v58 = vand.u32 4294901760, %v8804_v56  ;;  %24191 = vrcp.f32 %v8683_v57 }
 0xbe9   :  { %v24190_v4 = vpop.eup %24189 }
 0xbea   :  { %23112 = vmatpush3.msra.mxu1 %v8805_v58  ;;  %v8685_v1 = vmul.f32 %v24190_v4, %v24186_v18 }
 0xbeb   :  { %v9141_v5 = vpop.permute.xlu1 %9140  ;;  %23121 = vmatprep.subr.mxu1 %v24282_v51 }
 0xbec   :  { %v9177_v6 = vand.u32 4294901760, %v9141_v5  ;;  %v8692_v10 = vsel %vm1534_vm2, %v8685_v1, 0 }
 0xbed   :  { %v8760_v11 = vand.u32 4294901760, %v8692_v10 }
 0xbee   :  { %v25260_v16 = vsub.f32 %v9141_v5, %v9177_v6 }
 0xbef   :  { %v9595_v17 = vpop.permute.xlu1 %9594  ;;  %v8761_v20 = vsub.f32 %v8692_v10, %v8760_v11  ;;  %23114 = vmatmul.mubr.f32.vlgmr.msra.gmra.mxu1 %v8760_v11 }
 0xbf0   :  { %v9255_v23 = vand.u32 4294901760, %v25260_v16  ;;  %v9598_v24 = vsel %vm1534_vm2, %v9595_v17, 0  ;;  %23122 = vmatpush3.msra.mxu1 %v8725_v54  ;;  %23123 = vmatprep.mubr.msk.f32.mxu1 %vm24283_vm1, %v24282_v51 }
 0xbf1   :  { %23131 = vmatprep.subr.mxu1 %v24282_v51  ;;  %v8762_v26 = vand.u32 4294901760, %v8761_v20  ;;  %v25270_v61 = vand.u32 4294901760, %v9598_v24 }
 0xbf2   :  { %v9256_v28 = vsub.f32 %v25260_v16, %v9255_v23 }
 0xbf3   :  { %23124 = vmatmul.mubr.f32.vlgmr.msra.gmra.mxu1 %v8762_v26  ;;  %v8763_v29 = vsub.f32 %v8761_v20, %v8762_v26  ;;  %v25276_v38 = vsub.f32 %v9598_v24, %v25270_v61  ;;  %v10049_v40 = vpop.permute.xlu1 %10048 }
 0xbf4   :  { %v9257_v30 = vand.u32 4294901760, %v9256_v28  ;;  %23132 = vmatpush3.msra.mxu1 %v8725_v54  ;;  %23133 = vmatprep.mubr.msk.f32.mxu1 %vm24283_vm1, %v24282_v51  ;;  %v10052_v3 = vsel %vm1534_vm2, %v10049_v40, 0 }
 0xbf5   :  { %v24192_v33 = vpop.eup %24191  ;;  %23141 = vmatprep.subr.mxu1 %v24282_v51  ;;  %v8764_v36 = vand.u32 4294901760, %v8763_v29  ;;  %v9709_v44 = vand.u32 4294901760, %v25276_v38  ;;  %v25296_v45 = vand.u32 4294901760, %v10052_v3 }
 0xbf6   :  { %v8687_v37 = vmul.f32 %v24192_v33, %v24188_v47 }
 0xbf7   :  { %23109 = vmatmul.mubr.f32.vlgmr.msra.gmra.mxu0 %v8764_v36  ;;  %23134 = vmatmul.mubr.f32.vlgmr.msra.gmra.mxu1 %v8760_v11  ;;  %v9710_v18 = vsub.f32 %v25276_v38, %v9709_v44  ;;  %v25306_v54 = vsub.f32 %v10052_v3, %v25296_v45 }
 0xbf8   :  { %23117 = vmatpush3.msra.mxu0 %v8802_v55  ;;  %23142 = vmatpush3.msra.mxu1 %v9257_v30  ;;  %v9144_v41 = vsel %vm1534_vm2, %v8687_v37, 0  ;;  %v10047_v55 = vpop.permute.xlu0 %10046 }
 0xbf9   :  { %23118 = vmatprep.mubr.msk.f32.mxu0 %vm24283_vm1, %v24282_v51  ;;  %23126 = vmatprep.subr.mxu0 %v24282_v51  ;;  %v9212_v59 = vand.u32 4294901760, %v9144_v41  ;;  %v9711_v53 = vand.u32 4294901760, %v9710_v18  ;;  %v10050_v56 = vsel %vm1534_vm2, %v10047_v55, 0  ;;  %v10163_v57 = vand.u32 4294901760, %v25306_v54 }
 0xbfa   :  { %23143 = vmatprep.mubr.msk.f32.mxu1 %vm24283_vm1, %v24282_v51  ;;  %23151 = vmatprep.subr.mxu1 %v24282_v51  ;;  %v10120_v4 = vand.u32 4294901760, %v10050_v56 }
 0xbfb   :  { %23119 = vmatmul.mubr.f32.vlgmr.msra.gmra.mxu0 %v8761_v20  ;;  %v9213_v8 = vsub.f32 %v9144_v41, %v9212_v59  ;;  %23144 = vmatmul.mubr.f32.vlgmr.msra.gmra.mxu1 %v9212_v59  ;;  %v10164_v1 = vsub.f32 %v25306_v54, %v10163_v57 }
 0xbfc   :  { %23127 = vmatpush3.msra.mxu0 %v8803_v22  ;;  %23152 = vmatpush3.msra.mxu1 %v9177_v6  ;;  %v9668_v22 = vand.u32 4294901760, %v9667_v48 }
 0xbfd   :  { %23128 = vmatprep.mubr.msk.f32.mxu0 %vm24283_vm1, %v24282_v51  ;;  %23136 = vmatprep.subr.mxu0 %v24282_v51  ;;  %v9214_v7 = vand.u32 4294901760, %v9213_v8  ;;  %v10165_v10 = vand.u32 4294901760, %v10164_v1 }
 0xbfe   :  { %23153 = vmatprep.mubr.msk.f32.mxu1 %vm24283_vm1, %v24282_v51  ;;  %23161 = vmatprep.subr.mxu1 %v24282_v51  ;;  %v9669_v58 = vsub.f32 %v9667_v48, %v9668_v22 }
 0xbff   :  { %23129 = vmatmul.mubr.f32.vlgmr.msra.gmra.mxu0 %v8760_v11  ;;  %23154 = vmatmul.mubr.f32.vlgmr.msra.gmra.mxu1 %v9214_v7  ;;  %v9215_v47 = vsub.f32 %v9213_v8, %v9214_v7 }
 0xc00   :  { %23137 = vmatpush3.msra.mxu0 %v9177_v6  ;;  %23162 = vmatpush3.msra.mxu1 %v9177_v6  ;;  %v9670_v5 = vand.u32 4294901760, %v9669_v58  ;;  %v10121_v6 = vsub.f32 %v10050_v56, %v10120_v4 }
 0xc01   :  { %23138 = vmatprep.mubr.msk.f32.mxu0 %vm24283_vm1, %v24282_v51  ;;  %23146 = vmatprep.subr.mxu0 %v24282_v51  ;;  %v9216_v49 = vand.u32 4294901760, %v9215_v47 }
 0xc02   :  { %23163 = vmatprep.mubr.msk.f32.mxu1 %vm24283_vm1, %v24282_v51  ;;  %23171 = vmatprep.subr.mxu1 %v24282_v51  ;;  %v10122_v11 = vand.u32 4294901760, %v10121_v6 }
 0xc03   :  { %23139 = vmatmul.mubr.f32.vlgmr.msra.gmra.mxu0 %v9216_v49  ;;  %23164 = vmatmul.mubr.f32.vlgmr.msra.gmra.mxu1 %v9212_v59 }
 0xc04   :  { %23147 = vmatpush3.msra.mxu0 %v25260_v16  ;;  %23172 = vmatpush3.xpose.msra.mxu1 %v9711_v53  ;;  %v10123_v16 = vsub.f32 %v10121_v6, %v10122_v11 }
 0xc05   :  { %23148 = vmatprep.mubr.msk.f32.mxu0 %vm24283_vm1, %v24282_v51  ;;  %23156 = vmatprep.subr.mxu0 %v24282_v51 }
 0xc06   :  { %23173 = vmatprep.mubr.msk.f32.mxu1 %vm24283_vm1, %v24282_v51  ;;  %23181 = vmatprep.subr.mxu1 %v24282_v51  ;;  %v10124_v17 = vand.u32 4294901760, %v10123_v16 }
 0xc07   :  { %23149 = vmatmul.mubr.f32.vlgmr.msra.gmra.mxu0 %v9213_v8  ;;  %23174 = vmatmul.mubr.f32.vlgmr.msra.gmra.mxu1 %v25288_v14 }
 0xc08   :  { %23157 = vmatpush3.msra.mxu0 %v9255_v23  ;;  %23182 = vmatpush3.xpose.msra.mxu1 %v25270_v61 }
 0xc09   :  { %23158 = vmatprep.mubr.msk.f32.mxu0 %vm24283_vm1, %v24282_v51  ;;  %23166 = vmatprep.subr.mxu0 %v24282_v51 }
 0xc0a   :  { %23183 = vmatprep.mubr.msk.f32.mxu1 %vm24283_vm1, %v24282_v51  ;;  %23191 = vmatprep.subr.mxu1 %v24282_v51 }
 0xc0b   :  { %23159 = vmatmul.mubr.f32.vlgmr.msra.gmra.mxu0 %v9212_v59  ;;  %23184 = vmatmul.mubr.f32.vlgmr.msra.gmra.mxu1 %v9668_v22 }
 0xc0c   :  { %23167 = vmatpush3.xpose.msra.mxu0 %v25270_v61  ;;  %23192 = vmatpush3.xpose.msra.mxu1 %v25270_v61 }
 0xc0d   :  { %23168 = vmatprep.mubr.msk.f32.mxu0 %vm24283_vm1, %v24282_v51  ;;  %23176 = vmatprep.subr.mxu0 %v24282_v51 }
 0xc0e   :  { %23193 = vmatprep.mubr.msk.f32.mxu1 %vm24283_vm1, %v24282_v51  ;;  %23201 = vmatprep.subr.mxu1 %v24282_v51 }
 0xc0f   :  { %23169 = vmatmul.mubr.f32.vlgmr.msra.gmra.mxu0 %v9670_v5  ;;  %23194 = vmatmul.mubr.f32.vlgmr.msra.gmra.mxu1 %v25288_v14 }
 0xc10   :  { %23177 = vmatpush3.xpose.msra.mxu0 %v25276_v38  ;;  %23202 = vmatpush3.xpose.msra.mxu1 %v10165_v10 }
 0xc11   :  { %23178 = vmatprep.mubr.msk.f32.mxu0 %vm24283_vm1, %v24282_v51  ;;  %23186 = vmatprep.subr.mxu0 %v24282_v51 }
 0xc12   :  { %23203 = vmatprep.mubr.msk.f32.mxu1 %vm24283_vm1, %v24282_v51  ;;  %23211 = vmatprep.subr.mxu1 %v24282_v51 }
 0xc13   :  { %23179 = vmatmul.mubr.f32.vlgmr.msra.gmra.mxu0 %v9667_v48  ;;  %23204 = vmatmul.mubr.f32.vlgmr.msra.gmra.mxu1 %v10120_v4 }
 0xc14   :  { %23187 = vmatpush3.xpose.msra.mxu0 %v9709_v44  ;;  %23212 = vmatpush3.xpose.msra.mxu1 %v25296_v45 }
 0xc15   :  { %23188 = vmatprep.mubr.msk.f32.mxu0 %vm24283_vm1, %v24282_v51  ;;  %23196 = vmatprep.subr.mxu0 %v24282_v51 }
 0xc16   :  { %23213 = vmatprep.mubr.msk.f32.mxu1 %vm24283_vm1, %v24282_v51  ;;  %23221 = vmatprep.subr.mxu1 %v24282_v51 }
 0xc17   :  { %23189 = vmatmul.mubr.f32.vlgmr.msra.gmra.mxu0 %v25288_v14  ;;  %23214 = vmatmul.mubr.f32.vlgmr.msra.gmra.mxu1 %v10122_v11 }
 0xc18   :  { %23197 = vmatpush3.xpose.msra.mxu0 %v25296_v45  ;;  %23222 = vmatpush3.xpose.msra.mxu1 %v25296_v45 }
 0xc19   :  { %23198 = vmatprep.mubr.msk.f32.mxu0 %vm24283_vm1, %v24282_v51  ;;  %23206 = vmatprep.subr.mxu0 %v24282_v51 }
 0xc1a   :  { %23223 = vmatprep.mubr.msk.f32.mxu1 %vm24283_vm1, %v24282_v51  ;;  %23231 = vmatprep.subr.mxu1 %v24282_v51 }
 0xc1b   :  { %23199 = vmatmul.mubr.f32.vlgmr.msra.gmra.mxu0 %v10124_v17  ;;  %23224 = vmatmul.mubr.f32.vlgmr.msra.gmra.mxu1 %v10120_v4 }
 0xc1c   :  { %23207 = vmatpush3.xpose.msra.mxu0 %v25306_v54  ;;  %23208 = vmatprep.mubr.msk.f32.mxu0 %vm24283_vm1, %v24282_v51 }
 0xc1d   :  { %23216 = vmatprep.subr.mxu0 %v24282_v51  ;;  %23233 = vmatprep.mubr.msk.f32.mxu1 %vm24283_vm1, %v24282_v51 }
 0xc1f   :  { %23209 = vmatmul.mubr.f32.vlgmr.msra.gmra.mxu0 %v10121_v6 }
 0xc20   :  { %23217 = vmatpush3.xpose.msra.mxu0 %v10163_v57  ;;  %23218 = vmatprep.mubr.msk.f32.mxu0 %vm24283_vm1, %v24282_v51 }
 0xc21   :  { %23226 = vmatprep.subr.mxu0 %v24282_v51 }
 0xc23   :  { %23219 = vmatmul.mubr.f32.vlgmr.msra.gmra.mxu0 %v10120_v4 }
 0xc24   :  { %23228 = vmatprep.mubr.msk.f32.mxu0 %vm24283_vm1, %v24282_v51 }
 0xcaf   :  { %v8842_v20 = vpop.f32.mrf.mxu1 }
 0xcb1   :  { %v23115_v23 = vpop.f32.mrf.mxu1 }
 0xcb3   :  { %v8990_v24 = vpop.f32.mrf.mxu1 }
 0xcb5   :  { %v23125_v26 = vpop.f32.mrf.mxu1 }
 0xcb7   :  { %v8766_v28 = vpop.f32.mrf.mxu0  ;;  %v9136_v61 = vpop.f32.mrf.mxu1 }
 0xcb8   :  { %v8843_v29 = vadd.f32 %v8842_v20, %v8766_v28 }
 0xcb9   :  { %v23110_v30 = vpop.f32.mrf.mxu0  ;;  %v23135_v33 = vpop.f32.mrf.mxu1 }
 0xcbb   :  { %v8916_v36 = vpop.f32.mrf.mxu0  ;;  %v9294_v37 = vpop.f32.mrf.mxu1 }
 0xcbc   :  { %v8917_v38 = vadd.f32 %v8916_v36, %v8843_v29 }
 0xcbd   :  { %v23120_v39 = vpop.f32.mrf.mxu0  ;;  %v23145_v40 = vpop.f32.mrf.mxu1 }
 0xcbe   :  { %v8991_v41 = vadd.f32 %v8990_v24, %v8917_v38 }
 0xcbf   :  { %v9064_v59 = vpop.f32.mrf.mxu0  ;;  %v9442_v62 = vpop.f32.mrf.mxu1 }
 0xcc0   :  { %v9065_v44 = vadd.f32 %v9064_v59, %v8991_v41 }
 0xcc1   :  { %v23130_v3 = vpop.f32.mrf.mxu0  ;;  %v23155_v8 = vpop.f32.mrf.mxu1 }
 0xcc2   :  { %v25376_v14 = vadd.f32 %v9136_v61, %v9065_v44 }
 0xcc3   :  { %v9218_v7 = vpop.f32.mrf.mxu0  ;;  %v9588_v18 = vpop.f32.mrf.mxu1 }
 0xcc4   :  { %v9295_v45 = vadd.f32 %v9294_v37, %v9218_v7 }
 0xcc5   :  { %v23140_v47 = vpop.f32.mrf.mxu0  ;;  %v23165_v48 = vpop.f32.mrf.mxu1 }
 0xcc7   :  { %v9368_v49 = vpop.f32.mrf.mxu0  ;;  %v9748_v53 = vpop.f32.mrf.mxu1 }
 0xcc8   :  { %v9369_v54 = vadd.f32 %v9368_v49, %v9295_v45 }
 0xcc9   :  { %v23150_v55 = vpop.f32.mrf.mxu0  ;;  %v23175_v22 = vpop.f32.mrf.mxu1 }
 0xcca   :  { %v9443_v56 = vadd.f32 %v9442_v62, %v9369_v54 }
 0xccb   :  { %v9516_v57 = vpop.f32.mrf.mxu0  ;;  %v9896_v58 = vpop.f32.mrf.mxu1 }
 0xccc   :  { %v9517_v4 = vadd.f32 %v9516_v57, %v9443_v56 }
 0xccd   :  { %v23160_v1 = vpop.f32.mrf.mxu0  ;;  %v23185_v5 = vpop.f32.mrf.mxu1 }
 0xcce   :  { %v9589_v6 = vadd.f32 %v9588_v18, %v9517_v4 }
 0xccf   :  { %v9672_v10 = vpop.f32.mrf.mxu0  ;;  %v10042_v11 = vpop.f32.mrf.mxu1 }
 0xcd0   :  { %v9749_v20 = vadd.f32 %v9748_v53, %v9672_v10 }
 0xcd1   :  { %v23170_v16 = vpop.f32.mrf.mxu0  ;;  %v23195_v17 = vpop.f32.mrf.mxu1 }
 0xcd3   :  { %v9822_v23 = vpop.f32.mrf.mxu0  ;;  %v10202_v24 = vpop.f32.mrf.mxu1 }
 0xcd4   :  { %v9823_v26 = vadd.f32 %v9822_v23, %v9749_v20 }
 0xcd5   :  { %v23180_v28 = vpop.f32.mrf.mxu0  ;;  %v23205_v61 = vpop.f32.mrf.mxu1 }
 0xcd6   :  { %v9897_v29 = vadd.f32 %v9896_v58, %v9823_v26 }
 0xcd7   :  { %v9970_v30 = vpop.f32.mrf.mxu0  ;;  %v10350_v33 = vpop.f32.mrf.mxu1 }
 0xcd8   :  { %v9971_v36 = vadd.f32 %v9970_v30, %v9897_v29 }
 0xcd9   :  { %v23190_v37 = vpop.f32.mrf.mxu0  ;;  %v23215_v38 = vpop.f32.mrf.mxu1 }
 0xcda   :  { %v10043_v39 = vadd.f32 %v10042_v11, %v9971_v36 }
 0xcdb   :  { %v10126_v40 = vpop.f32.mrf.mxu0  ;;  %v10496_v41 = vpop.f32.mrf.mxu1 }
 0xcdc   :  { %v10500_v59 = vsel %vm1534_vm2, %v10043_v39, -inf  ;;  %v10203_v3 = vadd.f32 %v10202_v24, %v10126_v40 }
 0xcdd   :  { %v23225_v62 = vpop.f32.mrf.mxu1  ;;  %10501 = vmax.xlane.f32.xlu1 %v10500_v59  ;;  %v23200_v44 = vpop.f32.mrf.mxu0 }
 0xcdf   :  { %v10276_v8 = vpop.f32.mrf.mxu0 }
 0xce0   :  { %v10277_v7 = vadd.f32 %v10276_v8, %v10203_v3 }
 0xce1   :  { %v23210_v18 = vpop.f32.mrf.mxu0 }
 0xce2   :  { %v10351_v45 = vadd.f32 %v10350_v33, %v10277_v7 }
 0xce3   :  { %v10424_v47 = vpop.f32.mrf.mxu0 }
 0xce4   :  { %v10425_v48 = vadd.f32 %v10424_v47, %v10351_v45 }
 0xce5   :  { %v23220_v49 = vpop.f32.mrf.mxu0 }
 0xce6   :  { %v10497_v53 = vadd.f32 %v10496_v41, %v10425_v48 }
 0xce8   :  { %v10503_v54 = vsel %vm1534_vm2, %v10497_v53, -inf }
 0xce9   :  { %10504 = vmax.xlane.f32.xlu0 %v10503_v54 }
 0xd66   :  { %v10502_v55 = vpop.xlane.xlu1 %10501 }
 0xd67   :  { %v10506_v22 = vsub.f32 %v10043_v39, %v10502_v55 }
 0xd69   :  { %v10508_v56 = vmul.f32 1.442695, %v10506_v22 }
 0xd6b   :  { %24193 = vpow2.f32 %v10508_v56  ;;  %v21623_v56 = vld [vmem:[%s26540_s8 + $0x30] sm:$0xff] }
 0xd72   :  { %v10505_v57 = vpop.xlane.xlu0 %10504 }
 0xd73   :  { %v10507_v58 = vsub.f32 %v10497_v53, %v10505_v57  ;;  %v21624_v53 = vld [vmem:[%s26540_s8 + $0x38] sm:$0xff] }
 0xd74   :  { %v25428_v54 = vand.u32 4294901760, %v21624_v53 }
 0xd75   :  { %v10510_v4 = vmul.f32 1.442695, %v10507_v58  ;;  %v25436_v58 = vand.u32 4294901760, %v21623_v56 }
 0xd76   :  { %v25434_v57 = vsub.f32 %v21624_v53, %v25428_v54 }
 0xd77   :  { %24195 = vpow2.f32 %v10510_v4 }
 0xd78   :  { %v24194_v1 = vpop.eup %24193 }
 0xd79   :  { %v10512_v5 = vsel %vm1534_vm2, %v24194_v1, 0.0 }
 0xd7a   :  { %10513 = vadd.xlane.f32.xlu0 %v10512_v5  ;;  %v21622_v5 = vld [vmem:[%s26540_s8 + $0x28] sm:$0xff] }
 0xd84   :  { %v24196_v10 = vpop.eup %24195 }
 0xd85   :  { %v10515_v11 = vsel %vm1534_vm2, %v24196_v10, 0.0 }
 0xd86   :  { %10516 = vadd.xlane.f32.xlu1 %v10515_v11  ;;  %v25444_v11 = vand.u32 4294901760, %v25434_v57 }
 0xd90   :  { %10522 = vrot.lane.b32.xlu0 %v24913_v52, %s24291_s30 }
 0xd94   :  { %11430 = vrot.lane.b32.xlu0 %v25239_v46, %s24280_s25 }
 0xd97   :  { %10974 = vrot.lane.b32.xlu1 %v24911_v50, %s24291_s30 }
 0xd98   :  { %11438 = vrot.lane.b32.xlu0 %v9589_v6, %s24292_s13 }
 0xd9b   :  { %11428 = vrot.lane.b32.xlu1 %v25237_v31, %s24280_s25 }
 0xd9f   :  { %11436 = vrot.lane.b32.xlu1 %v25376_v14, %s24292_s13 }
 0xe03   :  { %v10514_v16 = vpop.xlane.xlu0 %10513 }
 0xe04   :  { %24197 = vrcp.f32 %v10514_v16  ;;  %v25447_v16 = vsub.f32 %v21623_v56, %v25436_v58 }
 0xe07   :  { %v10523_v17 = vpop.permute.xlu0 %10522 }
 0xe08   :  { %v10559_v20 = vand.u32 4294901760, %v10523_v17 }
 0xe0a   :  { %v10636_v52 = vsub.f32 %v10523_v17, %v10559_v20  ;;  %23227 = vmatpush3.msra.mxu0 %v10559_v20  ;;  %v25449_v17 = vand.u32 4294901760, %v21622_v5 }
 0xe0b   :  { %23236 = vmatprep.subr.mxu0 %v24282_v51 }
 0xe0c   :  { %v10637_v46 = vand.u32 4294901760, %v10636_v52 }
 0xe0e   :  { %v10638_v23 = vsub.f32 %v10636_v52, %v10637_v46 }
 0xe0f   :  { %v10517_v50 = vpop.xlane.xlu1 %10516 }
 0xe10   :  { %v10639_v24 = vand.u32 4294901760, %v10638_v23  ;;  %24199 = vrcp.f32 %v10517_v50  ;;  %v11587_v50 = vsub.f32 %v25434_v57, %v25444_v11 }
 0xe11   :  { %v24198_v6 = vpop.eup %24197 }
 0xe12   :  { %v10519_v26 = vmul.f32 %v24198_v6, %v24194_v1  ;;  %23232 = vmatpush3.msra.mxu1 %v10639_v24  ;;  %v25459_v24 = vand.u32 4294901760, %v25447_v16  ;;  %v25462_v6 = vsub.f32 %v21622_v5, %v25449_v17 }
 0xe13   :  { %v10975_v31 = vpop.permute.xlu1 %10974  ;;  %23241 = vmatprep.subr.mxu1 %v24282_v51 }
 0xe14   :  { %v11011_v14 = vand.u32 4294901760, %v10975_v31  ;;  %v10526_v28 = vsel %vm1534_vm2, %v10519_v26, 0 }
 0xe15   :  { %v10594_v61 = vand.u32 4294901760, %v10526_v28 }
 0xe16   :  { %v11088_v29 = vsub.f32 %v10975_v31, %v11011_v14 }
 0xe17   :  { %v10595_v30 = vsub.f32 %v10526_v28, %v10594_v61  ;;  %23234 = vmatmul.mubr.f32.vlgmr.msra.gmra.mxu1 %v10594_v61 }
 0xe18   :  { %v11089_v33 = vand.u32 4294901760, %v11088_v29  ;;  %23242 = vmatpush3.msra.mxu1 %v10559_v20  ;;  %23243 = vmatprep.mubr.msk.f32.mxu1 %vm24283_vm1, %v24282_v51 }
 0xe19   :  { %23251 = vmatprep.subr.mxu1 %v24282_v51  ;;  %v10596_v36 = vand.u32 4294901760, %v10595_v30 }
 0xe1a   :  { %v11090_v37 = vsub.f32 %v11088_v29, %v11089_v33 }
 0xe1b   :  { %23244 = vmatmul.mubr.f32.vlgmr.msra.gmra.mxu1 %v10596_v36  ;;  %v10597_v38 = vsub.f32 %v10595_v30, %v10596_v36 }
 0xe1c   :  { %v11091_v39 = vand.u32 4294901760, %v11090_v37  ;;  %23252 = vmatpush3.msra.mxu1 %v10559_v20  ;;  %23253 = vmatprep.mubr.msk.f32.mxu1 %vm24283_vm1, %v24282_v51 }
 0xe1d   :  { %v24200_v40 = vpop.eup %24199  ;;  %23261 = vmatprep.subr.mxu1 %v24282_v51  ;;  %v10598_v41 = vand.u32 4294901760, %v10597_v38 }
 0xe1e   :  { %v10521_v59 = vmul.f32 %v24200_v40, %v24196_v10 }
 0xe1f   :  { %23229 = vmatmul.mubr.f32.vlgmr.msra.gmra.mxu0 %v10598_v41  ;;  %23254 = vmatmul.mubr.f32.vlgmr.msra.gmra.mxu1 %v10594_v61 }
 0xe20   :  { %23237 = vmatpush3.msra.mxu0 %v10636_v52  ;;  %23262 = vmatpush3.msra.mxu1 %v11091_v39  ;;  %v10978_v62 = vsel %vm1534_vm2, %v10521_v59, 0 }
 0xe21   :  { %23238 = vmatprep.mubr.msk.f32.mxu0 %vm24283_vm1, %v24282_v51  ;;  %23246 = vmatprep.subr.mxu0 %v24282_v51  ;;  %v11046_v44 = vand.u32 4294901760, %v10978_v62 }
 0xe22   :  { %23263 = vmatprep.mubr.msk.f32.mxu1 %vm24283_vm1, %v24282_v51  ;;  %23271 = vmatprep.subr.mxu1 %v24282_v51 }
 0xe23   :  { %23239 = vmatmul.mubr.f32.vlgmr.msra.gmra.mxu0 %v10595_v30  ;;  %v11047_v3 = vsub.f32 %v10978_v62, %v11046_v44  ;;  %23264 = vmatmul.mubr.f32.vlgmr.msra.gmra.mxu1 %v11046_v44  ;;  %v25471_v30 = vand.u32 4294901760, %v25462_v6 }
 0xe24   :  { %23247 = vmatpush3.msra.mxu0 %v10637_v46  ;;  %23272 = vmatpush3.msra.mxu1 %v11011_v14  ;;  %v21621_v46 = vld [vmem:[%s26540_s8 + $0x20] sm:$0xff] }
 0xe25   :  { %23248 = vmatprep.mubr.msk.f32.mxu0 %vm24283_vm1, %v24282_v51  ;;  %23256 = vmatprep.subr.mxu0 %v24282_v51  ;;  %v11048_v8 = vand.u32 4294901760, %v11047_v3  ;;  %v11601_v40 = vsub.f32 %v25462_v6, %v25471_v30 }
 0xe26   :  { %23273 = vmatprep.mubr.msk.f32.mxu1 %vm24283_vm1, %v24282_v51  ;;  %23281 = vmatprep.subr.mxu1 %v24282_v51 }
 0xe27   :  { %23249 = vmatmul.mubr.f32.vlgmr.msra.gmra.mxu0 %v10594_v61  ;;  %23274 = vmatmul.mubr.f32.vlgmr.msra.gmra.mxu1 %v11048_v8  ;;  %v11049_v7 = vsub.f32 %v11047_v3, %v11048_v8  ;;  %v11588_v61 = vand.u32 4294901760, %v11587_v50 }
 0xe28   :  { %23257 = vmatpush3.msra.mxu0 %v11011_v14  ;;  %23282 = vmatpush3.msra.mxu1 %v11011_v14  ;;  %v25465_v14 = vand.u32 4294901760, %v21621_v46 }
 0xe29   :  { %23258 = vmatprep.mubr.msk.f32.mxu0 %vm24283_vm1, %v24282_v51  ;;  %23266 = vmatprep.subr.mxu0 %v24282_v51  ;;  %v11050_v18 = vand.u32 4294901760, %v11049_v7 }
 0xe2a   :  { %23283 = vmatprep.mubr.msk.f32.mxu1 %vm24283_vm1, %v24282_v51  ;;  %v25474_v37 = vsub.f32 %v21621_v46, %v25465_v14  ;;  %23297 = vmatprep.subr.mxu1 %v11588_v61 }
 0xe2b   :  { %23259 = vmatmul.mubr.f32.vlgmr.msra.gmra.mxu0 %v11050_v18  ;;  %23284 = vmatmul.mubr.f32.vlgmr.msra.gmra.mxu1 %v11046_v44 }
 0xe2c   :  { %23267 = vmatpush3.msra.mxu0 %v11088_v29  ;;  %23268 = vmatprep.mubr.msk.f32.mxu0 %vm24283_vm1, %v24282_v51  ;;  %v11594_v29 = vsub.f32 %v25447_v16, %v25459_v24  ;;  %v25481_v62 = vand.u32 4294901760, %v25474_v37 }
 0xe2d   :  { %23276 = vmatprep.subr.mxu0 %v24282_v51  ;;  %23298 = vmatpush3.msra.mxu1 %v11588_v61 }
 0xe2e   :  { %v11595_v39 = vand.u32 4294901760, %v11594_v29  ;;  %v11608_v18 = vsub.f32 %v25474_v37, %v25481_v62 }
 0xe2f   :  { %23269 = vmatmul.mubr.f32.vlgmr.msra.gmra.mxu0 %v11047_v3  ;;  %v11602_v3 = vand.u32 4294901760, %v11601_v40 }
 0xe30   :  { %23277 = vmatpush3.msra.mxu0 %v11089_v33  ;;  %23278 = vmatprep.mubr.msk.f32.mxu0 %vm24283_vm1, %v24282_v51 }
 0xe31   :  { %23286 = vmatprep.subr.mxu0 %v25428_v54  ;;  %23299 = vmatprep.subr.mxu1 %v11595_v39 }
 0xe32   :  { %23300 = vmatpush3.msra.mxu1 %v11595_v39 }
 0xe33   :  { %23279 = vmatmul.mubr.f32.vlgmr.msra.gmra.mxu0 %v11046_v44  ;;  %23301 = vmatprep.subr.mxu1 %v11602_v3 }
 0xe34   :  { %23287 = vmatpush3.msra.mxu0 %v25428_v54  ;;  %23302 = vmatpush3.msra.mxu1 %v11602_v3 }
 0xe35   :  { %23288 = vmatprep.subr.mxu0 %v25436_v58 }
 0xe36   :  { %23289 = vmatpush3.msra.mxu0 %v25436_v58 }
 0xe37   :  { %23290 = vmatprep.subr.mxu0 %v25449_v17 }
 0xe38   :  { %23291 = vmatpush3.msra.mxu0 %v25449_v17 }
 0xe39   :  { %23292 = vmatprep.subr.mxu0 %v25465_v14 }
 0xe3a   :  { %23293 = vmatpush3.msra.mxu0 %v25465_v14 }
 0xe3b   :  { %23308 = vmatprep.subr.mxu0 %v25434_v57 }
 0xed7   :  { %v10676_v45 = vpop.f32.mrf.mxu1 }
 0xed9   :  { %v23235_v47 = vpop.f32.mrf.mxu1 }
 0xedb   :  { %v10824_v48 = vpop.f32.mrf.mxu1 }
 0xedd   :  { %v23245_v49 = vpop.f32.mrf.mxu1 }
 0xedf   :  { %v10600_v55 = vpop.f32.mrf.mxu0  ;;  %v10970_v22 = vpop.f32.mrf.mxu1 }
 0xee0   :  { %v10677_v10 = vadd.f32 %v10676_v45, %v10600_v55 }
 0xee1   :  { %v23230_v4 = vpop.f32.mrf.mxu0  ;;  %v23255_v1 = vpop.f32.mrf.mxu1 }
 0xee3   :  { %v10750_v20 = vpop.f32.mrf.mxu0  ;;  %v11128_v52 = vpop.f32.mrf.mxu1 }
 0xee4   :  { %v10751_v23 = vadd.f32 %v10750_v20, %v10677_v10  ;;  %v11429_v20 = vpop.permute.xlu1 %11428 }
 0xee5   :  { %v23240_v26 = vpop.f32.mrf.mxu0  ;;  %v23265_v31 = vpop.f32.mrf.mxu1 }
 0xee6   :  { %v10825_v28 = vadd.f32 %v10824_v48, %v10751_v23  ;;  %v11609_v48 = vand.u32 4294901760, %v11608_v18  ;;  %v11431_v31 = vpop.permute.xlu0 %11430 }
 0xee7   :  { %v10898_v33 = vpop.f32.mrf.mxu0  ;;  %v11276_v36 = vpop.f32.mrf.mxu1  ;;  %v11451_v39 = vsel %vm1534_vm2, %v25100_v32, %v11431_v31  ;;  %v12010_v31 = vld [vmem:[%s26542_s10 + $0x10] sm:$0xff] }
 0xee8   :  { %v10899_v38 = vadd.f32 %v10898_v33, %v10825_v28  ;;  %23303 = vmatprep.subr.mxu1 %v11609_v48  ;;  %v11437_v46 = vpop.permute.xlu1 %11436 }
 0xee9   :  { %v23250_v41 = vpop.f32.mrf.mxu0  ;;  %v23275_v59 = vpop.f32.mrf.mxu1  ;;  %23304 = vmatpush3.msra.mxu1 %v11609_v48 }
 0xeea   :  { %v10971_v44 = vadd.f32 %v10970_v22, %v10899_v38  ;;  %23319 = vmatprep.subr.mxu1 %v25428_v54 }
 0xeeb   :  { %v11052_v8 = vpop.f32.mrf.mxu0  ;;  %v11422_v7 = vpop.f32.mrf.mxu1 }
 0xeec   :  { %11444 = vrot.lane.b32.xlu1 %v10971_v44, %s24293_s1  ;;  %v11129_v49 = vadd.f32 %v11128_v52, %v11052_v8  ;;  %v11450_v52 = vsel %vm1534_vm2, %v25098_v60, %v11429_v20 }
 0xeed   :  { %v23260_v45 = vpop.f32.mrf.mxu0  ;;  %v23285_v47 = vpop.f32.mrf.mxu1  ;;  %v11453_v23 = vsel %vm11452_vm4, %v11450_v52, %v11437_v46 }
 0xeef   :  { %v11202_v53 = vpop.f32.mrf.mxu0 }
 0xef0   :  { %v11203_v55 = vadd.f32 %v11202_v53, %v11129_v49 }
 0xef1   :  { %v23270_v22 = vpop.f32.mrf.mxu0 }
 0xef2   :  { %v11277_v56 = vadd.f32 %v11276_v36, %v11203_v55  ;;  %v11439_v36 = vpop.permute.xlu0 %11438 }
 0xef3   :  { %v11350_v4 = vpop.f32.mrf.mxu0  ;;  %v11454_v60 = vsel %vm11452_vm4, %v11451_v39, %v11439_v36  ;;  %v21626_v39 = vld [vmem:[%s26541_s9 + $0x1] ss:$0 sm:$0xff] }
 0xef4   :  { %v11351_v1 = vadd.f32 %v11350_v4, %v11277_v56 }
 0xef5   :  { %v23280_v5 = vpop.f32.mrf.mxu0 }
 0xef6   :  { %v11423_v10 = vadd.f32 %v11422_v7, %v11351_v1 }
 0xef8   :  { %11446 = vrot.lane.b32.xlu0 %v11423_v10, %s24293_s1 }
 0xf5e   :  { %v11445_v50 = vpop.permute.xlu1 %11444 }
 0xf5f   :  { %v11456_v26 = vsel %vm11455_vm3, %v11453_v23, %v11445_v50 }
 0xf60   :  { %v11465_v28 = vsel %vm84_vm0, %v11456_v26, 0 }
 0xf61   :  { %v11539_v61 = vand.u32 4294901760, %v11465_v28 }
 0xf63   :  { %v11540_v29 = vsub.f32 %v11465_v28, %v11539_v61  ;;  %23305 = vmatprep.mubr.f32.mxu1 %v11539_v61  ;;  %v25607_v28 = vand.u32 4294901760, %v12010_v31 }
 0xf65   :  { %v11541_v33 = vand.u32 4294901760, %v11540_v29 }
 0xf67   :  { %v11542_v38 = vsub.f32 %v11540_v29, %v11541_v33 }
 0xf69   :  { %v11543_v40 = vand.u32 4294901760, %v11542_v38  ;;  %v12008_v38 = vld [vmem:[%s26542_s10] sm:$0xff] }
 0xf6a   :  { %v11447_v41 = vpop.permute.xlu0 %11446 }
 0xf6b   :  { %v11457_v59 = vsel %vm11455_vm3, %v11454_v60, %v11447_v41  ;;  %23294 = vmatprep.mubr.f32.mxu0 %v11543_v40  ;;  %v25632_v41 = vand.u32 4294901760, %v12008_v38 }
 0xf6c   :  { %v11468_v44 = vsel %vm84_vm0, %v11457_v59, 0 }
 0xf6d   :  { %v11549_v3 = vand.u32 4294901760, %v11468_v44 }
 0xf6f   :  { %v11550_v8 = vsub.f32 %v11468_v44, %v11549_v3  ;;  %23306 = vmatmul.mubr.f32.vlgmr.msra.gmra.mxu1 %v11549_v3 }
 0xf70   :  { %23320 = vmatpush3.msra.mxu1 %v25428_v54  ;;  %23327 = vmatprep.mubr.f32.mxu1 %v11541_v33  ;;  %v25613_v33 = vsub.f32 %v12010_v31, %v25607_v28 }
 0xf71   :  { %v11551_v7 = vand.u32 4294901760, %v11550_v8  ;;  %23321 = vmatprep.subr.mxu1 %v25436_v58 }
 0xf72   :  { %23322 = vmatpush3.msra.mxu1 %v25436_v58  ;;  %v25626_v40 = vand.u32 4294901760, %v25613_v33 }
 0xf73   :  { %v11552_v32 = vsub.f32 %v11550_v8, %v11551_v7  ;;  %23323 = vmatprep.subr.mxu1 %v25449_v17 }
 0xf74   :  { %23324 = vmatpush3.msra.mxu1 %v25449_v17 }
 0xf75   :  { %v11553_v18 = vand.u32 4294901760, %v11552_v32  ;;  %23325 = vmatprep.subr.mxu1 %v25465_v14  ;;  %v25641_v32 = vsub.f32 %v12008_v38, %v25632_v41 }
 0xf76   :  { %23326 = vmatpush3.msra.mxu1 %v25465_v14 }
 0xf77   :  { %23328 = vmatmul.mubr.f32.vlgmr.msra.gmra.mxu1 %v11551_v7  ;;  %23341 = vmatprep.subr.mxu1 %v25428_v54 }
 0xf78   :  { %23295 = vmatmul.mubr.f32.vlgmr.msra.gmra.mxu0 %v11553_v18  ;;  %23342 = vmatpush3.msra.mxu1 %v25428_v54  ;;  %v12015_v54 = vld [vmem:[%s26542_s10 + $0x38] sm:$0xff] }
 0xf79   :  { %23309 = vmatpush3.msra.mxu0 %v25434_v57  ;;  %23349 = vmatprep.mubr.f32.mxu1 %v11539_v61  ;;  %v12014_v57 = vld [vmem:[%s26542_s10 + $0x30] sm:$0xff] }
 0xf7a   :  { %23310 = vmatprep.subr.mxu0 %v25447_v16  ;;  %23316 = vmatprep.mubr.f32.mxu0 %v11540_v29 }
 0xf7b   :  { %23343 = vmatprep.subr.mxu1 %v25436_v58  ;;  %23311 = vmatpush3.msra.mxu0 %v25447_v16  ;;  %v25540_v16 = vand.u32 4294901760, %v12014_v57 }
 0xf7c   :  { %23344 = vmatpush3.msra.mxu1 %v25436_v58  ;;  %23312 = vmatprep.subr.mxu0 %v25462_v6  ;;  %v12013_v58 = vld [vmem:[%s26542_s10 + $0x28] sm:$0xff] }
 0xf7d   :  { %23345 = vmatprep.subr.mxu1 %v25449_v17  ;;  %23313 = vmatpush3.msra.mxu0 %v25462_v6  ;;  %v12011_v6 = vld [vmem:[%s26542_s10 + $0x18] sm:$0xff] }
 0xf7e   :  { %23346 = vmatpush3.msra.mxu1 %v25449_v17  ;;  %23314 = vmatprep.subr.mxu0 %v25474_v37  ;;  %v25542_v17 = vand.u32 4294901760, %v12013_v58 }
 0xf7f   :  { %23347 = vmatprep.subr.mxu1 %v25465_v14  ;;  %23315 = vmatpush3.msra.mxu0 %v25474_v37 }
 0xf80   :  { %23348 = vmatpush3.msra.mxu1 %v25465_v14  ;;  %23317 = vmatmul.mubr.f32.vlgmr.msra.gmra.mxu0 %v11550_v8  ;;  %v25561_v45 = vsub.f32 %v12013_v58, %v25542_v17 }
 0xf81   :  { %23330 = vmatprep.subr.mxu0 %v25444_v11  ;;  %23350 = vmatmul.mubr.f32.vlgmr.msra.gmra.mxu1 %v11549_v3 }
 0xf82   :  { %23331 = vmatpush3.msra.mxu0 %v25444_v11  ;;  %23338 = vmatprep.mubr.f32.mxu0 %v11539_v61  ;;  %v25538_v11 = vand.u32 4294901760, %v12015_v54  ;;  %v25578_v55 = vand.u32 4294901760, %v25561_v45  ;;  %v12009_v61 = vld [vmem:[%s26542_s10 + $0x8] sm:$0xff] }
 0xf83   :  { %23332 = vmatprep.subr.mxu0 %v25459_v24  ;;  %v25615_v36 = vand.u32 4294901760, %v12009_v61 }
 0xf84   :  { %23333 = vmatpush3.msra.mxu0 %v25459_v24  ;;  %v12012_v24 = vld [vmem:[%s26542_s10 + $0x20] sm:$0xff]  ;;  %v25555_v37 = vsub.f32 %v12015_v54, %v25538_v11  ;;  %v12157_v1 = vsub.f32 %v25561_v45, %v25578_v55  ;;  %s24294_s10 = smov 32  }
 0xf85   :  { %23334 = vmatprep.subr.mxu0 %v25471_v30  ;;  %v25550_v14 = vand.u32 4294901760, %v12012_v24  ;;  %v25629_v60 = vsub.f32 %v12009_v61, %v25615_v36 }
 0xf86   :  { %23335 = vmatpush3.msra.mxu0 %v25471_v30  ;;  %v25552_v30 = vand.u32 4294901760, %v12011_v6  ;;  %v25572_v49 = vand.u32 4294901760, %v25555_v37  ;;  %v12158_v52 = vand.u32 4294901760, %v12157_v1 }
 0xf87   :  { %23336 = vmatprep.subr.mxu0 %v25481_v62  ;;  %v25565_v47 = vsub.f32 %v12012_v24, %v25550_v14  ;;  %v25638_v8 = vand.u32 4294901760, %v25629_v60  ;;  %v25648_v24 = vand.u32 4294901760, %v25641_v32 }
 0xf88   :  { %23337 = vmatpush3.msra.mxu0 %v25481_v62  ;;  %v25558_v62 = vsub.f32 %v12014_v57, %v25540_v16  ;;  %v25568_v48 = vsub.f32 %v12011_v6, %v25552_v30  ;;  %v12143_v56 = vsub.f32 %v25555_v37, %v25572_v49 }
 0xf89   :  { %23339 = vmatmul.mubr.f32.vlgmr.msra.gmra.mxu0 %v11549_v3  ;;  %23352 = vmatprep.subr.mxu0 %v25538_v11  ;;  %v25582_v22 = vand.u32 4294901760, %v25565_v47  ;;  %v12178_v3 = vsub.f32 %v25613_v33, %v25626_v40  ;;  %v12185_v54 = vsub.f32 %v25629_v60, %v25638_v8  ;;  %v12192_v1 = vsub.f32 %v25641_v32, %v25648_v24 }
 0xf8a   :  { %23353 = vmatpush3.msra.mxu0 %v25538_v11  ;;  %v25575_v53 = vand.u32 4294901760, %v25558_v62  ;;  %v25592_v5 = vand.u32 4294901760, %v25568_v48  ;;  %v12144_v10 = vand.u32 4294901760, %v12143_v56 }
 0xf8b   :  { %23354 = vmatprep.subr.mxu0 %v25540_v16  ;;  %v12164_v46 = vsub.f32 %v25565_v47, %v25582_v22  ;;  %v12179_v18 = vand.u32 4294901760, %v12178_v3  ;;  %v12186_v56 = vand.u32 4294901760, %v12185_v54  ;;  %v24233_v54 = vld [vmem:[%s26541_s9] ss:$0 sm:$0xff] }
 0xf8c   :  { %23355 = vmatpush3.msra.mxu0 %v25540_v16  ;;  %v12150_v4 = vsub.f32 %v25558_v62, %v25575_v53  ;;  %23371 = vmatprep.subr.mxu1 %v12144_v10  ;;  %v12171_v23 = vsub.f32 %v25568_v48, %v25592_v5 }
 0xf8d   :  { %23356 = vmatprep.subr.mxu0 %v25542_v17  ;;  %23372 = vmatpush3.msra.mxu1 %v12144_v10  ;;  %v12165_v50 = vand.u32 4294901760, %v12164_v46 }
 0xf8e   :  { %23357 = vmatpush3.msra.mxu0 %v25542_v17  ;;  %v12151_v20 = vand.u32 4294901760, %v12150_v4  ;;  %v12172_v26 = vand.u32 4294901760, %v12171_v23  ;;  %v12193_v23 = vand.u32 4294901760, %v12192_v1 }
 0xf8f   :  { %23358 = vmatprep.subr.mxu0 %v25550_v14 }
 0xf90   :  { %23359 = vmatpush3.msra.mxu0 %v25550_v14  ;;  %23373 = vmatprep.subr.mxu1 %v12151_v20 }
 0xf91   :  { %23360 = vmatprep.subr.mxu0 %v25552_v30  ;;  %23374 = vmatpush3.msra.mxu1 %v12151_v20 }
 0xf92   :  { %23361 = vmatpush3.msra.mxu0 %v25552_v30  ;;  %23375 = vmatprep.subr.mxu1 %v12158_v52 }
 0xf93   :  { %23376 = vmatpush3.msra.mxu1 %v12158_v52  ;;  %23362 = vmatprep.subr.mxu0 %v25607_v28 }
 0xf94   :  { %23377 = vmatprep.subr.mxu1 %v12165_v50  ;;  %23363 = vmatpush3.msra.mxu0 %v25607_v28 }
 0xf95   :  { %23378 = vmatpush3.msra.mxu1 %v12165_v50  ;;  %23364 = vmatprep.subr.mxu0 %v25615_v36 }
 0xf96   :  { %23379 = vmatprep.subr.mxu1 %v12172_v26  ;;  %23365 = vmatpush3.msra.mxu0 %v25615_v36 }
 0xf97   :  { %23380 = vmatpush3.msra.mxu1 %v12172_v26  ;;  %23366 = vmatprep.subr.mxu0 %v25632_v41 }
 0xf98   :  { %23367 = vmatpush3.msra.mxu0 %v25632_v41  ;;  %23381 = vmatprep.subr.mxu1 %v12179_v18 }
 0xf99   :  { %23390 = vmatprep.subr.mxu0 %v25555_v37  ;;  %23382 = vmatpush3.msra.mxu1 %v12179_v18 }
 0xf9a   :  { %23383 = vmatprep.subr.mxu1 %v12186_v56 }
 0xf9b   :  { %23384 = vmatpush3.msra.mxu1 %v12186_v56 }
 0xf9c   :  { %23385 = vmatprep.subr.mxu1 %v12193_v23 }
 0xf9d   :  { %23386 = vmatpush3.msra.mxu1 %v12193_v23 }
 0xf9e   :  { %23409 = vmatprep.subr.mxu1 %v25538_v11 }
0x102f   :  { %v23307_v59 = vpop.f32.mrf.mxu1 }
0x1031   :  { %v11646_v6 = vpop.f32.mrf.mxu1 }
0x1037   :  { %v23329_v10 = vpop.f32.mrf.mxu1 }
0x1038   :  { %v23296_v29 = vpop.f32.mrf.mxu0 }
0x1039   :  { %v11556_v7 = vadd.f32 %v23296_v29, %v21626_v39  ;;  %v11816_v26 = vpop.f32.mrf.mxu1 }
0x103a   :  { %v11545_v44 = vpop.f32.mrf.mxu0 }
0x103b   :  { %v11546_v57 = vadd.f32 %v21626_v39, %v11545_v44  ;;  %v11653_v4 = vadd.f32 %v23307_v59, %v11556_v7 }
0x103d   :  { %v11647_v52 = vadd.f32 %v11646_v6, %v11546_v57  ;;  %v2549_v57 = vadd.f32 %v24233_v54, %v24880_v42 }
0x1040   :  { %v23318_v58 = vpop.f32.mrf.mxu0 }
0x1041   :  { %v11740_v46 = vadd.f32 %v23318_v58, %v11653_v4  ;;  %v23351_v61 = vpop.f32.mrf.mxu1  ;;  %v2650_v58 = vadd.f32 %v24882_v43, %v2549_v57 }
0x1042   :  { %v11732_v20 = vpop.f32.mrf.mxu0 }
0x1043   :  { %v11733_v50 = vadd.f32 %v11732_v20, %v11647_v52  ;;  %v11825_v31 = vadd.f32 %v23329_v10, %v11740_v46  ;;  %v11988_v7 = vpop.f32.mrf.mxu1  ;;  %v2736_v6 = vadd.f32 %v24884_v0, %v2650_v58 }
0x1045   :  { %v11817_v39 = vadd.f32 %v11816_v26, %v11733_v50  ;;  %v2820_v56 = vadd.f32 %v24886_v63, %v2736_v6 }
0x1047   :  { %v2911_v4 = vadd.f32 %v24890_v2, %v2820_v56 }
0x1049   :  { %v23340_v29 = vpop.f32.mrf.mxu0  ;;  %v2992_v10 = vadd.f32 %v24892_v12, %v2911_v4 }
0x104a   :  { %v11914_v38 = vadd.f32 %v23340_v29, %v11825_v31 }
0x104b   :  { %v11907_v59 = vpop.f32.mrf.mxu0 }
0x104c   :  { %v11995_v44 = vadd.f32 %v23351_v61, %v11914_v38  ;;  %v11908_v3 = vadd.f32 %v11907_v59, %v11817_v39  ;;  %v13152_v59 = vld [vmem:[#allocation4 + $0x20] sm:$0xff] }
0x104e   :  { %v11989_v18 = vadd.f32 %v11988_v7, %v11908_v3  ;;  %12002 = vrot.lane.b32.xlu0 %v11995_v44, %s24294_s10 }
0x1050   :  { %12000 = vrot.lane.b32.xlu1 %v11989_v18, %s24294_s10  ;;  %v25815_v18 = vand.u32 4294901760, %v13152_v59 }
0x1052   :  { %v25826_v58 = vsub.f32 %v13152_v59, %v25815_v18 }
0x10c0   :  { %v12003_v1 = vpop.permute.xlu0 %12002 }
0x10c1   :  { %v12007_v20 = vsel %vm84_vm0, %v24888_v9, %v12003_v1 }
0x10c2   :  { %v12028_v46 = vsel %vm12023_vm5, %v12007_v20, 0  ;;  %v12001_v52 = vpop.permute.xlu1 %12000 }
0x10c3   :  { %v25665_v23 = vand.u32 4294901760, %v12028_v46  ;;  %v12006_v42 = vsel %vm84_vm0, %v2992_v10, %v12001_v52 }
0x10c4   :  { %v12025_v43 = vsel %vm12023_vm5, %v12006_v42, 0 }
0x10c5   :  { %v12114_v0 = vsub.f32 %v12028_v46, %v25665_v23  ;;  %v12103_v50 = vand.u32 4294901760, %v12025_v43  ;;  %v21627_v46 = vld [vmem:[%s26543_s11] ss:$0 sm:$0xff] }
0x10c7   :  { %v12115_v63 = vand.u32 4294901760, %v12114_v0  ;;  %v12104_v26 = vsub.f32 %v12025_v43, %v12103_v50  ;;  %23387 = vmatprep.mubr.f32.mxu1 %v12103_v50 }
0x10c8   :  { %23388 = vmatmul.mubr.f32.vlgmr.msra.gmra.mxu1 %v25665_v23 }
0x10c9   :  { %23410 = vmatpush3.msra.mxu1 %v25538_v11  ;;  %v12105_v2 = vand.u32 4294901760, %v12104_v26  ;;  %v12116_v12 = vsub.f32 %v12114_v0, %v12115_v63 }
0x10ca   :  { %23411 = vmatprep.subr.mxu1 %v25540_v16 }
0x10cb   :  { %23412 = vmatpush3.msra.mxu1 %v25540_v16  ;;  %23425 = vmatprep.mubr.f32.mxu1 %v12105_v2  ;;  %v12106_v9 = vsub.f32 %v12104_v26, %v12105_v2  ;;  %v12117_v61 = vand.u32 4294901760, %v12116_v12 }
0x10cc   :  { %23413 = vmatprep.subr.mxu1 %v25542_v17 }
0x10cd   :  { %23414 = vmatpush3.msra.mxu1 %v25542_v17  ;;  %v12107_v31 = vand.u32 4294901760, %v12106_v9 }
0x10ce   :  { %23415 = vmatprep.subr.mxu1 %v25550_v14 }
0x10cf   :  { %23416 = vmatpush3.msra.mxu1 %v25550_v14  ;;  %23368 = vmatprep.mubr.f32.mxu0 %v12107_v31 }
0x10d0   :  { %23417 = vmatprep.subr.mxu1 %v25552_v30  ;;  %23369 = vmatmul.mubr.f32.vlgmr.msra.gmra.mxu0 %v12117_v61 }
0x10d1   :  { %23391 = vmatpush3.msra.mxu0 %v25555_v37  ;;  %23418 = vmatpush3.msra.mxu1 %v25552_v30 }
0x10d2   :  { %23392 = vmatprep.subr.mxu0 %v25558_v62  ;;  %23406 = vmatprep.mubr.f32.mxu0 %v12104_v26 }
0x10d3   :  { %23419 = vmatprep.subr.mxu1 %v25607_v28  ;;  %23393 = vmatpush3.msra.mxu0 %v25558_v62 }
0x10d4   :  { %23420 = vmatpush3.msra.mxu1 %v25607_v28  ;;  %23394 = vmatprep.subr.mxu0 %v25561_v45 }
0x10d5   :  { %23421 = vmatprep.subr.mxu1 %v25615_v36  ;;  %23395 = vmatpush3.msra.mxu0 %v25561_v45 }
0x10d6   :  { %23422 = vmatpush3.msra.mxu1 %v25615_v36  ;;  %23396 = vmatprep.subr.mxu0 %v25565_v47 }
0x10d7   :  { %23423 = vmatprep.subr.mxu1 %v25632_v41  ;;  %23397 = vmatpush3.msra.mxu0 %v25565_v47  ;;  %v21628_v47 = vld [vmem:[%s26536_s4 + $0x20] sm:$0xff] }
0x10d8   :  { %23424 = vmatpush3.msra.mxu1 %v25632_v41  ;;  %23398 = vmatprep.subr.mxu0 %v25568_v48 }
0x10d9   :  { %23426 = vmatmul.mubr.f32.vlgmr.msra.gmra.mxu1 %v12115_v63  ;;  %23447 = vmatprep.subr.mxu1 %v25538_v11 }
0x10da   :  { %23399 = vmatpush3.msra.mxu0 %v25568_v48  ;;  %23448 = vmatpush3.msra.mxu1 %v25538_v11  ;;  %v21631_v11 = vld [vmem:[%s26536_s4 + $0x38] sm:$0xff] }
0x10db   :  { %23463 = vmatprep.mubr.f32.mxu1 %v12103_v50  ;;  %23400 = vmatprep.subr.mxu0 %v25613_v33 }
0x10dc   :  { %23449 = vmatprep.subr.mxu1 %v25540_v16  ;;  %23401 = vmatpush3.msra.mxu0 %v25613_v33 }
0x10dd   :  { %23450 = vmatpush3.msra.mxu1 %v25540_v16  ;;  %23402 = vmatprep.subr.mxu0 %v25629_v60  ;;  %v25739_v16 = vand.u32 4294901760, %v21631_v11 }
0x10de   :  { %23451 = vmatprep.subr.mxu1 %v25542_v17  ;;  %23403 = vmatpush3.msra.mxu0 %v25629_v60 }
0x10df   :  { %23452 = vmatpush3.msra.mxu1 %v25542_v17  ;;  %23404 = vmatprep.subr.mxu0 %v25641_v32  ;;  %v21630_v17 = vld [vmem:[%s26536_s4 + $0x30] sm:$0xff] }
0x10e0   :  { %23453 = vmatprep.subr.mxu1 %v25550_v14  ;;  %23405 = vmatpush3.msra.mxu0 %v25641_v32 }
0x10e1   :  { %23454 = vmatpush3.msra.mxu1 %v25550_v14  ;;  %23407 = vmatmul.mubr.f32.vlgmr.msra.gmra.mxu0 %v12114_v0  ;;  %v25745_v14 = vand.u32 4294901760, %v21630_v17 }
0x10e2   :  { %23428 = vmatprep.subr.mxu0 %v25572_v49  ;;  %23455 = vmatprep.subr.mxu1 %v25552_v30 }
0x10e3   :  { %23429 = vmatpush3.msra.mxu0 %v25572_v49  ;;  %23444 = vmatprep.mubr.f32.mxu0 %v12103_v50  ;;  %v12745_v45 = vsub.f32 %v21630_v17, %v25745_v14 }
0x10e4   :  { %23456 = vmatpush3.msra.mxu1 %v25552_v30  ;;  %23430 = vmatprep.subr.mxu0 %v25575_v53  ;;  %v12738_v30 = vsub.f32 %v21631_v11, %v25739_v16 }
0x10e5   :  { %23457 = vmatprep.subr.mxu1 %v25607_v28  ;;  %23431 = vmatpush3.msra.mxu0 %v25575_v53  ;;  %v12746_v49 = vand.u32 4294901760, %v12745_v45  ;;  %v25761_v53 = vand.u32 4294901760, %v21628_v47 }
0x10e6   :  { %23458 = vmatpush3.msra.mxu1 %v25607_v28  ;;  %23432 = vmatprep.subr.mxu0 %v25578_v55  ;;  %v12739_v37 = vand.u32 4294901760, %v12738_v30 }
0x10e7   :  { %23459 = vmatprep.subr.mxu1 %v25615_v36  ;;  %23433 = vmatpush3.msra.mxu0 %v25578_v55  ;;  %v12759_v33 = vsub.f32 %v21628_v47, %v25761_v53 }
0x10e8   :  { %23460 = vmatpush3.msra.mxu1 %v25615_v36  ;;  %23434 = vmatprep.subr.mxu0 %v25582_v22  ;;  %v12740_v48 = vsub.f32 %v12738_v30, %v12739_v37 }
0x10e9   :  { %23461 = vmatprep.subr.mxu1 %v25632_v41  ;;  %23435 = vmatpush3.msra.mxu0 %v25582_v22  ;;  %v12760_v60 = vand.u32 4294901760, %v12759_v33 }
0x10ea   :  { %23462 = vmatpush3.msra.mxu1 %v25632_v41  ;;  %23436 = vmatprep.subr.mxu0 %v25592_v5  ;;  %v12741_v22 = vand.u32 4294901760, %v12740_v48 }
0x10eb   :  { %23464 = vmatmul.mubr.f32.vlgmr.msra.gmra.mxu1 %v25665_v23  ;;  %23437 = vmatpush3.msra.mxu0 %v25592_v5  ;;  %v12747_v5 = vsub.f32 %v12745_v45, %v12746_v49 }
0x10ec   :  { %23438 = vmatprep.subr.mxu0 %v25626_v40  ;;  %23485 = vmatprep.mubr.f32.mxu1 %v24386_v13 }
0x10ed   :  { %23439 = vmatpush3.msra.mxu0 %v25626_v40  ;;  %23477 = vmatprep.subr.mxu1 %v12741_v22  ;;  %v12748_v36 = vand.u32 4294901760, %v12747_v5 }
0x10ee   :  { %23440 = vmatprep.subr.mxu0 %v25638_v8  ;;  %23478 = vmatpush3.msra.mxu1 %v12741_v22 }
0x10ef   :  { %23441 = vmatpush3.msra.mxu0 %v25638_v8  ;;  %23479 = vmatprep.subr.mxu1 %v12748_v36  ;;  %v12761_v8 = vsub.f32 %v12759_v33, %v12760_v60 }
0x10f0   :  { %23442 = vmatprep.subr.mxu0 %v25648_v24  ;;  %23480 = vmatpush3.msra.mxu1 %v12748_v36 }
0x10f1   :  { %23443 = vmatpush3.msra.mxu0 %v25648_v24  ;;  %v12762_v32 = vand.u32 4294901760, %v12761_v8 }
0x10f2   :  { %23445 = vmatmul.mubr.f32.vlgmr.msra.gmra.mxu0 %v25665_v23  ;;  %23466 = vmatprep.subr.mxu0 %v25739_v16 }
0x10f3   :  { %23474 = vmatprep.mubr.f32.mxu0 %v24417_v34  ;;  %23467 = vmatpush3.msra.mxu0 %v25739_v16  ;;  %v21629_v34 = vld [vmem:[%s26536_s4 + $0x28] sm:$0xff] }
0x10f4   :  { %23468 = vmatprep.subr.mxu0 %v25745_v14  ;;  %v25753_v62 = vand.u32 4294901760, %v21629_v34 }
0x10f5   :  { %23469 = vmatpush3.msra.mxu0 %v25745_v14 }
0x10f6   :  { %23470 = vmatprep.subr.mxu0 %v25753_v62  ;;  %v12752_v55 = vsub.f32 %v21629_v34, %v25753_v62 }
0x10f7   :  { %23471 = vmatpush3.msra.mxu0 %v25753_v62 }
0x10f8   :  { %23472 = vmatprep.subr.mxu0 %v25761_v53  ;;  %v12753_v28 = vand.u32 4294901760, %v12752_v55 }
0x10f9   :  { %23473 = vmatpush3.msra.mxu0 %v25761_v53 }
0x10fa   :  { %v12754_v40 = vsub.f32 %v12752_v55, %v12753_v28  ;;  %23488 = vmatprep.subr.mxu0 %v12738_v30  ;;  %23475 = vmatmul.mubr.f32.vlgmr.msra.gmra.mxu0 %v24419_v35 }
0x10fb   :  { %23489 = vmatpush3.msra.mxu0 %v12738_v30  ;;  %23496 = vmatprep.mubr.f32.mxu0 %v24396_v19  ;;  %v13155_v19 = vld [vmem:[#allocation4 + $0x38] sm:$0xff] }
0x10fc   :  { %v12755_v41 = vand.u32 4294901760, %v12754_v40  ;;  %23490 = vmatprep.subr.mxu0 %v12745_v45  ;;  %v25784_v35 = vand.u32 4294901760, %v13155_v19 }
0x10fd   :  { %23491 = vmatpush3.msra.mxu0 %v12745_v45 }
0x10fe   :  { %23481 = vmatprep.subr.mxu1 %v12755_v41  ;;  %23492 = vmatprep.subr.mxu0 %v12752_v55 }
0x10ff   :  { %23482 = vmatpush3.msra.mxu1 %v12755_v41  ;;  %23493 = vmatpush3.msra.mxu0 %v12752_v55 }
0x1100   :  { %23483 = vmatprep.subr.mxu1 %v12762_v32  ;;  %23494 = vmatprep.subr.mxu0 %v12759_v33 }
0x1101   :  { %23484 = vmatpush3.msra.mxu1 %v12762_v32  ;;  %23495 = vmatpush3.msra.mxu0 %v12759_v33  ;;  %v21633_v32 = vld [vmem:[%s26537_s5 + $0x1] ss:$0 sm:$0xff] }
0x1102   :  { %23499 = vmatprep.subr.mxu1 %v25739_v16  ;;  %23486 = vmatmul.mubr.f32.vlgmr.msra.gmra.mxu1 %v24389_v15 }
0x1103   :  { %23500 = vmatpush3.msra.mxu1 %v25739_v16  ;;  %23510 = vmatprep.subr.mxu0 %v12739_v37 }
0x1104   :  { %23501 = vmatprep.subr.mxu1 %v25745_v14  ;;  %23497 = vmatmul.mubr.f32.vlgmr.msra.gmra.mxu0 %v24399_v21  ;;  %v13154_v21 = vld [vmem:[#allocation4 + $0x30] sm:$0xff] }
0x1105   :  { %23502 = vmatpush3.msra.mxu1 %v25745_v14  ;;  %23511 = vmatpush3.msra.mxu0 %v12739_v37  ;;  %v25791_v24 = vand.u32 4294901760, %v13154_v21 }
0x1106   :  { %23503 = vmatprep.subr.mxu1 %v25753_v62  ;;  %23507 = vmatprep.mubr.f32.mxu1 %v24405_v25  ;;  %v25789_v25 = vsub.f32 %v13155_v19, %v25784_v35 }
0x1107   :  { %23504 = vmatpush3.msra.mxu1 %v25753_v62  ;;  %23512 = vmatprep.subr.mxu0 %v12746_v49  ;;  %v25799_v38 = vsub.f32 %v13154_v21, %v25791_v24 }
0x1108   :  { %23505 = vmatprep.subr.mxu1 %v25761_v53  ;;  %23513 = vmatpush3.msra.mxu0 %v12746_v49  ;;  %v25796_v29 = vand.u32 4294901760, %v25789_v25 }
0x1109   :  { %23506 = vmatpush3.msra.mxu1 %v25761_v53  ;;  %23514 = vmatprep.subr.mxu0 %v12753_v28  ;;  %v25810_v3 = vand.u32 4294901760, %v25799_v38 }
0x110a   :  { %23521 = vmatprep.subr.mxu1 %v25739_v16  ;;  %23508 = vmatmul.mubr.f32.vlgmr.msra.gmra.mxu1 %v24408_v27  ;;  %v13153_v27 = vld [vmem:[#allocation4 + $0x28] sm:$0xff]  ;;  %v13287_v44 = vsub.f32 %v25789_v25, %v25796_v29 }
0x110b   :  { %23522 = vmatpush3.msra.mxu1 %v25739_v16  ;;  %23515 = vmatpush3.msra.mxu0 %v12753_v28  ;;  %v25801_v39 = vand.u32 4294901760, %v13153_v27 }
0x110c   :  { %23523 = vmatprep.subr.mxu1 %v25745_v14  ;;  %23516 = vmatprep.subr.mxu0 %v12760_v60  ;;  %v13288_v54 = vand.u32 4294901760, %v13287_v44 }
0x110d   :  { %23524 = vmatpush3.msra.mxu1 %v25745_v14  ;;  %23517 = vmatpush3.msra.mxu0 %v12760_v60  ;;  %v25813_v7 = vsub.f32 %v13153_v27, %v25801_v39 }
0x110e   :  { %23525 = vmatprep.subr.mxu1 %v25753_v62  ;;  %23518 = vmatprep.mubr.f32.mxu0 %v24386_v13 }
0x110f   :  { %23526 = vmatpush3.msra.mxu1 %v25753_v62  ;;  %23519 = vmatmul.mubr.f32.vlgmr.msra.gmra.mxu0 %v24389_v15  ;;  %v25823_v57 = vand.u32 4294901760, %v25813_v7 }
0x1110   :  { %23527 = vmatprep.subr.mxu1 %v25761_v53  ;;  %23529 = vmatprep.mubr.f32.mxu1 %v24386_v13  ;;  %v13294_v13 = vsub.f32 %v25799_v38, %v25810_v3 }
0x1111   :  { %23528 = vmatpush3.msra.mxu1 %v25761_v53  ;;  %23532 = vmatprep.subr.mxu0 %v25784_v35  ;;  %v13301_v56 = vsub.f32 %v25813_v7, %v25823_v57 }
0x1112   :  { %23530 = vmatmul.mubr.f32.vlgmr.msra.gmra.mxu1 %v24389_v15  ;;  %23533 = vmatpush3.msra.mxu0 %v25784_v35  ;;  %v13295_v6 = vand.u32 4294901760, %v13294_v13  ;;  %v25833_v15 = vand.u32 4294901760, %v25826_v58 }
0x1113   :  { %23534 = vmatprep.subr.mxu0 %v25791_v24  ;;  %23543 = vmatprep.subr.mxu1 %v13288_v54  ;;  %v13302_v4 = vand.u32 4294901760, %v13301_v56 }
0x1114   :  { %23535 = vmatpush3.msra.mxu0 %v25791_v24  ;;  %23544 = vmatpush3.msra.mxu1 %v13288_v54  ;;  %v13308_v1 = vsub.f32 %v25826_v58, %v25833_v15 }
0x1115   :  { %23536 = vmatprep.subr.mxu0 %v25801_v39  ;;  %23545 = vmatprep.subr.mxu1 %v13295_v6 }
0x1116   :  { %23537 = vmatpush3.msra.mxu0 %v25801_v39  ;;  %23546 = vmatpush3.msra.mxu1 %v13295_v6  ;;  %v13309_v10 = vand.u32 4294901760, %v13308_v1 }
0x1117   :  { %23538 = vmatprep.subr.mxu0 %v25815_v18  ;;  %23547 = vmatprep.subr.mxu1 %v13302_v4 }
0x1118   :  { %23539 = vmatpush3.msra.mxu0 %v25815_v18  ;;  %23548 = vmatpush3.msra.mxu1 %v13302_v4  ;;  %v21635_v4 = vld [vmem:[%s26539_s7 + $0x1] ss:$0 sm:$0xff] }
0x1119   :  { %23554 = vmatprep.subr.mxu0 %v25789_v25  ;;  %23549 = vmatprep.subr.mxu1 %v13309_v10 }
0x111a   :  { %23550 = vmatpush3.msra.mxu1 %v13309_v10 }
0x111b   :  { %23565 = vmatprep.subr.mxu1 %v25784_v35 }
0x1188   :  { %v23389_v52 = vpop.f32.mrf.mxu1 }
0x118a   :  { %v12230_v50 = vpop.f32.mrf.mxu1 }
0x1190   :  { %v23370_v20 = vpop.f32.mrf.mxu0 }
0x1191   :  { %v12120_v42 = vadd.f32 %v23370_v20, %v21627_v46 }
0x1192   :  { %v12109_v23 = vpop.f32.mrf.mxu0 }
0x1193   :  { %v12110_v0 = vadd.f32 %v21627_v46, %v12109_v23  ;;  %v12237_v63 = vadd.f32 %v23389_v52, %v12120_v42 }
0x1195   :  { %v12231_v9 = vadd.f32 %v12230_v50, %v12110_v0 }
0x1199   :  { %v23427_v26 = vpop.f32.mrf.mxu1 }
0x119b   :  { %v12412_v61 = vpop.f32.mrf.mxu1 }
0x11a1   :  { %v23408_v43 = vpop.f32.mrf.mxu0 }
0x11a2   :  { %v12332_v12 = vadd.f32 %v23408_v43, %v12237_v63 }
0x11a3   :  { %v12324_v2 = vpop.f32.mrf.mxu0 }
0x11a4   :  { %v12325_v31 = vadd.f32 %v12324_v2, %v12231_v9  ;;  %v12421_v11 = vadd.f32 %v23427_v26, %v12332_v12 }
0x11a6   :  { %v12413_v30 = vadd.f32 %v12412_v61, %v12325_v31 }
0x11ab   :  { %v23465_v16 = vpop.f32.mrf.mxu1 }
0x11ad   :  { %v12600_v45 = vpop.f32.mrf.mxu1 }
0x11b2   :  { %v23446_v17 = vpop.f32.mrf.mxu0 }
0x11b3   :  { %v12522_v14 = vadd.f32 %v23446_v17, %v12421_v11 }
0x11b4   :  { %v12515_v34 = vpop.f32.mrf.mxu0 }
0x11b5   :  { %v12607_v37 = vadd.f32 %v23465_v16, %v12522_v14  ;;  %v12516_v62 = vadd.f32 %v12515_v34, %v12413_v30 }
0x11b7   :  { %v13168_v47 = vsel %vm84_vm0, %v12607_v37, 0  ;;  %v12601_v48 = vadd.f32 %v12600_v45, %v12516_v62 }
0x11b8   :  { %v13249_v49 = vand.u32 4294901760, %v13168_v47 }
0x11b9   :  { %v13165_v53 = vsel %vm84_vm0, %v12601_v48, 0 }
0x11ba   :  { %v13250_v55 = vsub.f32 %v13168_v47, %v13249_v49  ;;  %v13239_v22 = vand.u32 4294901760, %v13165_v53  ;;  %v23476_v8 = vpop.f32.mrf.mxu0 }
0x11bc   :  { %v13251_v5 = vand.u32 4294901760, %v13250_v55  ;;  %v13240_v28 = vsub.f32 %v13165_v53, %v13239_v22  ;;  %23551 = vmatprep.mubr.f32.mxu1 %v13239_v22  ;;  %v12698_v19 = vpop.f32.mrf.mxu0 }
0x11bd   :  { %23552 = vmatmul.mubr.f32.vlgmr.msra.gmra.mxu1 %v13249_v49  ;;  %v12699_v21 = vadd.f32 %v21633_v32, %v12698_v19 }
0x11be   :  { %23566 = vmatpush3.msra.mxu1 %v25784_v35  ;;  %v13241_v33 = vand.u32 4294901760, %v13240_v28  ;;  %v13252_v36 = vsub.f32 %v13250_v55, %v13251_v5 }
0x11bf   :  { %23567 = vmatprep.subr.mxu1 %v25791_v24 }
0x11c0   :  { %23568 = vmatpush3.msra.mxu1 %v25791_v24  ;;  %23573 = vmatprep.mubr.f32.mxu1 %v13241_v33  ;;  %v13242_v40 = vsub.f32 %v13240_v28, %v13241_v33  ;;  %v13253_v41 = vand.u32 4294901760, %v13252_v36 }
0x11c1   :  { %23569 = vmatprep.subr.mxu1 %v25801_v39 }
0x11c2   :  { %23570 = vmatpush3.msra.mxu1 %v25801_v39  ;;  %v13243_v60 = vand.u32 4294901760, %v13242_v40 }
0x11c3   :  { %23571 = vmatprep.subr.mxu1 %v25815_v18 }
0x11c4   :  { %23572 = vmatpush3.msra.mxu1 %v25815_v18  ;;  %23540 = vmatprep.mubr.f32.mxu0 %v13243_v60 }
0x11c5   :  { %23574 = vmatmul.mubr.f32.vlgmr.msra.gmra.mxu1 %v13251_v5  ;;  %23587 = vmatprep.subr.mxu1 %v25784_v35 }
0x11c6   :  { %23541 = vmatmul.mubr.f32.vlgmr.msra.gmra.mxu0 %v13253_v41  ;;  %23588 = vmatpush3.msra.mxu1 %v25784_v35  ;;  %v23487_v35 = vpop.f32.mrf.mxu1 }
0x11c7   :  { %23555 = vmatpush3.msra.mxu0 %v25789_v25  ;;  %23595 = vmatprep.mubr.f32.mxu1 %v13239_v22 }
0x11c8   :  { %23556 = vmatprep.subr.mxu0 %v25799_v38  ;;  %23562 = vmatprep.mubr.f32.mxu0 %v13240_v28  ;;  %v12799_v25 = vpop.f32.mrf.mxu1 }
0x11c9   :  { %23589 = vmatprep.subr.mxu1 %v25791_v24  ;;  %23557 = vmatpush3.msra.mxu0 %v25799_v38  ;;  %v12800_v27 = vadd.f32 %v12799_v25, %v12699_v21 }
0x11ca   :  { %23590 = vmatpush3.msra.mxu1 %v25791_v24  ;;  %23558 = vmatprep.subr.mxu0 %v25813_v7  ;;  %v23498_v24 = vpop.f32.mrf.mxu0  ;;  %v23509_v38 = vpop.f32.mrf.mxu1 }
0x11cb   :  { %23591 = vmatprep.subr.mxu1 %v25801_v39  ;;  %23559 = vmatpush3.msra.mxu0 %v25813_v7 }
0x11cc   :  { %23592 = vmatpush3.msra.mxu1 %v25801_v39  ;;  %23560 = vmatprep.subr.mxu0 %v25826_v58  ;;  %v12969_v59 = vpop.f32.mrf.mxu1 }
0x11cd   :  { %23593 = vmatprep.subr.mxu1 %v25815_v18  ;;  %23561 = vmatpush3.msra.mxu0 %v25826_v58 }
0x11ce   :  { %23594 = vmatpush3.msra.mxu1 %v25815_v18  ;;  %23563 = vmatmul.mubr.f32.vlgmr.msra.gmra.mxu0 %v13250_v55 }
0x11cf   :  { %23576 = vmatprep.subr.mxu0 %v25796_v29  ;;  %23596 = vmatmul.mubr.f32.vlgmr.msra.gmra.mxu1 %v13249_v49 }
0x11d0   :  { %23577 = vmatpush3.msra.mxu0 %v25796_v29  ;;  %23584 = vmatprep.mubr.f32.mxu0 %v13239_v22  ;;  %v12885_v29 = vpop.f32.mrf.mxu0 }
0x11d1   :  { %23578 = vmatprep.subr.mxu0 %v25810_v3  ;;  %23603 = vmatprep.subr.mxu1 %v24282_v51  ;;  %v12886_v39 = vadd.f32 %v12885_v29, %v12800_v27 }
0x11d2   :  { %23579 = vmatpush3.msra.mxu0 %v25810_v3  ;;  %23605 = vmatprep.mubr.msk.f32.mxu1 %vm24283_vm1, %v24282_v51  ;;  %v23520_v44 = vpop.f32.mrf.mxu0  ;;  %v12709_v3 = vadd.f32 %v23476_v8, %v21633_v32  ;;  %v23531_v54 = vpop.f32.mrf.mxu1 }
0x11d3   :  { %23580 = vmatprep.subr.mxu0 %v25823_v57  ;;  %v12970_v7 = vadd.f32 %v12969_v59, %v12886_v39 }
0x11d4   :  { %23581 = vmatpush3.msra.mxu0 %v25823_v57  ;;  %v13060_v18 = vpop.f32.mrf.mxu0  ;;  %v12806_v13 = vadd.f32 %v23487_v35, %v12709_v3  ;;  %v13141_v58 = vpop.f32.mrf.mxu1 }
0x11d5   :  { %23582 = vmatprep.subr.mxu0 %v25833_v15  ;;  %v13061_v57 = vadd.f32 %v13060_v18, %v12970_v7 }
0x11d6   :  { %23583 = vmatpush3.msra.mxu0 %v25833_v15  ;;  %v12893_v6 = vadd.f32 %v23498_v24, %v12806_v13 }
0x11d7   :  { %23585 = vmatmul.mubr.f32.vlgmr.msra.gmra.mxu0 %v13249_v49  ;;  %23598 = vmatprep.subr.mxu0 %v24282_v51  ;;  %v13142_v56 = vadd.f32 %v13141_v58, %v13061_v57 }
0x11d8   :  { %23600 = vmatprep.mubr.msk.f32.mxu0 %vm24283_vm1, %v24282_v51  ;;  %v12978_v1 = vadd.f32 %v23509_v38, %v12893_v6 }
0x11d9   :  { %v25891_v10 = vmul.f32 0.35355338, %v13142_v56 }
0x11da   :  { %v13067_v43 = vadd.f32 %v23520_v44, %v12978_v1 }
0x11db   :  { %v13708_v0 = vsel %vm1534_vm2, %v25891_v10, 0 }
0x11dc   :  { %v25895_v12 = vand.u32 4294901760, %v13708_v0  ;;  %v13148_v61 = vadd.f32 %v23531_v54, %v13067_v43 }
0x11de   :  { %v13780_v17 = vsub.f32 %v13708_v0, %v25895_v12  ;;  %v25898_v30 = vmul.f32 0.35355338, %v13148_v61 }
0x11e0   :  { %v13781_v49 = vand.u32 4294901760, %v13780_v17  ;;  %v14160_v53 = vsel %vm1534_vm2, %v25898_v30, 0 }
0x11e1   :  { %v25906_v28 = vand.u32 4294901760, %v14160_v53 }
0x11e2   :  { %v13782_v36 = vsub.f32 %v13780_v17, %v13781_v49 }
0x11e3   :  { %v14232_v8 = vsub.f32 %v14160_v53, %v25906_v28 }
0x11e4   :  { %v13783_v32 = vand.u32 4294901760, %v13782_v36 }
0x11e5   :  { %v14233_v25 = vand.u32 4294901760, %v14232_v8 }
0x11e7   :  { %v14234_v29 = vsub.f32 %v14232_v8, %v14233_v25 }
0x11e9   :  { %v14235_v39 = vand.u32 4294901760, %v14234_v29 }
0x127d   :  { %v23553_v20 = vpop.f32.mrf.mxu1 }
0x127f   :  { %v13346_v50 = vpop.f32.mrf.mxu1 }
0x1285   :  { %v23575_v26 = vpop.f32.mrf.mxu1 }
0x1286   :  { %v23542_v15 = vpop.f32.mrf.mxu0 }
0x1287   :  { %v13256_v52 = vadd.f32 %v23542_v15, %v21635_v4  ;;  %v13516_v16 = vpop.f32.mrf.mxu1 }
0x1288   :  { %v13245_v46 = vpop.f32.mrf.mxu0 }
0x1289   :  { %v13246_v23 = vadd.f32 %v21635_v4, %v13245_v46  ;;  %v13353_v63 = vadd.f32 %v23553_v20, %v13256_v52 }
0x128b   :  { %v13347_v31 = vadd.f32 %v13346_v50, %v13246_v23 }
0x128e   :  { %v23564_v42 = vpop.f32.mrf.mxu0 }
0x128f   :  { %v13440_v9 = vadd.f32 %v23564_v42, %v13353_v63  ;;  %v23597_v34 = vpop.f32.mrf.mxu1 }
0x1290   :  { %v13432_v2 = vpop.f32.mrf.mxu0 }
0x1291   :  { %v13433_v11 = vadd.f32 %v13432_v2, %v13347_v31  ;;  %v13525_v14 = vadd.f32 %v23575_v26, %v13440_v9  ;;  %v13688_v55 = vpop.f32.mrf.mxu1 }
0x1293   :  { %v13517_v45 = vadd.f32 %v13516_v16, %v13433_v11 }
0x1297   :  { %v23586_v37 = vpop.f32.mrf.mxu0 }
0x1298   :  { %v13614_v62 = vadd.f32 %v23586_v37, %v13525_v14 }
0x1299   :  { %v13607_v47 = vpop.f32.mrf.mxu0 }
0x129a   :  { %v13608_v48 = vadd.f32 %v13607_v47, %v13517_v45  ;;  %v25902_v22 = vadd.f32 %v23597_v34, %v13614_v62 }
0x129c   :  { %v25904_v5 = vadd.f32 %v13688_v55, %v13608_v48  ;;  %v14163_v60 = vsel %vm1534_vm2, %v25902_v22, 0 }
0x129d   :  { %v14196_v35 = vand.u32 4294901760, %v14163_v60 }
0x129e   :  { %v13711_v33 = vsel %vm1534_vm2, %v25904_v5, 0 }
0x129f   :  { %v13744_v40 = vand.u32 4294901760, %v13711_v33  ;;  %v14273_v27 = vsub.f32 %v14163_v60, %v14196_v35 }
0x12a1   :  { %23599 = vmatpush3.xpose.msra.mxu0 %v13744_v40  ;;  %v13821_v41 = vsub.f32 %v13711_v33, %v13744_v40  ;;  %v14274_v38 = vand.u32 4294901760, %v14273_v27 }
0x12a2   :  { %23608 = vmatprep.subr.mxu0 %v24282_v51 }
0x12a3   :  { %v13822_v19 = vand.u32 4294901760, %v13821_v41  ;;  %v14275_v59 = vsub.f32 %v14273_v27, %v14274_v38 }
0x12a4   :  { %23601 = vmatmul.mubr.f32.vlgmr.msra.gmra.mxu0 %v13783_v32 }
0x12a5   :  { %23609 = vmatpush3.xpose.msra.mxu0 %v13821_v41  ;;  %23610 = vmatprep.mubr.msk.f32.mxu0 %vm24283_vm1, %v24282_v51  ;;  %v13823_v21 = vsub.f32 %v13821_v41, %v13822_v19  ;;  %v14276_v44 = vand.u32 4294901760, %v14275_v59 }
0x12a6   :  { %23618 = vmatprep.subr.mxu0 %v24282_v51 }
0x12a7   :  { %v13824_v24 = vand.u32 4294901760, %v13823_v21 }
0x12a8   :  { %23611 = vmatmul.mubr.f32.vlgmr.msra.gmra.mxu0 %v13780_v17 }
0x12a9   :  { %23604 = vmatpush3.xpose.msra.mxu1 %v13824_v24  ;;  %23619 = vmatpush3.xpose.msra.mxu0 %v13822_v19 }
0x12aa   :  { %23620 = vmatprep.mubr.msk.f32.mxu0 %vm24283_vm1, %v24282_v51  ;;  %23613 = vmatprep.subr.mxu1 %v24282_v51 }
0x12ab   :  { %23628 = vmatprep.subr.mxu0 %v24282_v51 }
0x12ac   :  { %23606 = vmatmul.mubr.f32.vlgmr.msra.gmra.mxu1 %v25895_v12  ;;  %23621 = vmatmul.mubr.f32.vlgmr.msra.gmra.mxu0 %v25895_v12 }
0x12ad   :  { %23614 = vmatpush3.xpose.msra.mxu1 %v13744_v40  ;;  %23629 = vmatpush3.xpose.msra.mxu0 %v14196_v35 }
0x12ae   :  { %23615 = vmatprep.mubr.msk.f32.mxu1 %vm24283_vm1, %v24282_v51  ;;  %23630 = vmatprep.mubr.msk.f32.mxu0 %vm24283_vm1, %v24282_v51 }
0x12af   :  { %23623 = vmatprep.subr.mxu1 %v24282_v51  ;;  %23638 = vmatprep.subr.mxu0 %v24282_v51 }
0x12b0   :  { %23616 = vmatmul.mubr.f32.vlgmr.msra.gmra.mxu1 %v13781_v49  ;;  %23631 = vmatmul.mubr.f32.vlgmr.msra.gmra.mxu0 %v14235_v39 }
0x12b1   :  { %23624 = vmatpush3.xpose.msra.mxu1 %v13744_v40  ;;  %23639 = vmatpush3.xpose.msra.mxu0 %v14273_v27 }
0x12b2   :  { %23625 = vmatprep.mubr.msk.f32.mxu1 %vm24283_vm1, %v24282_v51  ;;  %23640 = vmatprep.mubr.msk.f32.mxu0 %vm24283_vm1, %v24282_v51 }
0x12b3   :  { %23633 = vmatprep.subr.mxu1 %v24282_v51  ;;  %23648 = vmatprep.subr.mxu0 %v24282_v51 }
0x12b4   :  { %23626 = vmatmul.mubr.f32.vlgmr.msra.gmra.mxu1 %v25895_v12  ;;  %23641 = vmatmul.mubr.f32.vlgmr.msra.gmra.mxu0 %v14232_v8 }
0x12b5   :  { %23634 = vmatpush3.xpose.msra.mxu1 %v14276_v44  ;;  %23649 = vmatpush3.xpose.msra.mxu0 %v14274_v38 }
0x12b6   :  { %23635 = vmatprep.mubr.msk.f32.mxu1 %vm24283_vm1, %v24282_v51  ;;  %23650 = vmatprep.mubr.msk.f32.mxu0 %vm24283_vm1, %v24282_v51 }
0x12b7   :  { %23643 = vmatprep.subr.mxu1 %v24282_v51  ;;  %23658 = vmatprep.subr.mxu0 %v24282_v51 }
0x12b8   :  { %23636 = vmatmul.mubr.f32.vlgmr.msra.gmra.mxu1 %v25906_v28  ;;  %23651 = vmatmul.mubr.f32.vlgmr.msra.gmra.mxu0 %v25906_v28 }
0x12b9   :  { %23644 = vmatpush3.xpose.msra.mxu1 %v14196_v35  ;;  %23645 = vmatprep.mubr.msk.f32.mxu1 %vm24283_vm1, %v24282_v51 }
0x12ba   :  { %23653 = vmatprep.subr.mxu1 %v24282_v51  ;;  %23660 = vmatprep.mubr.msk.f32.mxu0 %vm24283_vm1, %v24282_v51 }
0x12bc   :  { %23646 = vmatmul.mubr.f32.vlgmr.msra.gmra.mxu1 %v14233_v25 }
0x12bd   :  { %23654 = vmatpush3.xpose.msra.mxu1 %v14196_v35  ;;  %23655 = vmatprep.mubr.msk.f32.mxu1 %vm24283_vm1, %v24282_v51 }
0x12be   :  { %23663 = vmatprep.subr.mxu1 %v24282_v51 }
0x12c0   :  { %23656 = vmatmul.mubr.f32.vlgmr.msra.gmra.mxu1 %v25906_v28 }
0x12c1   :  { %23665 = vmatprep.mubr.msk.f32.mxu1 %vm24283_vm1, %v24282_v51 }
0x1364   :  { %v13785_v3 = vpop.f32.mrf.mxu0 }
0x1366   :  { %v23602_v7 = vpop.f32.mrf.mxu0 }
0x1368   :  { %v13935_v18 = vpop.f32.mrf.mxu0 }
0x136a   :  { %v23612_v54 = vpop.f32.mrf.mxu0 }
0x136c   :  { %v13861_v13 = vpop.f32.mrf.mxu1  ;;  %v14083_v57 = vpop.f32.mrf.mxu0 }
0x136d   :  { %v13862_v58 = vadd.f32 %v13861_v13, %v13785_v3 }
0x136e   :  { %v23607_v6 = vpop.f32.mrf.mxu1  ;;  %v23622_v56 = vpop.f32.mrf.mxu0 }
0x136f   :  { %v13936_v15 = vadd.f32 %v13935_v18, %v13862_v58 }
0x1370   :  { %v14009_v4 = vpop.f32.mrf.mxu1  ;;  %v14237_v1 = vpop.f32.mrf.mxu0 }
0x1371   :  { %v14010_v20 = vadd.f32 %v14009_v4, %v13936_v15 }
0x1372   :  { %v23617_v46 = vpop.f32.mrf.mxu1  ;;  %v23632_v52 = vpop.f32.mrf.mxu0 }
0x1373   :  { %v14084_v23 = vadd.f32 %v14083_v57, %v14010_v20 }
0x1374   :  { %v14155_v42 = vpop.f32.mrf.mxu1  ;;  %v14387_v43 = vpop.f32.mrf.mxu0 }
0x1375   :  { %v14156_v0 = vadd.f32 %v14155_v42, %v14084_v23 }
0x1376   :  { %v23627_v50 = vpop.f32.mrf.mxu1  ;;  %v23642_v63 = vpop.f32.mrf.mxu0 }
0x1377   :  { %v14611_v26 = vsel %vm1534_vm2, %v14156_v0, -inf }
0x1378   :  { %v14313_v2 = vpop.f32.mrf.mxu1  ;;  %14612 = vmax.xlane.f32.xlu1 %v14611_v26  ;;  %v14535_v12 = vpop.f32.mrf.mxu0 }
0x1379   :  { %v14314_v9 = vadd.f32 %v14313_v2, %v14237_v1 }
0x137a   :  { %v23637_v31 = vpop.f32.mrf.mxu1  ;;  %v23652_v61 = vpop.f32.mrf.mxu0 }
0x137b   :  { %v14388_v11 = vadd.f32 %v14387_v43, %v14314_v9 }
0x137c   :  { %v14461_v16 = vpop.f32.mrf.mxu1 }
0x137d   :  { %v14462_v17 = vadd.f32 %v14461_v16, %v14388_v11 }
0x137e   :  { %v23647_v14 = vpop.f32.mrf.mxu1 }
0x137f   :  { %v14536_v34 = vadd.f32 %v14535_v12, %v14462_v17 }
0x1380   :  { %v14607_v37 = vpop.f32.mrf.mxu1 }
0x1381   :  { %v14608_v62 = vadd.f32 %v14607_v37, %v14536_v34 }
0x1382   :  { %v23657_v45 = vpop.f32.mrf.mxu1 }
0x1383   :  { %v14614_v47 = vsel %vm1534_vm2, %v14608_v62, -inf }
0x1384   :  { %14615 = vmax.xlane.f32.xlu0 %v14614_v47 }
0x1401   :  { %v14613_v48 = vpop.xlane.xlu1 %14612 }
0x1402   :  { %v14617_v49 = vsub.f32 %v14156_v0, %v14613_v48 }
0x1404   :  { %v14619_v53 = vmul.f32 1.442695, %v14617_v49 }
0x1406   :  { %24201 = vpow2.f32 %v14619_v53 }
0x140d   :  { %v14616_v55 = vpop.xlane.xlu0 %14615 }
0x140e   :  { %v14618_v28 = vsub.f32 %v14608_v62, %v14616_v55 }
0x1410   :  { %v14621_v33 = vmul.f32 1.442695, %v14618_v28 }
0x1412   :  { %24203 = vpow2.f32 %v14621_v33 }
0x1413   :  { %v24202_v36 = vpop.eup %24201 }
0x1414   :  { %v14623_v40 = vsel %vm1534_vm2, %v24202_v36, 0.0 }
0x1415   :  { %14624 = vadd.xlane.f32.xlu0 %v14623_v40 }
0x141f   :  { %v24204_v60 = vpop.eup %24203 }
0x1420   :  { %v14626_v41 = vsel %vm1534_vm2, %v24204_v60, 0.0 }
0x1421   :  { %14627 = vadd.xlane.f32.xlu1 %v14626_v41 }
0x142b   :  { %14633 = vrot.lane.b32.xlu0 %v25904_v5, %s24284_s3 }
0x142f   :  { %15537 = vrot.lane.b32.xlu0 %v25891_v10, %s24286_s24 }
0x1432   :  { %15085 = vrot.lane.b32.xlu1 %v25902_v22, %s24284_s3 }
0x1433   :  { %15991 = vrot.lane.b32.xlu0 %v25898_v30, %s24286_s24 }
0x1436   :  { %15539 = vrot.lane.b32.xlu1 %v25904_v5, %s24286_s24 }
0x143a   :  { %15993 = vrot.lane.b32.xlu1 %v25902_v22, %s24286_s24 }
0x149e   :  { %v14625_v8 = vpop.xlane.xlu0 %14624 }
0x149f   :  { %24205 = vrcp.f32 %v14625_v8 }
0x14a2   :  { %v14634_v32 = vpop.permute.xlu0 %14633 }
0x14a3   :  { %v14670_v19 = vand.u32 4294901760, %v14634_v32 }
0x14a5   :  { %v14747_v35 = vsub.f32 %v14634_v32, %v14670_v19  ;;  %23659 = vmatpush3.msra.mxu0 %v14670_v19 }
0x14a6   :  { %23668 = vmatprep.subr.mxu0 %v24282_v51  ;;  %v15538_v23 = vpop.permute.xlu0 %15537 }
0x14a7   :  { %v14748_v21 = vand.u32 4294901760, %v14747_v35  ;;  %v15541_v50 = vsel %vm1534_vm2, %v15538_v23, 0 }
0x14a8   :  { %v26002_v12 = vand.u32 4294901760, %v15541_v50 }
0x14a9   :  { %v14749_v25 = vsub.f32 %v14747_v35, %v14748_v21 }
0x14aa   :  { %v14628_v24 = vpop.xlane.xlu1 %14627  ;;  %v15612_v16 = vsub.f32 %v15541_v50, %v26002_v12  ;;  %v15992_v37 = vpop.permute.xlu0 %15991 }
0x14ab   :  { %v14750_v27 = vand.u32 4294901760, %v14749_v25  ;;  %24207 = vrcp.f32 %v14628_v24  ;;  %v15995_v45 = vsel %vm1534_vm2, %v15992_v37, 0 }
0x14ac   :  { %v24206_v29 = vpop.eup %24205  ;;  %v15613_v62 = vand.u32 4294901760, %v15612_v16  ;;  %v16065_v49 = vand.u32 4294901760, %v15995_v45 }
0x14ad   :  { %v14630_v38 = vmul.f32 %v24206_v29, %v24202_v36  ;;  %23664 = vmatpush3.msra.mxu1 %v14750_v27 }
0x14ae   :  { %v15086_v39 = vpop.permute.xlu1 %15085  ;;  %23673 = vmatprep.subr.mxu1 %v24282_v51  ;;  %v15614_v48 = vsub.f32 %v15612_v16, %v15613_v62  ;;  %v16066_v28 = vsub.f32 %v15995_v45, %v16065_v49 }
0x14af   :  { %v15122_v59 = vand.u32 4294901760, %v15086_v39  ;;  %v14637_v44 = vsel %vm1534_vm2, %v14630_v38, 0 }
0x14b0   :  { %v14705_v3 = vand.u32 4294901760, %v14637_v44  ;;  %v15615_v55 = vand.u32 4294901760, %v15614_v48  ;;  %v16067_v36 = vand.u32 4294901760, %v16066_v28 }
0x14b1   :  { %v25974_v7 = vsub.f32 %v15086_v39, %v15122_v59 }
0x14b2   :  { %v15540_v18 = vpop.permute.xlu1 %15539  ;;  %v14706_v54 = vsub.f32 %v14637_v44, %v14705_v3  ;;  %23666 = vmatmul.mubr.f32.vlgmr.msra.gmra.mxu1 %v14705_v3  ;;  %v16068_v40 = vsub.f32 %v16066_v28, %v16067_v36 }
0x14b3   :  { %v15200_v13 = vand.u32 4294901760, %v25974_v7  ;;  %v15543_v57 = vsel %vm1534_vm2, %v15540_v18, 0  ;;  %23674 = vmatpush3.msra.mxu1 %v14670_v19  ;;  %23675 = vmatprep.mubr.msk.f32.mxu1 %vm24283_vm1, %v24282_v51 }
0x14b4   :  { %23683 = vmatprep.subr.mxu1 %v24282_v51  ;;  %v14707_v58 = vand.u32 4294901760, %v14706_v54  ;;  %v25984_v56 = vand.u32 4294901760, %v15543_v57 }
0x14b5   :  { %v15201_v6 = vsub.f32 %v25974_v7, %v15200_v13 }
0x14b6   :  { %23676 = vmatmul.mubr.f32.vlgmr.msra.gmra.mxu1 %v14707_v58  ;;  %v14708_v15 = vsub.f32 %v14706_v54, %v14707_v58  ;;  %v25990_v52 = vsub.f32 %v15543_v57, %v25984_v56  ;;  %v15994_v42 = vpop.permute.xlu1 %15993 }
0x14b7   :  { %v15202_v4 = vand.u32 4294901760, %v15201_v6  ;;  %23684 = vmatpush3.msra.mxu1 %v14670_v19  ;;  %23685 = vmatprep.mubr.msk.f32.mxu1 %vm24283_vm1, %v24282_v51  ;;  %v15997_v26 = vsel %vm1534_vm2, %v15994_v42, 0 }
0x14b8   :  { %v24208_v1 = vpop.eup %24207  ;;  %23693 = vmatprep.subr.mxu1 %v24282_v51  ;;  %v14709_v20 = vand.u32 4294901760, %v14708_v15  ;;  %v15654_v63 = vand.u32 4294901760, %v25990_v52  ;;  %v26010_v61 = vand.u32 4294901760, %v15997_v26 }
0x14b9   :  { %v14632_v46 = vmul.f32 %v24208_v1, %v24204_v60  ;;  %v16069_v60 = vand.u32 4294901760, %v16068_v40 }
0x14ba   :  { %23661 = vmatmul.mubr.f32.vlgmr.msra.gmra.mxu0 %v14709_v20  ;;  %23686 = vmatmul.mubr.f32.vlgmr.msra.gmra.mxu1 %v14705_v3  ;;  %v15655_v31 = vsub.f32 %v25990_v52, %v15654_v63  ;;  %v26020_v34 = vsub.f32 %v15997_v26, %v26010_v61 }
0x14bb   :  { %23669 = vmatpush3.msra.mxu0 %v14747_v35  ;;  %23694 = vmatpush3.msra.mxu1 %v15202_v4  ;;  %v15089_v43 = vsel %vm1534_vm2, %v14632_v46, 0 }
0x14bc   :  { %23670 = vmatprep.mubr.msk.f32.mxu0 %vm24283_vm1, %v24282_v51  ;;  %23678 = vmatprep.subr.mxu0 %v24282_v51  ;;  %v15157_v0 = vand.u32 4294901760, %v15089_v43  ;;  %v15656_v14 = vand.u32 4294901760, %v15655_v31  ;;  %v16108_v47 = vand.u32 4294901760, %v26020_v34 }
0x14bd   :  { %23695 = vmatprep.mubr.msk.f32.mxu1 %vm24283_vm1, %v24282_v51  ;;  %23703 = vmatprep.subr.mxu1 %v24282_v51 }
0x14be   :  { %23671 = vmatmul.mubr.f32.vlgmr.msra.gmra.mxu0 %v14706_v54  ;;  %v15158_v2 = vsub.f32 %v15089_v43, %v15157_v0  ;;  %23696 = vmatmul.mubr.f32.vlgmr.msra.gmra.mxu1 %v15157_v0  ;;  %v16109_v53 = vsub.f32 %v26020_v34, %v16108_v47 }
0x14bf   :  { %23679 = vmatpush3.msra.mxu0 %v14748_v21  ;;  %23704 = vmatpush3.msra.mxu1 %v15122_v59 }
0x14c0   :  { %23680 = vmatprep.mubr.msk.f32.mxu0 %vm24283_vm1, %v24282_v51  ;;  %23688 = vmatprep.subr.mxu0 %v24282_v51  ;;  %v15159_v9 = vand.u32 4294901760, %v15158_v2  ;;  %v16110_v33 = vand.u32 4294901760, %v16109_v53 }
0x14c1   :  { %23705 = vmatprep.mubr.msk.f32.mxu1 %vm24283_vm1, %v24282_v51  ;;  %23713 = vmatprep.subr.mxu1 %v24282_v51 }
0x14c2   :  { %23681 = vmatmul.mubr.f32.vlgmr.msra.gmra.mxu0 %v14705_v3  ;;  %23706 = vmatmul.mubr.f32.vlgmr.msra.gmra.mxu1 %v15159_v9  ;;  %v15160_v11 = vsub.f32 %v15158_v2, %v15159_v9 }
0x14c3   :  { %23689 = vmatpush3.msra.mxu0 %v15122_v59  ;;  %23714 = vmatpush3.msra.mxu1 %v15122_v59 }
0x14c4   :  { %23690 = vmatprep.mubr.msk.f32.mxu0 %vm24283_vm1, %v24282_v51  ;;  %23698 = vmatprep.subr.mxu0 %v24282_v51  ;;  %v15161_v17 = vand.u32 4294901760, %v15160_v11 }
0x14c5   :  { %23715 = vmatprep.mubr.msk.f32.mxu1 %vm24283_vm1, %v24282_v51  ;;  %23723 = vmatprep.subr.mxu1 %v24282_v51 }
0x14c6   :  { %23691 = vmatmul.mubr.f32.vlgmr.msra.gmra.mxu0 %v15161_v17  ;;  %23716 = vmatmul.mubr.f32.vlgmr.msra.gmra.mxu1 %v15157_v0 }
0x14c7   :  { %23699 = vmatpush3.msra.mxu0 %v25974_v7  ;;  %23724 = vmatpush3.xpose.msra.mxu1 %v15656_v14 }
0x14c8   :  { %23700 = vmatprep.mubr.msk.f32.mxu0 %vm24283_vm1, %v24282_v51  ;;  %23708 = vmatprep.subr.mxu0 %v24282_v51 }
0x14c9   :  { %23725 = vmatprep.mubr.msk.f32.mxu1 %vm24283_vm1, %v24282_v51  ;;  %23733 = vmatprep.subr.mxu1 %v24282_v51 }
0x14ca   :  { %23701 = vmatmul.mubr.f32.vlgmr.msra.gmra.mxu0 %v15158_v2  ;;  %23726 = vmatmul.mubr.f32.vlgmr.msra.gmra.mxu1 %v26002_v12 }
0x14cb   :  { %23709 = vmatpush3.msra.mxu0 %v15200_v13  ;;  %23734 = vmatpush3.xpose.msra.mxu1 %v25984_v56 }
0x14cc   :  { %23710 = vmatprep.mubr.msk.f32.mxu0 %vm24283_vm1, %v24282_v51  ;;  %23718 = vmatprep.subr.mxu0 %v24282_v51 }
0x14cd   :  { %23735 = vmatprep.mubr.msk.f32.mxu1 %vm24283_vm1, %v24282_v51  ;;  %23743 = vmatprep.subr.mxu1 %v24282_v51 }
0x14ce   :  { %23711 = vmatmul.mubr.f32.vlgmr.msra.gmra.mxu0 %v15157_v0  ;;  %23736 = vmatmul.mubr.f32.vlgmr.msra.gmra.mxu1 %v15613_v62 }
0x14cf   :  { %23719 = vmatpush3.xpose.msra.mxu0 %v25984_v56  ;;  %23744 = vmatpush3.xpose.msra.mxu1 %v25984_v56 }
0x14d0   :  { %23720 = vmatprep.mubr.msk.f32.mxu0 %vm24283_vm1, %v24282_v51  ;;  %23728 = vmatprep.subr.mxu0 %v24282_v51 }
0x14d1   :  { %23745 = vmatprep.mubr.msk.f32.mxu1 %vm24283_vm1, %v24282_v51  ;;  %23753 = vmatprep.subr.mxu1 %v24282_v51 }
0x14d2   :  { %23721 = vmatmul.mubr.f32.vlgmr.msra.gmra.mxu0 %v15615_v55  ;;  %23746 = vmatmul.mubr.f32.vlgmr.msra.gmra.mxu1 %v26002_v12 }
0x14d3   :  { %23729 = vmatpush3.xpose.msra.mxu0 %v25990_v52  ;;  %23754 = vmatpush3.xpose.msra.mxu1 %v16110_v33 }
0x14d4   :  { %23730 = vmatprep.mubr.msk.f32.mxu0 %vm24283_vm1, %v24282_v51  ;;  %23738 = vmatprep.subr.mxu0 %v24282_v51 }
0x14d5   :  { %23755 = vmatprep.mubr.msk.f32.mxu1 %vm24283_vm1, %v24282_v51  ;;  %23763 = vmatprep.subr.mxu1 %v24282_v51 }
0x14d6   :  { %23731 = vmatmul.mubr.f32.vlgmr.msra.gmra.mxu0 %v15612_v16  ;;  %23756 = vmatmul.mubr.f32.vlgmr.msra.gmra.mxu1 %v16065_v49 }
0x14d7   :  { %23739 = vmatpush3.xpose.msra.mxu0 %v15654_v63  ;;  %23764 = vmatpush3.xpose.msra.mxu1 %v26010_v61 }
0x14d8   :  { %23740 = vmatprep.mubr.msk.f32.mxu0 %vm24283_vm1, %v24282_v51  ;;  %23748 = vmatprep.subr.mxu0 %v24282_v51 }
0x14d9   :  { %23765 = vmatprep.mubr.msk.f32.mxu1 %vm24283_vm1, %v24282_v51  ;;  %23773 = vmatprep.subr.mxu1 %v24282_v51 }
0x14da   :  { %23741 = vmatmul.mubr.f32.vlgmr.msra.gmra.mxu0 %v26002_v12  ;;  %23766 = vmatmul.mubr.f32.vlgmr.msra.gmra.mxu1 %v16067_v36 }
0x14db   :  { %23749 = vmatpush3.xpose.msra.mxu0 %v26010_v61  ;;  %23774 = vmatpush3.xpose.msra.mxu1 %v26010_v61 }
0x14dc   :  { %23750 = vmatprep.mubr.msk.f32.mxu0 %vm24283_vm1, %v24282_v51  ;;  %23758 = vmatprep.subr.mxu0 %v24282_v51 }
0x14dd   :  { %23775 = vmatprep.mubr.msk.f32.mxu1 %vm24283_vm1, %v24282_v51  ;;  %23783 = vmatprep.subr.mxu1 %v24282_v51 }
0x14de   :  { %23751 = vmatmul.mubr.f32.vlgmr.msra.gmra.mxu0 %v16069_v60  ;;  %23776 = vmatmul.mubr.f32.vlgmr.msra.gmra.mxu1 %v16065_v49 }
0x14df   :  { %23759 = vmatpush3.xpose.msra.mxu0 %v26020_v34  ;;  %23760 = vmatprep.mubr.msk.f32.mxu0 %vm24283_vm1, %v24282_v51 }
0x14e0   :  { %23768 = vmatprep.subr.mxu0 %v24282_v51  ;;  %23785 = vmatprep.mubr.msk.f32.mxu1 %vm24283_vm1, %v24282_v51 }
0x14e2   :  { %23761 = vmatmul.mubr.f32.vlgmr.msra.gmra.mxu0 %v16066_v28 }
0x14e3   :  { %23769 = vmatpush3.xpose.msra.mxu0 %v16108_v47  ;;  %23770 = vmatprep.mubr.msk.f32.mxu0 %vm24283_vm1, %v24282_v51 }
0x14e4   :  { %23778 = vmatprep.subr.mxu0 %v24282_v51 }
0x14e6   :  { %23771 = vmatmul.mubr.f32.vlgmr.msra.gmra.mxu0 %v16065_v49 }
0x14e7   :  { %23780 = vmatprep.mubr.msk.f32.mxu0 %vm24283_vm1, %v24282_v51 }
0x1572   :  { %v14787_v41 = vpop.f32.mrf.mxu1 }
0x1574   :  { %v23667_v8 = vpop.f32.mrf.mxu1 }
0x1576   :  { %v14935_v32 = vpop.f32.mrf.mxu1 }
0x1578   :  { %v23677_v19 = vpop.f32.mrf.mxu1 }
0x157a   :  { %v14711_v35 = vpop.f32.mrf.mxu0  ;;  %v15081_v21 = vpop.f32.mrf.mxu1 }
0x157b   :  { %v14788_v25 = vadd.f32 %v14787_v41, %v14711_v35 }
0x157c   :  { %v23662_v24 = vpop.f32.mrf.mxu0  ;;  %v23687_v27 = vpop.f32.mrf.mxu1 }
0x157e   :  { %v14861_v29 = vpop.f32.mrf.mxu0  ;;  %v15239_v38 = vpop.f32.mrf.mxu1 }
0x157f   :  { %v14862_v39 = vadd.f32 %v14861_v29, %v14788_v25 }
0x1580   :  { %v23672_v59 = vpop.f32.mrf.mxu0  ;;  %v23697_v44 = vpop.f32.mrf.mxu1 }
0x1581   :  { %v14936_v3 = vadd.f32 %v14935_v32, %v14862_v39 }
0x1582   :  { %v15009_v7 = vpop.f32.mrf.mxu0  ;;  %v15387_v18 = vpop.f32.mrf.mxu1 }
0x1583   :  { %v15010_v54 = vadd.f32 %v15009_v7, %v14936_v3 }
0x1584   :  { %v23682_v13 = vpop.f32.mrf.mxu0  ;;  %v23707_v57 = vpop.f32.mrf.mxu1 }
0x1585   :  { %v26090_v58 = vadd.f32 %v15081_v21, %v15010_v54 }
0x1586   :  { %v15163_v6 = vpop.f32.mrf.mxu0  ;;  %v15533_v56 = vpop.f32.mrf.mxu1 }
0x1587   :  { %v15240_v15 = vadd.f32 %v15239_v38, %v15163_v6 }
0x1588   :  { %v23692_v4 = vpop.f32.mrf.mxu0  ;;  %v23717_v1 = vpop.f32.mrf.mxu1 }
0x158a   :  { %v15313_v20 = vpop.f32.mrf.mxu0  ;;  %v15693_v46 = vpop.f32.mrf.mxu1 }
0x158b   :  { %v15314_v52 = vadd.f32 %v15313_v20, %v15240_v15 }
0x158c   :  { %v23702_v23 = vpop.f32.mrf.mxu0  ;;  %v23727_v42 = vpop.f32.mrf.mxu1 }
0x158d   :  { %v15388_v43 = vadd.f32 %v15387_v18, %v15314_v52 }
0x158e   :  { %v15461_v0 = vpop.f32.mrf.mxu0  ;;  %v15841_v50 = vpop.f32.mrf.mxu1 }
0x158f   :  { %v15462_v63 = vadd.f32 %v15461_v0, %v15388_v43 }
0x1590   :  { %v23712_v26 = vpop.f32.mrf.mxu0  ;;  %v23737_v2 = vpop.f32.mrf.mxu1 }
0x1591   :  { %v26092_v12 = vadd.f32 %v15533_v56, %v15462_v63 }
0x1592   :  { %v15617_v9 = vpop.f32.mrf.mxu0  ;;  %v15987_v31 = vpop.f32.mrf.mxu1 }
0x1593   :  { %v15694_v16 = vadd.f32 %v15693_v46, %v15617_v9 }
0x1594   :  { %v23722_v61 = vpop.f32.mrf.mxu0  ;;  %v23747_v11 = vpop.f32.mrf.mxu1 }
0x1596   :  { %v15767_v17 = vpop.f32.mrf.mxu0  ;;  %v16147_v14 = vpop.f32.mrf.mxu1 }
0x1597   :  { %v15768_v34 = vadd.f32 %v15767_v17, %v15694_v16 }
0x1598   :  { %v23732_v37 = vpop.f32.mrf.mxu0  ;;  %v23757_v62 = vpop.f32.mrf.mxu1 }
0x1599   :  { %v15842_v45 = vadd.f32 %v15841_v50, %v15768_v34 }
0x159a   :  { %v15915_v47 = vpop.f32.mrf.mxu0  ;;  %v16295_v48 = vpop.f32.mrf.mxu1 }
0x159b   :  { %v15916_v49 = vadd.f32 %v15915_v47, %v15842_v45 }
0x159c   :  { %v23742_v53 = vpop.f32.mrf.mxu0  ;;  %v23767_v55 = vpop.f32.mrf.mxu1 }
0x159d   :  { %v15988_v28 = vadd.f32 %v15987_v31, %v15916_v49 }
0x159e   :  { %v16071_v33 = vpop.f32.mrf.mxu0  ;;  %v16441_v36 = vpop.f32.mrf.mxu1 }
0x159f   :  { %v16445_v40 = vsel %vm1534_vm2, %v15988_v28, -inf  ;;  %v16148_v8 = vadd.f32 %v16147_v14, %v16071_v33 }
0x15a0   :  { %v23777_v60 = vpop.f32.mrf.mxu1  ;;  %16446 = vmax.xlane.f32.xlu1 %v16445_v40  ;;  %v23752_v41 = vpop.f32.mrf.mxu0 }
0x15a2   :  { %v16221_v32 = vpop.f32.mrf.mxu0 }
0x15a3   :  { %v16222_v19 = vadd.f32 %v16221_v32, %v16148_v8 }
0x15a4   :  { %v23762_v35 = vpop.f32.mrf.mxu0 }
0x15a5   :  { %v16296_v21 = vadd.f32 %v16295_v48, %v16222_v19 }
0x15a6   :  { %v16369_v25 = vpop.f32.mrf.mxu0 }
0x15a7   :  { %v16370_v24 = vadd.f32 %v16369_v25, %v16296_v21 }
0x15a8   :  { %v23772_v27 = vpop.f32.mrf.mxu0 }
0x15a9   :  { %v16442_v29 = vadd.f32 %v16441_v36, %v16370_v24 }
0x15ab   :  { %v16448_v38 = vsel %vm1534_vm2, %v16442_v29, -inf }
0x15ac   :  { %16449 = vmax.xlane.f32.xlu0 %v16448_v38 }
0x1629   :  { %v16447_v39 = vpop.xlane.xlu1 %16446 }
0x162a   :  { %v16451_v59 = vsub.f32 %v15988_v28, %v16447_v39 }
0x162c   :  { %v16453_v44 = vmul.f32 1.442695, %v16451_v59 }
0x162e   :  { %24209 = vpow2.f32 %v16453_v44 }
0x1635   :  { %v16450_v3 = vpop.xlane.xlu0 %16449 }
0x1636   :  { %v16452_v7 = vsub.f32 %v16442_v29, %v16450_v3 }
0x1638   :  { %v16455_v18 = vmul.f32 1.442695, %v16452_v7 }
0x163a   :  { %24211 = vpow2.f32 %v16455_v18 }
0x163b   :  { %v24210_v54 = vpop.eup %24209 }
0x163c   :  { %v16457_v13 = vsel %vm1534_vm2, %v24210_v54, 0.0 }
0x163d   :  { %16458 = vadd.xlane.f32.xlu0 %v16457_v13 }
0x1647   :  { %v24212_v57 = vpop.eup %24211 }
0x1648   :  { %v16460_v6 = vsel %vm1534_vm2, %v24212_v57, 0.0 }
0x1649   :  { %16461 = vadd.xlane.f32.xlu1 %v16460_v6 }
0x1653   :  { %16467 = vrot.lane.b32.xlu0 %v25904_v5, %s24287_s26 }
0x1657   :  { %17371 = vrot.lane.b32.xlu0 %v25891_v10, %s24288_s27 }
0x165a   :  { %16919 = vrot.lane.b32.xlu1 %v25902_v22, %s24287_s26 }
0x165b   :  { %17825 = vrot.lane.b32.xlu0 %v25898_v30, %s24288_s27 }
0x165e   :  { %17373 = vrot.lane.b32.xlu1 %v25904_v5, %s24288_s27 }
0x1662   :  { %17827 = vrot.lane.b32.xlu1 %v25902_v22, %s24288_s27 }
0x16c6   :  { %v16459_v56 = vpop.xlane.xlu0 %16458 }
0x16c7   :  { %24213 = vrcp.f32 %v16459_v56 }
0x16ca   :  { %v16468_v15 = vpop.permute.xlu0 %16467 }
0x16cb   :  { %v16504_v4 = vand.u32 4294901760, %v16468_v15 }
0x16cd   :  { %v16581_v1 = vsub.f32 %v16468_v15, %v16504_v4  ;;  %23779 = vmatpush3.msra.mxu0 %v16504_v4 }
0x16ce   :  { %23788 = vmatprep.subr.mxu0 %v24282_v51  ;;  %v17372_v49 = vpop.permute.xlu0 %17371 }
0x16cf   :  { %v16582_v20 = vand.u32 4294901760, %v16581_v1  ;;  %v17375_v33 = vsel %vm1534_vm2, %v17372_v49, 0 }
0x16d0   :  { %v26141_v41 = vand.u32 4294901760, %v17375_v33 }
0x16d1   :  { %v16583_v46 = vsub.f32 %v16581_v1, %v16582_v20 }
0x16d2   :  { %v16462_v52 = vpop.xlane.xlu1 %16461  ;;  %v17446_v21 = vsub.f32 %v17375_v33, %v26141_v41  ;;  %v17826_v29 = vpop.permute.xlu0 %17825 }
0x16d3   :  { %v16584_v23 = vand.u32 4294901760, %v16583_v46  ;;  %24215 = vrcp.f32 %v16462_v52  ;;  %v17829_v39 = vsel %vm1534_vm2, %v17826_v29, 0 }
0x16d4   :  { %v24214_v42 = vpop.eup %24213  ;;  %v17447_v38 = vand.u32 4294901760, %v17446_v21  ;;  %v17899_v3 = vand.u32 4294901760, %v17829_v39 }
0x16d5   :  { %v16464_v43 = vmul.f32 %v24214_v42, %v24210_v54  ;;  %23784 = vmatpush3.msra.mxu1 %v16584_v23 }
0x16d6   :  { %v16920_v0 = vpop.permute.xlu1 %16919  ;;  %23793 = vmatprep.subr.mxu1 %v24282_v51  ;;  %v17448_v44 = vsub.f32 %v17446_v21, %v17447_v38  ;;  %v17900_v54 = vsub.f32 %v17829_v39, %v17899_v3 }
0x16d7   :  { %v16956_v50 = vand.u32 4294901760, %v16920_v0  ;;  %v16471_v63 = vsel %vm1534_vm2, %v16464_v43, 0 }
0x16d8   :  { %v16539_v26 = vand.u32 4294901760, %v16471_v63  ;;  %v17449_v18 = vand.u32 4294901760, %v17448_v44 }
0x16d9   :  { %v26113_v2 = vsub.f32 %v16920_v0, %v16956_v50 }
0x16da   :  { %v17374_v9 = vpop.permute.xlu1 %17373  ;;  %v16540_v31 = vsub.f32 %v16471_v63, %v16539_v26  ;;  %23786 = vmatmul.mubr.f32.vlgmr.msra.gmra.mxu1 %v16539_v26 }
0x16db   :  { %v17034_v61 = vand.u32 4294901760, %v26113_v2  ;;  %v17377_v11 = vsel %vm1534_vm2, %v17374_v9, 0  ;;  %23794 = vmatpush3.msra.mxu1 %v16504_v4  ;;  %23795 = vmatprep.mubr.msk.f32.mxu1 %vm24283_vm1, %v24282_v51 }
0x16dc   :  { %23803 = vmatprep.subr.mxu1 %v24282_v51  ;;  %v16541_v16 = vand.u32 4294901760, %v16540_v31  ;;  %v26123_v14 = vand.u32 4294901760, %v17377_v11 }
0x16dd   :  { %v17035_v17 = vsub.f32 %v26113_v2, %v17034_v61 }
0x16de   :  { %23796 = vmatmul.mubr.f32.vlgmr.msra.gmra.mxu1 %v16541_v16  ;;  %v16542_v34 = vsub.f32 %v16540_v31, %v16541_v16  ;;  %v26129_v48 = vsub.f32 %v17377_v11, %v26123_v14  ;;  %v17828_v53 = vpop.permute.xlu1 %17827 }
0x16df   :  { %v17036_v37 = vand.u32 4294901760, %v17035_v17  ;;  %23804 = vmatpush3.msra.mxu1 %v16504_v4  ;;  %23805 = vmatprep.mubr.msk.f32.mxu1 %vm24283_vm1, %v24282_v51  ;;  %v17831_v40 = vsel %vm1534_vm2, %v17828_v53, 0 }
0x16e0   :  { %v24216_v62 = vpop.eup %24215  ;;  %23813 = vmatprep.subr.mxu1 %v24282_v51  ;;  %v16543_v45 = vand.u32 4294901760, %v16542_v34  ;;  %v17488_v36 = vand.u32 4294901760, %v26129_v48  ;;  %v26149_v19 = vand.u32 4294901760, %v17831_v40 }
0x16e1   :  { %v16466_v47 = vmul.f32 %v24216_v62, %v24212_v57  ;;  %v17901_v57 = vand.u32 4294901760, %v17900_v54 }
0x16e2   :  { %23781 = vmatmul.mubr.f32.vlgmr.msra.gmra.mxu0 %v16543_v45  ;;  %23806 = vmatmul.mubr.f32.vlgmr.msra.gmra.mxu1 %v16539_v26  ;;  %v17489_v32 = vsub.f32 %v26129_v48, %v17488_v36  ;;  %v26159_v27 = vsub.f32 %v17831_v40, %v26149_v19 }
0x16e3   :  { %23789 = vmatpush3.msra.mxu0 %v16581_v1  ;;  %23814 = vmatpush3.msra.mxu1 %v17036_v37  ;;  %v16923_v55 = vsel %vm1534_vm2, %v16466_v47, 0  ;;  %v17902_v6 = vsub.f32 %v17900_v54, %v17901_v57 }
0x16e4   :  { %23790 = vmatprep.mubr.msk.f32.mxu0 %vm24283_vm1, %v24282_v51  ;;  %23798 = vmatprep.subr.mxu0 %v24282_v51  ;;  %v16991_v28 = vand.u32 4294901760, %v16923_v55  ;;  %v17490_v24 = vand.u32 4294901760, %v17489_v32  ;;  %v17942_v59 = vand.u32 4294901760, %v26159_v27 }
0x16e5   :  { %23815 = vmatprep.mubr.msk.f32.mxu1 %vm24283_vm1, %v24282_v51  ;;  %23823 = vmatprep.subr.mxu1 %v24282_v51  ;;  %v17903_v56 = vand.u32 4294901760, %v17902_v6 }
0x16e6   :  { %23791 = vmatmul.mubr.f32.vlgmr.msra.gmra.mxu0 %v16540_v31  ;;  %v16992_v60 = vsub.f32 %v16923_v55, %v16991_v28  ;;  %23816 = vmatmul.mubr.f32.vlgmr.msra.gmra.mxu1 %v16991_v28  ;;  %v17943_v7 = vsub.f32 %v26159_v27, %v17942_v59 }
0x16e7   :  { %23799 = vmatpush3.msra.mxu0 %v16582_v20  ;;  %23824 = vmatpush3.msra.mxu1 %v16956_v50 }
0x16e8   :  { %23800 = vmatprep.mubr.msk.f32.mxu0 %vm24283_vm1, %v24282_v51  ;;  %23808 = vmatprep.subr.mxu0 %v24282_v51  ;;  %v16993_v8 = vand.u32 4294901760, %v16992_v60  ;;  %v17944_v13 = vand.u32 4294901760, %v17943_v7 }
0x16e9   :  { %23825 = vmatprep.mubr.msk.f32.mxu1 %vm24283_vm1, %v24282_v51  ;;  %23833 = vmatprep.subr.mxu1 %v24282_v51 }
0x16ea   :  { %23801 = vmatmul.mubr.f32.vlgmr.msra.gmra.mxu0 %v16539_v26  ;;  %23826 = vmatmul.mubr.f32.vlgmr.msra.gmra.mxu1 %v16993_v8  ;;  %v16994_v35 = vsub.f32 %v16992_v60, %v16993_v8 }
0x16eb   :  { %23809 = vmatpush3.msra.mxu0 %v16956_v50  ;;  %23834 = vmatpush3.msra.mxu1 %v16956_v50 }
0x16ec   :  { %23810 = vmatprep.mubr.msk.f32.mxu0 %vm24283_vm1, %v24282_v51  ;;  %23818 = vmatprep.subr.mxu0 %v24282_v51  ;;  %v16995_v25 = vand.u32 4294901760, %v16994_v35 }
0x16ed   :  { %23835 = vmatprep.mubr.msk.f32.mxu1 %vm24283_vm1, %v24282_v51  ;;  %23843 = vmatprep.subr.mxu1 %v24282_v51 }
0x16ee   :  { %23811 = vmatmul.mubr.f32.vlgmr.msra.gmra.mxu0 %v16995_v25  ;;  %23836 = vmatmul.mubr.f32.vlgmr.msra.gmra.mxu1 %v16991_v28 }
0x16ef   :  { %23819 = vmatpush3.msra.mxu0 %v26113_v2  ;;  %23844 = vmatpush3.xpose.msra.mxu1 %v17490_v24 }
0x16f0   :  { %23820 = vmatprep.mubr.msk.f32.mxu0 %vm24283_vm1, %v24282_v51  ;;  %23828 = vmatprep.subr.mxu0 %v24282_v51 }
0x16f1   :  { %23845 = vmatprep.mubr.msk.f32.mxu1 %vm24283_vm1, %v24282_v51  ;;  %23853 = vmatprep.subr.mxu1 %v24282_v51 }
0x16f2   :  { %23821 = vmatmul.mubr.f32.vlgmr.msra.gmra.mxu0 %v16992_v60  ;;  %23846 = vmatmul.mubr.f32.vlgmr.msra.gmra.mxu1 %v26141_v41 }
0x16f3   :  { %23829 = vmatpush3.msra.mxu0 %v17034_v61  ;;  %23854 = vmatpush3.xpose.msra.mxu1 %v26123_v14 }
0x16f4   :  { %23830 = vmatprep.mubr.msk.f32.mxu0 %vm24283_vm1, %v24282_v51  ;;  %23838 = vmatprep.subr.mxu0 %v24282_v51 }
0x16f5   :  { %23855 = vmatprep.mubr.msk.f32.mxu1 %vm24283_vm1, %v24282_v51  ;;  %23863 = vmatprep.subr.mxu1 %v24282_v51 }
0x16f6   :  { %23831 = vmatmul.mubr.f32.vlgmr.msra.gmra.mxu0 %v16991_v28  ;;  %23856 = vmatmul.mubr.f32.vlgmr.msra.gmra.mxu1 %v17447_v38 }
0x16f7   :  { %23839 = vmatpush3.xpose.msra.mxu0 %v26123_v14  ;;  %23864 = vmatpush3.xpose.msra.mxu1 %v26123_v14 }
0x16f8   :  { %23840 = vmatprep.mubr.msk.f32.mxu0 %vm24283_vm1, %v24282_v51  ;;  %23848 = vmatprep.subr.mxu0 %v24282_v51 }
0x16f9   :  { %23865 = vmatprep.mubr.msk.f32.mxu1 %vm24283_vm1, %v24282_v51  ;;  %23873 = vmatprep.subr.mxu1 %v24282_v51 }
0x16fa   :  { %23841 = vmatmul.mubr.f32.vlgmr.msra.gmra.mxu0 %v17449_v18  ;;  %23866 = vmatmul.mubr.f32.vlgmr.msra.gmra.mxu1 %v26141_v41 }
0x16fb   :  { %23849 = vmatpush3.xpose.msra.mxu0 %v26129_v48  ;;  %23874 = vmatpush3.xpose.msra.mxu1 %v17944_v13 }
0x16fc   :  { %23850 = vmatprep.mubr.msk.f32.mxu0 %vm24283_vm1, %v24282_v51  ;;  %23858 = vmatprep.subr.mxu0 %v24282_v51 }
0x16fd   :  { %23875 = vmatprep.mubr.msk.f32.mxu1 %vm24283_vm1, %v24282_v51  ;;  %23883 = vmatprep.subr.mxu1 %v24282_v51 }
0x16fe   :  { %23851 = vmatmul.mubr.f32.vlgmr.msra.gmra.mxu0 %v17446_v21  ;;  %23876 = vmatmul.mubr.f32.vlgmr.msra.gmra.mxu1 %v17899_v3 }
0x16ff   :  { %23859 = vmatpush3.xpose.msra.mxu0 %v17488_v36  ;;  %23884 = vmatpush3.xpose.msra.mxu1 %v26149_v19 }
0x1700   :  { %23860 = vmatprep.mubr.msk.f32.mxu0 %vm24283_vm1, %v24282_v51  ;;  %23868 = vmatprep.subr.mxu0 %v24282_v51 }
0x1701   :  { %23885 = vmatprep.mubr.msk.f32.mxu1 %vm24283_vm1, %v24282_v51  ;;  %23893 = vmatprep.subr.mxu1 %v24282_v51 }
0x1702   :  { %23861 = vmatmul.mubr.f32.vlgmr.msra.gmra.mxu0 %v26141_v41  ;;  %23886 = vmatmul.mubr.f32.vlgmr.msra.gmra.mxu1 %v17901_v57 }
0x1703   :  { %23869 = vmatpush3.xpose.msra.mxu0 %v26149_v19  ;;  %23894 = vmatpush3.xpose.msra.mxu1 %v26149_v19 }
0x1704   :  { %23870 = vmatprep.mubr.msk.f32.mxu0 %vm24283_vm1, %v24282_v51  ;;  %23878 = vmatprep.subr.mxu0 %v24282_v51 }
0x1705   :  { %23895 = vmatprep.mubr.msk.f32.mxu1 %vm24283_vm1, %v24282_v51  ;;  %23903 = vmatprep.subr.mxu1 %v24282_v51 }
0x1706   :  { %23871 = vmatmul.mubr.f32.vlgmr.msra.gmra.mxu0 %v17903_v56  ;;  %23896 = vmatmul.mubr.f32.vlgmr.msra.gmra.mxu1 %v17899_v3 }
0x1707   :  { %23879 = vmatpush3.xpose.msra.mxu0 %v26159_v27  ;;  %23880 = vmatprep.mubr.msk.f32.mxu0 %vm24283_vm1, %v24282_v51 }
0x1708   :  { %23888 = vmatprep.subr.mxu0 %v24282_v51  ;;  %23905 = vmatprep.mubr.msk.f32.mxu1 %vm24283_vm1, %v24282_v51 }
0x170a   :  { %23881 = vmatmul.mubr.f32.vlgmr.msra.gmra.mxu0 %v17900_v54 }
0x170b   :  { %23889 = vmatpush3.xpose.msra.mxu0 %v17942_v59  ;;  %23890 = vmatprep.mubr.msk.f32.mxu0 %vm24283_vm1, %v24282_v51 }
0x170c   :  { %23898 = vmatprep.subr.mxu0 %v24282_v51 }
0x170e   :  { %23891 = vmatmul.mubr.f32.vlgmr.msra.gmra.mxu0 %v17899_v3 }
0x170f   :  { %23900 = vmatprep.mubr.msk.f32.mxu0 %vm24283_vm1, %v24282_v51 }
0x179a   :  { %v16621_v15 = vpop.f32.mrf.mxu1 }
0x179c   :  { %v23787_v4 = vpop.f32.mrf.mxu1 }
0x179e   :  { %v16769_v1 = vpop.f32.mrf.mxu1 }
0x17a0   :  { %v23797_v20 = vpop.f32.mrf.mxu1 }
0x17a2   :  { %v16545_v46 = vpop.f32.mrf.mxu0  ;;  %v16915_v52 = vpop.f32.mrf.mxu1 }
0x17a3   :  { %v16622_v23 = vadd.f32 %v16621_v15, %v16545_v46 }
0x17a4   :  { %v23782_v42 = vpop.f32.mrf.mxu0  ;;  %v23807_v43 = vpop.f32.mrf.mxu1 }
0x17a6   :  { %v16695_v0 = vpop.f32.mrf.mxu0  ;;  %v17073_v50 = vpop.f32.mrf.mxu1 }
0x17a7   :  { %v16696_v63 = vadd.f32 %v16695_v0, %v16622_v23 }
0x17a8   :  { %v23792_v26 = vpop.f32.mrf.mxu0  ;;  %v23817_v2 = vpop.f32.mrf.mxu1 }
0x17a9   :  { %v16770_v9 = vadd.f32 %v16769_v1, %v16696_v63 }
0x17aa   :  { %v16843_v31 = vpop.f32.mrf.mxu0  ;;  %v17221_v61 = vpop.f32.mrf.mxu1 }
0x17ab   :  { %v16844_v11 = vadd.f32 %v16843_v31, %v16770_v9 }
0x17ac   :  { %v23802_v16 = vpop.f32.mrf.mxu0  ;;  %v23827_v17 = vpop.f32.mrf.mxu1 }
0x17ad   :  { %v26229_v14 = vadd.f32 %v16915_v52, %v16844_v11 }
0x17ae   :  { %v16997_v34 = vpop.f32.mrf.mxu0  ;;  %v17367_v37 = vpop.f32.mrf.mxu1 }
0x17af   :  { %v17074_v62 = vadd.f32 %v17073_v50, %v16997_v34 }
0x17b0   :  { %v23812_v45 = vpop.f32.mrf.mxu0  ;;  %v23837_v47 = vpop.f32.mrf.mxu1 }
0x17b2   :  { %v17147_v48 = vpop.f32.mrf.mxu0  ;;  %v17527_v49 = vpop.f32.mrf.mxu1 }
0x17b3   :  { %v17148_v53 = vadd.f32 %v17147_v48, %v17074_v62 }
0x17b4   :  { %v23822_v55 = vpop.f32.mrf.mxu0  ;;  %v23847_v28 = vpop.f32.mrf.mxu1 }
0x17b5   :  { %v17222_v33 = vadd.f32 %v17221_v61, %v17148_v53 }
0x17b6   :  { %v17295_v36 = vpop.f32.mrf.mxu0  ;;  %v17675_v40 = vpop.f32.mrf.mxu1 }
0x17b7   :  { %v17296_v60 = vadd.f32 %v17295_v36, %v17222_v33 }
0x17b8   :  { %v23832_v41 = vpop.f32.mrf.mxu0  ;;  %v23857_v8 = vpop.f32.mrf.mxu1 }
0x17b9   :  { %v26231_v32 = vadd.f32 %v17367_v37, %v17296_v60 }
0x17ba   :  { %v17451_v19 = vpop.f32.mrf.mxu0  ;;  %v17821_v35 = vpop.f32.mrf.mxu1 }
0x17bb   :  { %v17528_v24 = vadd.f32 %v17527_v49, %v17451_v19 }
0x17bc   :  { %v23842_v21 = vpop.f32.mrf.mxu0  ;;  %v23867_v25 = vpop.f32.mrf.mxu1 }
0x17be   :  { %v17601_v27 = vpop.f32.mrf.mxu0  ;;  %v17981_v29 = vpop.f32.mrf.mxu1 }
0x17bf   :  { %v17602_v38 = vadd.f32 %v17601_v27, %v17528_v24 }
0x17c0   :  { %v23852_v39 = vpop.f32.mrf.mxu0  ;;  %v23877_v59 = vpop.f32.mrf.mxu1 }
0x17c1   :  { %v17676_v44 = vadd.f32 %v17675_v40, %v17602_v38 }
0x17c2   :  { %v17749_v3 = vpop.f32.mrf.mxu0  ;;  %v18129_v7 = vpop.f32.mrf.mxu1 }
0x17c3   :  { %v17750_v18 = vadd.f32 %v17749_v3, %v17676_v44 }
0x17c4   :  { %v23862_v54 = vpop.f32.mrf.mxu0  ;;  %v23887_v13 = vpop.f32.mrf.mxu1 }
0x17c5   :  { %v17822_v57 = vadd.f32 %v17821_v35, %v17750_v18 }
0x17c6   :  { %v17905_v6 = vpop.f32.mrf.mxu0  ;;  %v18275_v56 = vpop.f32.mrf.mxu1 }
0x17c7   :  { %v18279_v15 = vsel %vm1534_vm2, %v17822_v57, -inf  ;;  %v17982_v20 = vadd.f32 %v17981_v29, %v17905_v6 }
0x17c8   :  { %v23897_v4 = vpop.f32.mrf.mxu1  ;;  %18280 = vmax.xlane.f32.xlu1 %v18279_v15  ;;  %v23872_v1 = vpop.f32.mrf.mxu0 }
0x17ca   :  { %v18055_v46 = vpop.f32.mrf.mxu0 }
0x17cb   :  { %v18056_v52 = vadd.f32 %v18055_v46, %v17982_v20 }
0x17cc   :  { %v23882_v23 = vpop.f32.mrf.mxu0 }
0x17cd   :  { %v18130_v42 = vadd.f32 %v18129_v7, %v18056_v52 }
0x17ce   :  { %v18203_v43 = vpop.f32.mrf.mxu0 }
0x17cf   :  { %v18204_v0 = vadd.f32 %v18203_v43, %v18130_v42 }
0x17d0   :  { %v23892_v50 = vpop.f32.mrf.mxu0 }
0x17d1   :  { %v18276_v63 = vadd.f32 %v18275_v56, %v18204_v0 }
0x17d3   :  { %v18282_v26 = vsel %vm1534_vm2, %v18276_v63, -inf }
0x17d4   :  { %18283 = vmax.xlane.f32.xlu0 %v18282_v26 }
0x1851   :  { %v18281_v2 = vpop.xlane.xlu1 %18280 }
0x1852   :  { %v18285_v9 = vsub.f32 %v17822_v57, %v18281_v2 }
0x1854   :  { %v18287_v31 = vmul.f32 1.442695, %v18285_v9 }
0x1856   :  { %24217 = vpow2.f32 %v18287_v31 }
0x185d   :  { %v18284_v61 = vpop.xlane.xlu0 %18283 }
0x185e   :  { %v18286_v11 = vsub.f32 %v18276_v63, %v18284_v61 }
0x1860   :  { %v18289_v16 = vmul.f32 1.442695, %v18286_v11 }
0x1862   :  { %24219 = vpow2.f32 %v18289_v16 }
0x1863   :  { %v24218_v17 = vpop.eup %24217 }
0x1864   :  { %v18291_v34 = vsel %vm1534_vm2, %v24218_v17, 0.0 }
0x1865   :  { %18292 = vadd.xlane.f32.xlu0 %v18291_v34 }
0x186f   :  { %v24220_v37 = vpop.eup %24219 }
0x1870   :  { %v18294_v62 = vsel %vm1534_vm2, %v24220_v37, 0.0 }
0x1871   :  { %18295 = vadd.xlane.f32.xlu1 %v18294_v62 }
0x187b   :  { %18301 = vrot.lane.b32.xlu0 %v25904_v5, %s24289_s28 }
0x187f   :  { %19205 = vrot.lane.b32.xlu0 %v25891_v10, %s24290_s29 }
0x1882   :  { %18753 = vrot.lane.b32.xlu1 %v25902_v22, %s24289_s28 }
0x1883   :  { %19659 = vrot.lane.b32.xlu0 %v25898_v30, %s24290_s29 }
0x1886   :  { %19207 = vrot.lane.b32.xlu1 %v25904_v5, %s24290_s29 }
0x188a   :  { %19661 = vrot.lane.b32.xlu1 %v25902_v22, %s24290_s29 }
0x18ee   :  { %v18293_v45 = vpop.xlane.xlu0 %18292 }
0x18ef   :  { %24221 = vrcp.f32 %v18293_v45 }
0x18f2   :  { %v18302_v47 = vpop.permute.xlu0 %18301 }
0x18f3   :  { %v18338_v48 = vand.u32 4294901760, %v18302_v47 }
0x18f5   :  { %v18415_v49 = vsub.f32 %v18302_v47, %v18338_v48  ;;  %23899 = vmatpush3.msra.mxu0 %v18338_v48 }
0x18f6   :  { %23908 = vmatprep.subr.mxu0 %v24282_v51  ;;  %v19206_v18 = vpop.permute.xlu0 %19205 }
0x18f7   :  { %v18416_v10 = vand.u32 4294901760, %v18415_v49  ;;  %v19209_v6 = vsel %vm1534_vm2, %v19206_v18, 0 }
0x18f8   :  { %v26280_v1 = vand.u32 4294901760, %v19209_v6 }
0x18f9   :  { %v18417_v53 = vsub.f32 %v18415_v49, %v18416_v10 }
0x18fa   :  { %v18296_v55 = vpop.xlane.xlu1 %18295  ;;  %v19280_v42 = vsub.f32 %v19209_v6, %v26280_v1  ;;  %v19660_v63 = vpop.permute.xlu0 %19659 }
0x18fb   :  { %v18418_v28 = vand.u32 4294901760, %v18417_v53  ;;  %24223 = vrcp.f32 %v18296_v55  ;;  %v19663_v2 = vsel %vm1534_vm2, %v19660_v63, 0 }
0x18fc   :  { %v24222_v30 = vpop.eup %24221  ;;  %v19281_v26 = vand.u32 4294901760, %v19280_v42  ;;  %v19733_v61 = vand.u32 4294901760, %v19663_v2 }
0x18fd   :  { %v18298_v33 = vmul.f32 %v24222_v30, %v24218_v17  ;;  %23904 = vmatpush3.msra.mxu1 %v18418_v28 }
0x18fe   :  { %v18754_v36 = vpop.permute.xlu1 %18753  ;;  %23913 = vmatprep.subr.mxu1 %v24282_v51  ;;  %v19282_v31 = vsub.f32 %v19280_v42, %v19281_v26  ;;  %v19734_v17 = vsub.f32 %v19663_v2, %v19733_v61 }
0x18ff   :  { %v18790_v40 = vand.u32 4294901760, %v18754_v36  ;;  %v18305_v60 = vsel %vm1534_vm2, %v18298_v33, 0 }
0x1900   :  { %v18373_v41 = vand.u32 4294901760, %v18305_v60  ;;  %v19283_v16 = vand.u32 4294901760, %v19282_v31 }
0x1901   :  { %v26252_v8 = vsub.f32 %v18754_v36, %v18790_v40 }
0x1902   :  { %v19208_v19 = vpop.permute.xlu1 %19207  ;;  %v18374_v35 = vsub.f32 %v18305_v60, %v18373_v41  ;;  %23906 = vmatmul.mubr.f32.vlgmr.msra.gmra.mxu1 %v18373_v41 }
0x1903   :  { %v18868_v21 = vand.u32 4294901760, %v26252_v8  ;;  %v19211_v25 = vsel %vm1534_vm2, %v19208_v19, 0  ;;  %23914 = vmatpush3.msra.mxu1 %v18338_v48  ;;  %23915 = vmatprep.mubr.msk.f32.mxu1 %vm24283_vm1, %v24282_v51 }
0x1904   :  { %23923 = vmatprep.subr.mxu1 %v24282_v51  ;;  %v18375_v24 = vand.u32 4294901760, %v18374_v35  ;;  %v26262_v29 = vand.u32 4294901760, %v19211_v25 }
0x1905   :  { %v18869_v27 = vsub.f32 %v26252_v8, %v18868_v21 }
0x1906   :  { %23916 = vmatmul.mubr.f32.vlgmr.msra.gmra.mxu1 %v18375_v24  ;;  %v18376_v38 = vsub.f32 %v18374_v35, %v18375_v24  ;;  %v26268_v7 = vsub.f32 %v19211_v25, %v26262_v29  ;;  %v19662_v54 = vpop.permute.xlu1 %19661 }
0x1907   :  { %v18870_v39 = vand.u32 4294901760, %v18869_v27  ;;  %23924 = vmatpush3.msra.mxu1 %v18338_v48  ;;  %23925 = vmatprep.mubr.msk.f32.mxu1 %vm24283_vm1, %v24282_v51  ;;  %v19665_v15 = vsel %vm1534_vm2, %v19662_v54, 0 }
0x1908   :  { %v24224_v59 = vpop.eup %24223  ;;  %23933 = vmatprep.subr.mxu1 %v24282_v51  ;;  %v18377_v44 = vand.u32 4294901760, %v18376_v38  ;;  %v19322_v56 = vand.u32 4294901760, %v26268_v7  ;;  %v26288_v52 = vand.u32 4294901760, %v19665_v15 }
0x1909   :  { %v18300_v3 = vmul.f32 %v24224_v59, %v24220_v37  ;;  %v19735_v37 = vand.u32 4294901760, %v19734_v17 }
0x190a   :  { %23901 = vmatmul.mubr.f32.vlgmr.msra.gmra.mxu0 %v18377_v44  ;;  %23926 = vmatmul.mubr.f32.vlgmr.msra.gmra.mxu1 %v18373_v41  ;;  %v19323_v46 = vsub.f32 %v26268_v7, %v19322_v56  ;;  %v26298_v50 = vsub.f32 %v19665_v15, %v26288_v52 }
0x190b   :  { %23909 = vmatpush3.msra.mxu0 %v18415_v49  ;;  %23934 = vmatpush3.msra.mxu1 %v18870_v39  ;;  %v18757_v13 = vsel %vm1534_vm2, %v18300_v3, 0  ;;  %v19736_v62 = vsub.f32 %v19734_v17, %v19735_v37 }
0x190c   :  { %23910 = vmatprep.mubr.msk.f32.mxu0 %vm24283_vm1, %v24282_v51  ;;  %23918 = vmatprep.subr.mxu0 %v24282_v51  ;;  %v18825_v57 = vand.u32 4294901760, %v18757_v13  ;;  %v19324_v0 = vand.u32 4294901760, %v19323_v46  ;;  %v19776_v9 = vand.u32 4294901760, %v26298_v50 }
0x190d   :  { %23935 = vmatprep.mubr.msk.f32.mxu1 %vm24283_vm1, %v24282_v51  ;;  %23943 = vmatprep.subr.mxu1 %v24282_v51  ;;  %v19737_v45 = vand.u32 4294901760, %v19736_v62 }
0x190e   :  { %23911 = vmatmul.mubr.f32.vlgmr.msra.gmra.mxu0 %v18374_v35  ;;  %v18826_v4 = vsub.f32 %v18757_v13, %v18825_v57  ;;  %23936 = vmatmul.mubr.f32.vlgmr.msra.gmra.mxu1 %v18825_v57  ;;  %v19777_v11 = vsub.f32 %v26298_v50, %v19776_v9 }
0x190f   :  { %23919 = vmatpush3.msra.mxu0 %v18416_v10  ;;  %23944 = vmatpush3.msra.mxu1 %v18790_v40 }
0x1910   :  { %23920 = vmatprep.mubr.msk.f32.mxu0 %vm24283_vm1, %v24282_v51  ;;  %23928 = vmatprep.subr.mxu0 %v24282_v51  ;;  %v18827_v20 = vand.u32 4294901760, %v18826_v4  ;;  %v19778_v34 = vand.u32 4294901760, %v19777_v11 }
0x1911   :  { %23945 = vmatprep.mubr.msk.f32.mxu1 %vm24283_vm1, %v24282_v51  ;;  %23953 = vmatprep.subr.mxu1 %v24282_v51 }
0x1912   :  { %23921 = vmatmul.mubr.f32.vlgmr.msra.gmra.mxu0 %v18373_v41  ;;  %23946 = vmatmul.mubr.f32.vlgmr.msra.gmra.mxu1 %v18827_v20  ;;  %v18828_v23 = vsub.f32 %v18826_v4, %v18827_v20 }
0x1913   :  { %23929 = vmatpush3.msra.mxu0 %v18790_v40  ;;  %23954 = vmatpush3.msra.mxu1 %v18790_v40 }
0x1914   :  { %23930 = vmatprep.mubr.msk.f32.mxu0 %vm24283_vm1, %v24282_v51  ;;  %23938 = vmatprep.subr.mxu0 %v24282_v51  ;;  %v18829_v43 = vand.u32 4294901760, %v18828_v23 }
0x1915   :  { %23955 = vmatprep.mubr.msk.f32.mxu1 %vm24283_vm1, %v24282_v51  ;;  %23963 = vmatprep.subr.mxu1 %v24282_v51 }
0x1916   :  { %23931 = vmatmul.mubr.f32.vlgmr.msra.gmra.mxu0 %v18829_v43  ;;  %23956 = vmatmul.mubr.f32.vlgmr.msra.gmra.mxu1 %v18825_v57 }
0x1917   :  { %23939 = vmatpush3.msra.mxu0 %v26252_v8  ;;  %23964 = vmatpush3.xpose.msra.mxu1 %v19324_v0 }
0x1918   :  { %23940 = vmatprep.mubr.msk.f32.mxu0 %vm24283_vm1, %v24282_v51  ;;  %23948 = vmatprep.subr.mxu0 %v24282_v51 }
0x1919   :  { %23965 = vmatprep.mubr.msk.f32.mxu1 %vm24283_vm1, %v24282_v51  ;;  %23973 = vmatprep.subr.mxu1 %v24282_v51 }
0x191a   :  { %23941 = vmatmul.mubr.f32.vlgmr.msra.gmra.mxu0 %v18826_v4  ;;  %23966 = vmatmul.mubr.f32.vlgmr.msra.gmra.mxu1 %v26280_v1 }
0x191b   :  { %23949 = vmatpush3.msra.mxu0 %v18868_v21  ;;  %23974 = vmatpush3.xpose.msra.mxu1 %v26262_v29 }
0x191c   :  { %23950 = vmatprep.mubr.msk.f32.mxu0 %vm24283_vm1, %v24282_v51  ;;  %23958 = vmatprep.subr.mxu0 %v24282_v51 }
0x191d   :  { %23975 = vmatprep.mubr.msk.f32.mxu1 %vm24283_vm1, %v24282_v51  ;;  %23983 = vmatprep.subr.mxu1 %v24282_v51 }
0x191e   :  { %23951 = vmatmul.mubr.f32.vlgmr.msra.gmra.mxu0 %v18825_v57  ;;  %23976 = vmatmul.mubr.f32.vlgmr.msra.gmra.mxu1 %v19281_v26 }
0x191f   :  { %23959 = vmatpush3.xpose.msra.mxu0 %v26262_v29  ;;  %23984 = vmatpush3.xpose.msra.mxu1 %v26262_v29 }
0x1920   :  { %23960 = vmatprep.mubr.msk.f32.mxu0 %vm24283_vm1, %v24282_v51  ;;  %23968 = vmatprep.subr.mxu0 %v24282_v51 }
0x1921   :  { %23985 = vmatprep.mubr.msk.f32.mxu1 %vm24283_vm1, %v24282_v51  ;;  %23993 = vmatprep.subr.mxu1 %v24282_v51 }
0x1922   :  { %23961 = vmatmul.mubr.f32.vlgmr.msra.gmra.mxu0 %v19283_v16  ;;  %23986 = vmatmul.mubr.f32.vlgmr.msra.gmra.mxu1 %v26280_v1 }
0x1923   :  { %23969 = vmatpush3.xpose.msra.mxu0 %v26268_v7  ;;  %23994 = vmatpush3.xpose.msra.mxu1 %v19778_v34 }
0x1924   :  { %23970 = vmatprep.mubr.msk.f32.mxu0 %vm24283_vm1, %v24282_v51  ;;  %23978 = vmatprep.subr.mxu0 %v24282_v51 }
0x1925   :  { %23995 = vmatprep.mubr.msk.f32.mxu1 %vm24283_vm1, %v24282_v51  ;;  %24003 = vmatprep.subr.mxu1 %v24282_v51 }
0x1926   :  { %23971 = vmatmul.mubr.f32.vlgmr.msra.gmra.mxu0 %v19280_v42  ;;  %23996 = vmatmul.mubr.f32.vlgmr.msra.gmra.mxu1 %v19733_v61 }
0x1927   :  { %23979 = vmatpush3.xpose.msra.mxu0 %v19322_v56  ;;  %24004 = vmatpush3.xpose.msra.mxu1 %v26288_v52 }
0x1928   :  { %23980 = vmatprep.mubr.msk.f32.mxu0 %vm24283_vm1, %v24282_v51  ;;  %23988 = vmatprep.subr.mxu0 %v24282_v51 }
0x1929   :  { %24005 = vmatprep.mubr.msk.f32.mxu1 %vm24283_vm1, %v24282_v51  ;;  %24013 = vmatprep.subr.mxu1 %v24282_v51 }
0x192a   :  { %23981 = vmatmul.mubr.f32.vlgmr.msra.gmra.mxu0 %v26280_v1  ;;  %24006 = vmatmul.mubr.f32.vlgmr.msra.gmra.mxu1 %v19735_v37 }
0x192b   :  { %23989 = vmatpush3.xpose.msra.mxu0 %v26288_v52  ;;  %24014 = vmatpush3.xpose.msra.mxu1 %v26288_v52 }
0x192c   :  { %23990 = vmatprep.mubr.msk.f32.mxu0 %vm24283_vm1, %v24282_v51  ;;  %23998 = vmatprep.subr.mxu0 %v24282_v51 }
0x192d   :  { %24015 = vmatprep.mubr.msk.f32.mxu1 %vm24283_vm1, %v24282_v51  ;;  %24023 = vmatprep.subr.mxu1 %v24282_v51 }
0x192e   :  { %23991 = vmatmul.mubr.f32.vlgmr.msra.gmra.mxu0 %v19737_v45  ;;  %24016 = vmatmul.mubr.f32.vlgmr.msra.gmra.mxu1 %v19733_v61 }
0x192f   :  { %23999 = vmatpush3.xpose.msra.mxu0 %v26298_v50  ;;  %24000 = vmatprep.mubr.msk.f32.mxu0 %vm24283_vm1, %v24282_v51 }
0x1930   :  { %24008 = vmatprep.subr.mxu0 %v24282_v51  ;;  %24025 = vmatprep.mubr.msk.f32.mxu1 %vm24283_vm1, %v24282_v51 }
0x1932   :  { %24001 = vmatmul.mubr.f32.vlgmr.msra.gmra.mxu0 %v19734_v17 }
0x1933   :  { %24009 = vmatpush3.xpose.msra.mxu0 %v19776_v9  ;;  %24010 = vmatprep.mubr.msk.f32.mxu0 %vm24283_vm1, %v24282_v51 }
0x1934   :  { %24018 = vmatprep.subr.mxu0 %v24282_v51 }
0x1936   :  { %24011 = vmatmul.mubr.f32.vlgmr.msra.gmra.mxu0 %v19733_v61 }
0x1937   :  { %24020 = vmatprep.mubr.msk.f32.mxu0 %vm24283_vm1, %v24282_v51 }
0x19c2   :  { %v18455_v47 = vpop.f32.mrf.mxu1 }
0x19c4   :  { %v23907_v48 = vpop.f32.mrf.mxu1 }
0x19c6   :  { %v18603_v49 = vpop.f32.mrf.mxu1 }
0x19c8   :  { %v23917_v10 = vpop.f32.mrf.mxu1 }
0x19ca   :  { %v18379_v53 = vpop.f32.mrf.mxu0  ;;  %v18749_v55 = vpop.f32.mrf.mxu1 }
0x19cb   :  { %v18456_v28 = vadd.f32 %v18455_v47, %v18379_v53 }
0x19cc   :  { %v23902_v30 = vpop.f32.mrf.mxu0  ;;  %v23927_v33 = vpop.f32.mrf.mxu1 }
0x19ce   :  { %v18529_v36 = vpop.f32.mrf.mxu0  ;;  %v18907_v40 = vpop.f32.mrf.mxu1 }
0x19cf   :  { %v18530_v60 = vadd.f32 %v18529_v36, %v18456_v28 }
0x19d0   :  { %v23912_v41 = vpop.f32.mrf.mxu0  ;;  %v23937_v8 = vpop.f32.mrf.mxu1 }
0x19d1   :  { %v18604_v19 = vadd.f32 %v18603_v49, %v18530_v60 }
0x19d2   :  { %v18677_v35 = vpop.f32.mrf.mxu0  ;;  %v19055_v21 = vpop.f32.mrf.mxu1 }
0x19d3   :  { %v18678_v25 = vadd.f32 %v18677_v35, %v18604_v19 }
0x19d4   :  { %v23922_v24 = vpop.f32.mrf.mxu0  ;;  %v23947_v27 = vpop.f32.mrf.mxu1 }
0x19d5   :  { %v26368_v29 = vadd.f32 %v18749_v55, %v18678_v25 }
0x19d6   :  { %v18831_v38 = vpop.f32.mrf.mxu0  ;;  %v19201_v39 = vpop.f32.mrf.mxu1 }
0x19d7   :  { %v18908_v59 = vadd.f32 %v18907_v40, %v18831_v38 }
0x19d8   :  { %v23932_v44 = vpop.f32.mrf.mxu0  ;;  %v23957_v3 = vpop.f32.mrf.mxu1 }
0x19da   :  { %v18981_v7 = vpop.f32.mrf.mxu0  ;;  %v19361_v18 = vpop.f32.mrf.mxu1 }
0x19db   :  { %v18982_v54 = vadd.f32 %v18981_v7, %v18908_v59 }
0x19dc   :  { %v23942_v13 = vpop.f32.mrf.mxu0  ;;  %v23967_v57 = vpop.f32.mrf.mxu1 }
0x19dd   :  { %v19056_v6 = vadd.f32 %v19055_v21, %v18982_v54 }
0x19de   :  { %v19129_v56 = vpop.f32.mrf.mxu0  ;;  %v19509_v15 = vpop.f32.mrf.mxu1 }
0x19df   :  { %v19130_v4 = vadd.f32 %v19129_v56, %v19056_v6 }
0x19e0   :  { %v23952_v1 = vpop.f32.mrf.mxu0  ;;  %v23977_v20 = vpop.f32.mrf.mxu1 }
0x19e1   :  { %v19202_v46 = vadd.f32 %v19201_v39, %v19130_v4 }
0x19e2   :  { %v19285_v52 = vpop.f32.mrf.mxu0  ;;  %v19655_v23 = vpop.f32.mrf.mxu1 }
0x19e3   :  { %v19362_v0 = vadd.f32 %v19361_v18, %v19285_v52 }
0x19e4   :  { %v23962_v42 = vpop.f32.mrf.mxu0  ;;  %v23987_v43 = vpop.f32.mrf.mxu1 }
0x19e6   :  { %v19435_v50 = vpop.f32.mrf.mxu0  ;;  %v19815_v63 = vpop.f32.mrf.mxu1 }
0x19e7   :  { %v19436_v26 = vadd.f32 %v19435_v50, %v19362_v0 }
0x19e8   :  { %v23972_v2 = vpop.f32.mrf.mxu0  ;;  %v23997_v9 = vpop.f32.mrf.mxu1 }
0x19e9   :  { %v19510_v31 = vadd.f32 %v19509_v15, %v19436_v26 }
0x19ea   :  { %v19583_v61 = vpop.f32.mrf.mxu0  ;;  %v19963_v11 = vpop.f32.mrf.mxu1 }
0x19eb   :  { %v19584_v16 = vadd.f32 %v19583_v61, %v19510_v31 }
0x19ec   :  { %v23982_v17 = vpop.f32.mrf.mxu0  ;;  %v24007_v34 = vpop.f32.mrf.mxu1 }
0x19ed   :  { %v19656_v37 = vadd.f32 %v19655_v23, %v19584_v16  ;;  %v21639_v17 = vld [vmem:[%s26540_s8 + $0x58] sm:$0xff] }
0x19ee   :  { %v19739_v62 = vpop.f32.mrf.mxu0  ;;  %v20109_v45 = vpop.f32.mrf.mxu1 }
0x19ef   :  { %v20113_v47 = vsel %vm1534_vm2, %v19656_v37, -inf  ;;  %v19816_v10 = vadd.f32 %v19815_v63, %v19739_v62  ;;  %v21638_v62 = vld [vmem:[%s26540_s8 + $0x50] sm:$0xff] }
0x19f0   :  { %v24017_v48 = vpop.f32.mrf.mxu1  ;;  %20114 = vmax.xlane.f32.xlu1 %v20113_v47  ;;  %v23992_v49 = vpop.f32.mrf.mxu0 }
0x19f1   :  { %v21637_v49 = vld [vmem:[%s26540_s8 + $0x48] sm:$0xff] }
0x19f2   :  { %v19889_v53 = vpop.f32.mrf.mxu0 }
0x19f3   :  { %v19890_v55 = vadd.f32 %v19889_v53, %v19816_v10 }
0x19f4   :  { %v24002_v28 = vpop.f32.mrf.mxu0 }
0x19f5   :  { %v19964_v30 = vadd.f32 %v19963_v11, %v19890_v55 }
0x19f6   :  { %v20037_v33 = vpop.f32.mrf.mxu0 }
0x19f7   :  { %v20038_v36 = vadd.f32 %v20037_v33, %v19964_v30  ;;  %v26441_v30 = vand.u32 4294901760, %v21637_v49 }
0x19f8   :  { %v24012_v40 = vpop.f32.mrf.mxu0 }
0x19f9   :  { %v20110_v60 = vadd.f32 %v20109_v45, %v20038_v36  ;;  %v21636_v36 = vld [vmem:[%s26540_s8 + $0x40] sm:$0xff] }
0x19fb   :  { %v20116_v41 = vsel %vm1534_vm2, %v20110_v60, -inf }
0x19fc   :  { %20117 = vmax.xlane.f32.xlu0 %v20116_v41 }
0x1a79   :  { %v20115_v8 = vpop.xlane.xlu1 %20114 }
0x1a7a   :  { %v20119_v19 = vsub.f32 %v19656_v37, %v20115_v8  ;;  %v26420_v37 = vand.u32 4294901760, %v21639_v17 }
0x1a7c   :  { %v20121_v35 = vmul.f32 1.442695, %v20119_v19  ;;  %v26426_v48 = vsub.f32 %v21639_v17, %v26420_v37  ;;  %v26454_v19 = vsub.f32 %v21637_v49, %v26441_v30 }
0x1a7e   :  { %24225 = vpow2.f32 %v20121_v35  ;;  %v26436_v55 = vand.u32 4294901760, %v26426_v48  ;;  %v26456_v35 = vand.u32 4294901760, %v21636_v36 }
0x1a80   :  { %v21198_v41 = vsub.f32 %v26426_v48, %v26436_v55 }
0x1a85   :  { %v20118_v21 = vpop.xlane.xlu0 %20117 }
0x1a86   :  { %v20120_v25 = vsub.f32 %v20110_v60, %v20118_v21 }
0x1a88   :  { %v20123_v24 = vmul.f32 1.442695, %v20120_v25 }
0x1a8a   :  { %24227 = vpow2.f32 %v20123_v24 }
0x1a8b   :  { %v24226_v27 = vpop.eup %24225 }
0x1a8c   :  { %v20125_v38 = vsel %vm1534_vm2, %v24226_v27, 0.0 }
0x1a8d   :  { %20126 = vadd.xlane.f32.xlu0 %v20125_v38 }
0x1a97   :  { %v24228_v39 = vpop.eup %24227 }
0x1a98   :  { %v20128_v59 = vsel %vm1534_vm2, %v24228_v39, 0.0 }
0x1a99   :  { %20129 = vadd.xlane.f32.xlu1 %v20128_v59  ;;  %v26466_v59 = vsub.f32 %v21636_v36, %v26456_v35 }
0x1aa3   :  { %20135 = vrot.lane.b32.xlu0 %v25904_v5, %s24291_s30 }
0x1aa7   :  { %21043 = vrot.lane.b32.xlu0 %v26231_v32, %s24280_s25 }
0x1aaa   :  { %20587 = vrot.lane.b32.xlu1 %v25902_v22, %s24291_s30 }
0x1aab   :  { %21051 = vrot.lane.b32.xlu0 %v19202_v46, %s24292_s13 }
0x1aae   :  { %21041 = vrot.lane.b32.xlu1 %v26229_v14, %s24280_s25 }
0x1ab2   :  { %21049 = vrot.lane.b32.xlu1 %v26368_v29, %s24292_s13 }
0x1b16   :  { %v20127_v44 = vpop.xlane.xlu0 %20126 }
0x1b17   :  { %24229 = vrcp.f32 %v20127_v44 }
0x1b1a   :  { %v20136_v3 = vpop.permute.xlu0 %20135 }
0x1b1b   :  { %v20172_v7 = vand.u32 4294901760, %v20136_v3 }
0x1b1d   :  { %v20249_v18 = vsub.f32 %v20136_v3, %v20172_v7  ;;  %24019 = vmatpush3.msra.mxu0 %v20172_v7 }
0x1b1e   :  { %24028 = vmatprep.subr.mxu0 %v24282_v51 }
0x1b1f   :  { %v20250_v5 = vand.u32 4294901760, %v20249_v18 }
0x1b21   :  { %v20251_v32 = vsub.f32 %v20249_v18, %v20250_v5 }
0x1b22   :  { %v20130_v54 = vpop.xlane.xlu1 %20129 }
0x1b23   :  { %v20252_v22 = vand.u32 4294901760, %v20251_v32  ;;  %24231 = vrcp.f32 %v20130_v54  ;;  %v26473_v32 = vand.u32 4294901760, %v26466_v59 }
0x1b24   :  { %v24230_v13 = vpop.eup %24229 }
0x1b25   :  { %v20132_v57 = vmul.f32 %v24230_v13, %v24226_v27  ;;  %24024 = vmatpush3.msra.mxu1 %v20252_v22  ;;  %v21199_v27 = vand.u32 4294901760, %v21198_v41 }
0x1b26   :  { %v20588_v14 = vpop.permute.xlu1 %20587  ;;  %24033 = vmatprep.subr.mxu1 %v24282_v51 }
0x1b27   :  { %v20624_v29 = vand.u32 4294901760, %v20588_v14  ;;  %v20139_v6 = vsel %vm1534_vm2, %v20132_v57, 0 }
0x1b28   :  { %v20207_v56 = vand.u32 4294901760, %v20139_v6 }
0x1b29   :  { %v20701_v15 = vsub.f32 %v20588_v14, %v20624_v29  ;;  %v21219_v14 = vsub.f32 %v26466_v59, %v26473_v32 }
0x1b2a   :  { %v20208_v4 = vsub.f32 %v20139_v6, %v20207_v56  ;;  %24026 = vmatmul.mubr.f32.vlgmr.msra.gmra.mxu1 %v20207_v56 }
0x1b2b   :  { %v20702_v1 = vand.u32 4294901760, %v20701_v15  ;;  %24034 = vmatpush3.msra.mxu1 %v20172_v7  ;;  %24035 = vmatprep.mubr.msk.f32.mxu1 %vm24283_vm1, %v24282_v51 }
0x1b2c   :  { %24043 = vmatprep.subr.mxu1 %v24282_v51  ;;  %v20209_v20 = vand.u32 4294901760, %v20208_v4 }
0x1b2d   :  { %v20703_v46 = vsub.f32 %v20701_v15, %v20702_v1 }
0x1b2e   :  { %24036 = vmatmul.mubr.f32.vlgmr.msra.gmra.mxu1 %v20209_v20  ;;  %v20210_v52 = vsub.f32 %v20208_v4, %v20209_v20 }
0x1b2f   :  { %v20704_v23 = vand.u32 4294901760, %v20703_v46  ;;  %24044 = vmatpush3.msra.mxu1 %v20172_v7  ;;  %24045 = vmatprep.mubr.msk.f32.mxu1 %vm24283_vm1, %v24282_v51 }
0x1b30   :  { %v24232_v42 = vpop.eup %24231  ;;  %24053 = vmatprep.subr.mxu1 %v24282_v51  ;;  %v20211_v43 = vand.u32 4294901760, %v20210_v52 }
0x1b31   :  { %v20134_v0 = vmul.f32 %v24232_v42, %v24228_v39  ;;  %v26463_v39 = vand.u32 4294901760, %v26454_v19 }
0x1b32   :  { %24021 = vmatmul.mubr.f32.vlgmr.msra.gmra.mxu0 %v20211_v43  ;;  %24046 = vmatmul.mubr.f32.vlgmr.msra.gmra.mxu1 %v20207_v56 }
0x1b33   :  { %24029 = vmatpush3.msra.mxu0 %v20249_v18  ;;  %24054 = vmatpush3.msra.mxu1 %v20704_v23  ;;  %v20591_v50 = vsel %vm1534_vm2, %v20134_v0, 0 }
0x1b34   :  { %24030 = vmatprep.mubr.msk.f32.mxu0 %vm24283_vm1, %v24282_v51  ;;  %24038 = vmatprep.subr.mxu0 %v24282_v51  ;;  %v20659_v63 = vand.u32 4294901760, %v20591_v50 }
0x1b35   :  { %24055 = vmatprep.mubr.msk.f32.mxu1 %vm24283_vm1, %v24282_v51  ;;  %24063 = vmatprep.subr.mxu1 %v24282_v51 }
0x1b36   :  { %24031 = vmatmul.mubr.f32.vlgmr.msra.gmra.mxu0 %v20208_v4  ;;  %v20660_v26 = vsub.f32 %v20591_v50, %v20659_v63  ;;  %24056 = vmatmul.mubr.f32.vlgmr.msra.gmra.mxu1 %v20659_v63 }
0x1b37   :  { %24039 = vmatpush3.msra.mxu0 %v20250_v5  ;;  %24064 = vmatpush3.msra.mxu1 %v20624_v29  ;;  %v21212_v5 = vsub.f32 %v26454_v19, %v26463_v39 }
0x1b38   :  { %24040 = vmatprep.mubr.msk.f32.mxu0 %vm24283_vm1, %v24282_v51  ;;  %24048 = vmatprep.subr.mxu0 %v24282_v51  ;;  %v20661_v2 = vand.u32 4294901760, %v20660_v26 }
0x1b39   :  { %24065 = vmatprep.mubr.msk.f32.mxu1 %vm24283_vm1, %v24282_v51  ;;  %24073 = vmatprep.subr.mxu1 %v24282_v51  ;;  %v21213_v57 = vand.u32 4294901760, %v21212_v5 }
0x1b3a   :  { %24041 = vmatmul.mubr.f32.vlgmr.msra.gmra.mxu0 %v20207_v56  ;;  %24066 = vmatmul.mubr.f32.vlgmr.msra.gmra.mxu1 %v20661_v2  ;;  %v20662_v9 = vsub.f32 %v20660_v26, %v20661_v2 }
0x1b3b   :  { %24049 = vmatpush3.msra.mxu0 %v20624_v29  ;;  %24074 = vmatpush3.msra.mxu1 %v20624_v29 }
0x1b3c   :  { %24050 = vmatprep.mubr.msk.f32.mxu0 %vm24283_vm1, %v24282_v51  ;;  %24058 = vmatprep.subr.mxu0 %v24282_v51  ;;  %v20663_v31 = vand.u32 4294901760, %v20662_v9 }
0x1b3d   :  { %24075 = vmatprep.mubr.msk.f32.mxu1 %vm24283_vm1, %v24282_v51  ;;  %24089 = vmatprep.subr.mxu1 %v21199_v27 }
0x1b3e   :  { %24051 = vmatmul.mubr.f32.vlgmr.msra.gmra.mxu0 %v20663_v31  ;;  %24076 = vmatmul.mubr.f32.vlgmr.msra.gmra.mxu1 %v20659_v63 }
0x1b3f   :  { %24059 = vmatpush3.msra.mxu0 %v20701_v15  ;;  %24060 = vmatprep.mubr.msk.f32.mxu0 %vm24283_vm1, %v24282_v51  ;;  %v21220_v15 = vand.u32 4294901760, %v21219_v14 }
0x1b40   :  { %24068 = vmatprep.subr.mxu0 %v24282_v51  ;;  %24090 = vmatpush3.msra.mxu1 %v21199_v27 }
0x1b42   :  { %24061 = vmatmul.mubr.f32.vlgmr.msra.gmra.mxu0 %v20660_v26  ;;  %v21042_v26 = vpop.permute.xlu1 %21041 }
0x1b43   :  { %24069 = vmatpush3.msra.mxu0 %v20702_v1  ;;  %24070 = vmatprep.mubr.msk.f32.mxu0 %vm24283_vm1, %v24282_v51  ;;  %v26428_v51 = vand.u32 4294901760, %v21638_v62  ;;  %v21063_v9 = vsel %vm1534_vm2, %v26090_v58, %v21042_v26 }
0x1b44   :  { %24078 = vmatprep.subr.mxu0 %v26420_v37 }
0x1b45   :  { %v26439_v28 = vsub.f32 %v21638_v62, %v26428_v51 }
0x1b46   :  { %24071 = vmatmul.mubr.f32.vlgmr.msra.gmra.mxu0 %v20659_v63  ;;  %v21050_v2 = vpop.permute.xlu1 %21049 }
0x1b47   :  { %24079 = vmatpush3.msra.mxu0 %v26420_v37  ;;  %v26451_v8 = vand.u32 4294901760, %v26439_v28  ;;  %v21065_v31 = vsel %vm11452_vm4, %v21063_v9, %v21050_v2 }
0x1b48   :  { %24080 = vmatprep.subr.mxu0 %v26428_v51 }
0x1b49   :  { %24081 = vmatpush3.msra.mxu0 %v26428_v51  ;;  %v21205_v38 = vsub.f32 %v26439_v28, %v26451_v8 }
0x1b4a   :  { %24082 = vmatprep.subr.mxu0 %v26441_v30 }
0x1b4b   :  { %24083 = vmatpush3.msra.mxu0 %v26441_v30  ;;  %v21206_v18 = vand.u32 4294901760, %v21205_v38 }
0x1b4c   :  { %24084 = vmatprep.subr.mxu0 %v26456_v35 }
0x1b4d   :  { %24085 = vmatpush3.msra.mxu0 %v26456_v35  ;;  %24091 = vmatprep.subr.mxu1 %v21206_v18 }
0x1b4e   :  { %24100 = vmatprep.subr.mxu0 %v26426_v48  ;;  %24092 = vmatpush3.msra.mxu1 %v21206_v18 }
0x1b4f   :  { %24093 = vmatprep.subr.mxu1 %v21213_v57 }
0x1b50   :  { %24094 = vmatpush3.msra.mxu1 %v21213_v57 }
0x1b51   :  { %24095 = vmatprep.subr.mxu1 %v21220_v15 }
0x1b52   :  { %24096 = vmatpush3.msra.mxu1 %v21220_v15 }
0x1b53   :  { %24111 = vmatprep.subr.mxu1 %v26420_v37 }
0x1bea   :  { %v20289_v61 = vpop.f32.mrf.mxu1 }
0x1bec   :  { %v24027_v11 = vpop.f32.mrf.mxu1 }
0x1bee   :  { %v20437_v16 = vpop.f32.mrf.mxu1 }
0x1bf0   :  { %v24037_v34 = vpop.f32.mrf.mxu1 }
0x1bf2   :  { %v20213_v45 = vpop.f32.mrf.mxu0  ;;  %v20583_v47 = vpop.f32.mrf.mxu1 }
0x1bf3   :  { %v20290_v33 = vadd.f32 %v20289_v61, %v20213_v45 }
0x1bf4   :  { %v24022_v10 = vpop.f32.mrf.mxu0  ;;  %v24047_v53 = vpop.f32.mrf.mxu1 }
0x1bf6   :  { %v20363_v40 = vpop.f32.mrf.mxu0  ;;  %v20741_v60 = vpop.f32.mrf.mxu1 }
0x1bf7   :  { %v20364_v21 = vadd.f32 %v20363_v40, %v20290_v33 }
0x1bf8   :  { %v24032_v25 = vpop.f32.mrf.mxu0  ;;  %v24057_v24 = vpop.f32.mrf.mxu1 }
0x1bf9   :  { %v20438_v44 = vadd.f32 %v20437_v16, %v20364_v21  ;;  %v21044_v16 = vpop.permute.xlu0 %21043 }
0x1bfa   :  { %v20511_v3 = vpop.f32.mrf.mxu0  ;;  %v20889_v7 = vpop.f32.mrf.mxu1  ;;  %v21064_v10 = vsel %vm1534_vm2, %v26092_v12, %v21044_v16 }
0x1bfb   :  { %v20512_v54 = vadd.f32 %v20511_v3, %v20438_v44 }
0x1bfc   :  { %v24042_v22 = vpop.f32.mrf.mxu0  ;;  %v24067_v13 = vpop.f32.mrf.mxu1 }
0x1bfd   :  { %v20584_v29 = vadd.f32 %v20583_v47, %v20512_v54  ;;  %v21052_v47 = vpop.permute.xlu0 %21051 }
0x1bfe   :  { %v20665_v6 = vpop.f32.mrf.mxu0  ;;  %v21035_v56 = vpop.f32.mrf.mxu1  ;;  %v21066_v58 = vsel %vm11452_vm4, %v21064_v10, %v21052_v47 }
0x1bff   :  { %21057 = vrot.lane.b32.xlu1 %v20584_v29, %s24293_s1  ;;  %v20742_v20 = vadd.f32 %v20741_v60, %v20665_v6 }
0x1c00   :  { %v24052_v4 = vpop.f32.mrf.mxu0  ;;  %v24077_v1 = vpop.f32.mrf.mxu1 }
0x1c02   :  { %v20815_v46 = vpop.f32.mrf.mxu0 }
0x1c03   :  { %v20816_v52 = vadd.f32 %v20815_v46, %v20742_v20 }
0x1c04   :  { %v24062_v23 = vpop.f32.mrf.mxu0 }
0x1c05   :  { %v20890_v42 = vadd.f32 %v20889_v7, %v20816_v52 }
0x1c06   :  { %v20963_v43 = vpop.f32.mrf.mxu0 }
0x1c07   :  { %v20964_v0 = vadd.f32 %v20963_v43, %v20890_v42 }
0x1c08   :  { %v24072_v50 = vpop.f32.mrf.mxu0 }
0x1c09   :  { %v21036_v63 = vadd.f32 %v21035_v56, %v20964_v0 }
0x1c0b   :  { %21059 = vrot.lane.b32.xlu0 %v21036_v63, %s24293_s1 }
0x1c71   :  { %v21058_v61 = vpop.permute.xlu1 %21057 }
0x1c72   :  { %v21067_v11 = vsel %vm11455_vm3, %v21065_v31, %v21058_v61 }
0x1c73   :  { %v21076_v17 = vsel %vm84_vm0, %v21067_v11, 0 }
0x1c74   :  { %v21150_v34 = vand.u32 4294901760, %v21076_v17 }
0x1c76   :  { %v21151_v62 = vsub.f32 %v21076_v17, %v21150_v34  ;;  %24097 = vmatprep.mubr.f32.mxu1 %v21150_v34 }
0x1c78   :  { %v21152_v45 = vand.u32 4294901760, %v21151_v62 }
0x1c7a   :  { %v21153_v49 = vsub.f32 %v21151_v62, %v21152_v45 }
0x1c7c   :  { %v21154_v53 = vand.u32 4294901760, %v21153_v49 }
0x1c7d   :  { %v21060_v33 = vpop.permute.xlu0 %21059 }
0x1c7e   :  { %v21068_v36 = vsel %vm11455_vm3, %v21066_v58, %v21060_v33  ;;  %24086 = vmatprep.mubr.f32.mxu0 %v21154_v53 }
0x1c7f   :  { %v21079_v40 = vsel %vm84_vm0, %v21068_v36, 0 }
0x1c80   :  { %v21160_v60 = vand.u32 4294901760, %v21079_v40 }
0x1c82   :  { %v21161_v41 = vsub.f32 %v21079_v40, %v21160_v60  ;;  %24098 = vmatmul.mubr.f32.vlgmr.msra.gmra.mxu1 %v21160_v60 }
0x1c83   :  { %24112 = vmatpush3.msra.mxu1 %v26420_v37  ;;  %24119 = vmatprep.mubr.f32.mxu1 %v21152_v45 }
0x1c84   :  { %v21162_v21 = vand.u32 4294901760, %v21161_v41  ;;  %24113 = vmatprep.subr.mxu1 %v26428_v51 }
0x1c85   :  { %24114 = vmatpush3.msra.mxu1 %v26428_v51 }
0x1c86   :  { %v21163_v12 = vsub.f32 %v21161_v41, %v21162_v21  ;;  %24115 = vmatprep.subr.mxu1 %v26441_v30 }
0x1c87   :  { %24116 = vmatpush3.msra.mxu1 %v26441_v30 }
0x1c88   :  { %v21164_v25 = vand.u32 4294901760, %v21163_v12  ;;  %24117 = vmatprep.subr.mxu1 %v26456_v35 }
0x1c89   :  { %24118 = vmatpush3.msra.mxu1 %v26456_v35 }
0x1c8a   :  { %24120 = vmatmul.mubr.f32.vlgmr.msra.gmra.mxu1 %v21162_v21  ;;  %24133 = vmatprep.subr.mxu1 %v26420_v37 }
0x1c8b   :  { %24087 = vmatmul.mubr.f32.vlgmr.msra.gmra.mxu0 %v21164_v25  ;;  %24134 = vmatpush3.msra.mxu1 %v26420_v37 }
0x1c8c   :  { %24101 = vmatpush3.msra.mxu0 %v26426_v48  ;;  %24141 = vmatprep.mubr.f32.mxu1 %v21150_v34  ;;  %v21641_v48 = vld [vmem:[%s26541_s9 + $0x2] ss:$0 sm:$0xff] }
0x1c8d   :  { %24102 = vmatprep.subr.mxu0 %v26439_v28  ;;  %24108 = vmatprep.mubr.f32.mxu0 %v21151_v62 }
0x1c8e   :  { %24135 = vmatprep.subr.mxu1 %v26428_v51  ;;  %24103 = vmatpush3.msra.mxu0 %v26439_v28 }
0x1c8f   :  { %24136 = vmatpush3.msra.mxu1 %v26428_v51  ;;  %24104 = vmatprep.subr.mxu0 %v26454_v19 }
0x1c90   :  { %24137 = vmatprep.subr.mxu1 %v26441_v30  ;;  %24105 = vmatpush3.msra.mxu0 %v26454_v19 }
0x1c91   :  { %24138 = vmatpush3.msra.mxu1 %v26441_v30  ;;  %24106 = vmatprep.subr.mxu0 %v26466_v59 }
0x1c92   :  { %24139 = vmatprep.subr.mxu1 %v26456_v35  ;;  %24107 = vmatpush3.msra.mxu0 %v26466_v59 }
0x1c93   :  { %24140 = vmatpush3.msra.mxu1 %v26456_v35  ;;  %24109 = vmatmul.mubr.f32.vlgmr.msra.gmra.mxu0 %v21161_v41 }
0x1c94   :  { %24122 = vmatprep.subr.mxu0 %v26436_v55  ;;  %24142 = vmatmul.mubr.f32.vlgmr.msra.gmra.mxu1 %v21160_v60 }
0x1c95   :  { %24123 = vmatpush3.msra.mxu0 %v26436_v55  ;;  %24130 = vmatprep.mubr.f32.mxu0 %v21150_v34 }
0x1c96   :  { %24124 = vmatprep.subr.mxu0 %v26451_v8 }
0x1c97   :  { %24125 = vmatpush3.msra.mxu0 %v26451_v8 }
0x1c98   :  { %24126 = vmatprep.subr.mxu0 %v26463_v39 }
0x1c99   :  { %24127 = vmatpush3.msra.mxu0 %v26463_v39 }
0x1c9a   :  { %24128 = vmatprep.subr.mxu0 %v26473_v32 }
0x1c9b   :  { %24129 = vmatpush3.msra.mxu0 %v26473_v32 }
0x1c9c   :  { %24131 = vmatmul.mubr.f32.vlgmr.msra.gmra.mxu0 %v21160_v60 }
0x1d42   :  { %v24099_v51 = vpop.f32.mrf.mxu1 }
0x1d44   :  { %v21257_v8 = vpop.f32.mrf.mxu1 }
0x1d4a   :  { %v24121_v24 = vpop.f32.mrf.mxu1 }
0x1d4b   :  { %v24088_v37 = vpop.f32.mrf.mxu0 }
0x1d4c   :  { %v21167_v28 = vadd.f32 %v24088_v37, %v21641_v48  ;;  %v21427_v44 = vpop.f32.mrf.mxu1 }
0x1d4d   :  { %v21156_v55 = vpop.f32.mrf.mxu0 }
0x1d4e   :  { %v21157_v30 = vadd.f32 %v21641_v48, %v21156_v55  ;;  %v21264_v35 = vadd.f32 %v24099_v51, %v21167_v28 }
0x1d50   :  { %v21258_v39 = vadd.f32 %v21257_v8, %v21157_v30 }
0x1d53   :  { %v24110_v19 = vpop.f32.mrf.mxu0 }
0x1d54   :  { %v21351_v38 = vadd.f32 %v24110_v19, %v21264_v35  ;;  %v24143_v7 = vpop.f32.mrf.mxu1 }
0x1d55   :  { %v21343_v27 = vpop.f32.mrf.mxu0 }
0x1d56   :  { %v21344_v59 = vadd.f32 %v21343_v27, %v21258_v39  ;;  %v21436_v3 = vadd.f32 %v24121_v24, %v21351_v38  ;;  %v21599_v57 = vpop.f32.mrf.mxu1 }
0x1d58   :  { %v21428_v32 = vadd.f32 %v21427_v44, %v21344_v59 }
0x1d5c   :  { %v24132_v18 = vpop.f32.mrf.mxu0 }
0x1d5d   :  { %v21525_v5 = vadd.f32 %v24132_v18, %v21436_v3 }
0x1d5e   :  { %v21518_v54 = vpop.f32.mrf.mxu0 }
0x1d5f   :  { %v21606_v22 = vadd.f32 %v24143_v7, %v21525_v5  ;;  %v21519_v13 = vadd.f32 %v21518_v54, %v21428_v32 }
0x1d61   :  { %21610 = vst.msk [vmem:[%s26544_s12 + $0x8] sm:$0xff] %vm84_vm0, %v21606_v22  ;;  %v21600_v14 = vadd.f32 %v21599_v57, %v21519_v13 }
0x1d63   :  { %21609 = vst.msk [vmem:[%s26544_s12] sm:$0xff] %vm84_vm0, %v21600_v14 }
0x1d64   :  { %21615 = vsyncpa [#allocation3], 1 }
0x1d65   :  { %21616 = vsyncpa [#allocation5], 1 }

</bundles_post_ra>
